<compile_context>
chip_gen: v7x
topology: tpu7x:2x2x1
jax: 0.10.0
libtpu: 0.0.40
codegen_flags: <defaults>
</compile_context>

<pallas_src>
import functools

import jax
import jax.numpy as jnp
from jax.experimental import pallas as pl
from jax.experimental.pallas import tpu as pltpu

MEAN = jnp.array([0.485, 0.456, 0.406], jnp.float32)
STD = jnp.array([0.229, 0.224, 0.225], jnp.float32)

K_TAPS = 27          # 3 * 3 * 3 conv taps
K_PAD = 32           # im2col K padded to a nicer sublane multiple


def _round_up(a: int, b: int) -> int:
    return ((a + b - 1) // b) * b


# ---------------------------------------------------------------------------
# Kernel 1: fused (normalization-folded) conv3x3 pad=1 + bias + ReLU + 2x2/2 maxpool
# ---------------------------------------------------------------------------
def _conv_relu_pool_kernel(x_ref, w_ref, b_ref, o_ref, col_scr, y_scr, *, H, W, Wp, C, F):
    # x_ref   : (1, (H+3)*Wp, C) f32  halo-padded image flattened (row, col)-major; every conv
    #                                  tap (dy,dx) is one contiguous row-slice at offset dy*Wp+dx.
    # w_ref   : (K_PAD, F)      f32  folded conv weights, rows ordered (ky, kx, c), zero-padded.
    # b_ref   : (1, F)          f32  folded conv bias.
    # o_ref   : (1, Ho*Wo, F)  bf16  pooled activations (lane-dense, F multiple of 128).
    # col_scr : (H*Wp, K_PAD)   f32  VMEM im2col scratch.
    # y_scr   : (H*W, F)        f32  VMEM pre-pool activation scratch (bounds vreg pressure).
    Ho, Wo = H // 2, W // 2
    Ms = H * Wp                                   # matmul rows (includes Wp-W junk cols per row)

    # ---- im2col in VMEM: 9 contiguous, relayout-free row slices + zero pad band ----
    for dy in range(3):
        for dx in range(3):
            j = (dy * 3 + dx) * C
            s0 = dy * Wp + dx                      # static start -> plain slice
            col_scr[:, j:j + C] = x_ref[0, s0:s0 + Ms, :]
    col_scr[:, 9 * C:] = jnp.zeros((Ms, K_PAD - 9 * C), jnp.float32)

    # ---- single wide-K MXU matmul (was 9 K=3 matmuls) + f32 bias/ReLU epilogue ----
    acc = jnp.dot(col_scr[...], w_ref[...], preferred_element_type=jnp.float32)   # (Ms, F)
    y = jnp.maximum(acc + b_ref[...], 0.0)
    # Drop the junk columns (w in [W, Wp)); both reshapes are layout-preserving (Wp, W % 8 == 0).
    y = y.reshape(H, Wp, F)[:, :W, :].reshape(H * W, F)
    y_scr[...] = y

    # ---- 2x2/2 max-pool: strided row loads + aligned half-slices (no 5-D reshape) ----
    wmax = jnp.maximum(y_scr[pl.ds(0, H * Wo, 2), :],          # rows (h, w even)
                       y_scr[pl.ds(1, H * Wo, 2), :])          # rows (h, w odd) -> (H*Wo, F)
    wmax = wmax.reshape(Ho, 2 * Wo, F)                          # layout-preserving (2*Wo % 8 == 0)
    pooled = jnp.maximum(wmax[:, :Wo, :], wmax[:, Wo:, :])      # (Ho, Wo, F)
    o_ref[...] = pooled.reshape(1, Ho * Wo, F).astype(o_ref.dtype)


def prepare_conv_params(conv_w, conv_b):
    """One-time fold of x/255 and (x-mean)/std into the first conv (exact: conv is affine)."""
    F, C, KH, KW = conv_w.shape
    conv_w = conv_w.astype(jnp.float32)
    scale = 1.0 / (255.0 * STD)                                            # (C,)
    shift = -MEAN / STD                                                    # (C,)
    w_folded = conv_w * scale[None, :, None, None]                         # (F, C, 3, 3)
    w9 = jnp.transpose(w_folded, (2, 3, 1, 0)).reshape(KH * KW * C, F)     # rows = (ky, kx, c)
    wK = jnp.zeros((K_PAD, F), jnp.float32).at[:KH * KW * C, :].set(w9)
    bK = conv_b.astype(jnp.float32) + jnp.einsum("fcij,c->f", conv_w, shift)
    return wK, bK.reshape(1, F)


def conv3x3_relu_pool(x_nchw, wK, bK):
    """Raw [0,255] NCHW image -> folded-normalization conv3x3+bias+ReLU -> 2x2 maxpool.

    Returns (N, Ho*Wo*F) bf16 features flattened in (Ho, Wo, F) order."""
    N, C, H, W = x_nchw.shape
    F = wK.shape[1]
    assert C == 3, "ModelWrapper normalizes exactly 3 (RGB) channels"
    assert H % 2 == 0 and W % 8 == 0 and F % 128 == 0
    Ho, Wo = H // 2, W // 2
    Wp = _round_up(W + 2, 8)                     # padded row width (left/right halo + fill)
    MF = (H + 3) * Wp                            # +1 extra halo row so every tap slice is in-bounds

    # One fused prep pass: fill with 255*mean[c] (normalizes to exactly 0 under the fold,
    # matching zero-padding of the normalized image), interior = transposed raw image (f32).
    pad_val = (255.0 * MEAN).reshape(1, 1, 1, C)
    xp = jnp.broadcast_to(pad_val, (N, H + 3, Wp, C)).astype(jnp.float32)
    xp = xp.at[:, 1:H + 1, 1:W + 1, :].set(
        jnp.transpose(x_nchw, (0, 2, 3, 1)).astype(jnp.float32))
    x_flat = xp.reshape(N, MF, C)                # free reshape in HBM

    kernel = functools.partial(_conv_relu_pool_kernel, H=H, W=W, Wp=Wp, C=C, F=F)
    out = pl.pallas_call(
        kernel,
        out_shape=jax.ShapeDtypeStruct((N, Ho * Wo, F), jnp.bfloat16),
        grid_spec=pltpu.PrefetchScalarGridSpec(
            num_scalar_prefetch=0,
            grid=(N,),
            in_specs=[
                pl.BlockSpec((1, MF, C), lambda n: (n, 0, 0)),
                pl.BlockSpec((K_PAD, F), lambda n: (0, 0)),
                pl.BlockSpec((1, F), lambda n: (0, 0)),
            ],
            out_specs=pl.BlockSpec((1, Ho * Wo, F), lambda n: (n, 0, 0)),   # 128-lane dense
            scratch_shapes=[
                pltpu.VMEM((H * Wp, K_PAD), jnp.float32),    # im2col
                pltpu.VMEM((H * W, F), jnp.float32),         # pre-pool activation
            ],
        ),
        compiler_params=pltpu.CompilerParams(
            dimension_semantics=("parallel",),               # batch sharded across TCs (v7x)
            vmem_limit_bytes=32 * 1024 * 1024,
        ),
    )(x_flat, wK, bK)
    return out.reshape(N, Ho * Wo * F)


# ---------------------------------------------------------------------------
# Kernel 2: tiled matmul + bias, K-reduction grid axis, f32 accumulator
# ---------------------------------------------------------------------------
def _matmul_bias_kernel(x_ref, w_ref, b_ref, o_ref, acc_ref):
    @pl.when(pl.program_id(2) == 0)
    def _init():
        acc_ref[...] = jnp.zeros_like(acc_ref)

    acc_ref[...] += jnp.dot(x_ref[...], w_ref[...], preferred_element_type=jnp.float32)

    @pl.when(pl.program_id(2) == pl.num_programs(2) - 1)
    def _finalize():
        o_ref[...] = (acc_ref[...] + b_ref[...]).astype(o_ref.dtype)


def prepare_fc_params(fc_w, fc_b, *, tn=128, tk=8192):
    """One-time padding + bf16 cast of static FC params (hoisted out of the forward path)."""
    K, Nc = fc_w.shape
    tk_eff = min(tk, _round_up(K, 128))
    Kp = _round_up(K, tk_eff)
    Np = _round_up(Nc, tn)
    w_pad = jnp.zeros((Kp, Np), jnp.bfloat16).at[:K, :Nc].set(fc_w.astype(jnp.bfloat16))
    b_pad = jnp.zeros((1, Np), jnp.float32).at[:, :Nc].set(
        fc_b.reshape(1, Nc).astype(jnp.float32))
    return w_pad, b_pad


def matmul_bias(x, w_pad, b_pad, *, tm=128, tn=128, tk=8192):
    """x @ w_pad + b_pad with bf16 operands and f32 accumulation.  Returns (M, Np) f32."""
    M, K = x.shape
    Kp, Np = w_pad.shape
    tm = min(tm, _round_up(M, 8))
    tn = min(tn, Np)
    tk = min(tk, Kp)                             # big K tile -> grid collapses to (1,1,1) here
    assert Kp % tk == 0 and Np % tn == 0 and Kp >= K
    Mp = _round_up(M, tm)

    xp = x
    if (Mp, Kp) != (M, K):                       # only the small M->8 row pad (no dtype cast)
        xp = jnp.zeros((Mp, Kp), x.dtype).at[:M, :K].set(x)

    out = pl.pallas_call(
        _matmul_bias_kernel,
        out_shape=jax.ShapeDtypeStruct((Mp, Np), jnp.float32),
        grid_spec=pltpu.PrefetchScalarGridSpec(
            num_scalar_prefetch=0,
            grid=(Mp // tm, Np // tn, Kp // tk),              # K-reduction innermost
            in_specs=[
                pl.BlockSpec((tm, tk), lambda i, j, k: (i, k)),
                pl.BlockSpec((tk, tn), lambda i, j, k: (k, j)),
                pl.BlockSpec((1, tn), lambda i, j, k: (0, j)),
            ],
            out_specs=pl.BlockSpec((tm, tn), lambda i, j, k: (i, j)),
            scratch_shapes=[pltpu.VMEM((tm, tn), jnp.float32)],
        ),
        compiler_params=pltpu.CompilerParams(
            dimension_semantics=("parallel", "parallel", "arbitrary"),
            vmem_limit_bytes=32 * 1024 * 1024,
        ),
    )(xp, w_pad, b_pad)
    return out[:M]


# ---------------------------------------------------------------------------
# ModelWrapper.forward: (folded) normalization -> synthetic VGG-style model
# ---------------------------------------------------------------------------
def model_wrapper_forward(x_nchw, wK, bK, fc_w_pad, fc_b_pad, *, num_classes):
    feats = conv3x3_relu_pool(x_nchw, wK, bK)            # (N, Ho*Wo*F) bf16, no extra HBM pass
    logits = matmul_bias(feats, fc_w_pad, fc_b_pad)      # (N, Np) f32
    return logits[:, :num_classes]


# ---------------------------------------------------------------------------
# Pure-JAX reference (true semantics: normalize, conv, relu, pool, fc) for validation.
# ---------------------------------------------------------------------------
def _reference_forward(x_nchw, conv_w, conv_b, fc_w, fc_b):
    x = x_nchw.astype(jnp.float32) / 255.0
    x = (x - MEAN.reshape(1, -1, 1, 1)) / STD.reshape(1, -1, 1, 1)
    y = jax.lax.conv_general_dilated(
        x, conv_w, window_strides=(1, 1), padding=((1, 1), (1, 1)),
        dimension_numbers=("NCHW", "OIHW", "NCHW"))
    y = jnp.maximum(y + conv_b.reshape(1, -1, 1, 1), 0.0)
    n, f, h, w = y.shape
    y = y.reshape(n, f, h // 2, 2, w // 2, 2).max(axis=(3, 5))
    y = jnp.transpose(y, (0, 2, 3, 1)).reshape(n, -1)     # (Ho, Wo, F) flatten order
    return y @ fc_w + fc_b.reshape(1, -1)


# ---------------------------------------------------------------------------
if __name__ == "__main__":
    key = jax.random.PRNGKey(0)
    k_x, k_w1, k_b1, k_w2, k_b2 = jax.random.split(key, 5)

    # ModelWrapper hard-codes 3 (RGB) channels; small batch/spatial for the demo.
    # F = 128 keeps every kernel store and MXU matmul 128-lane dense.
    N, C, H, W = 2, 3, 16, 16
    F, NUM_CLASSES = 128, 10

    x = jax.random.uniform(k_x, (N, C, H, W), jnp.float32, 0.0, 255.0)   # raw [0,255] image
    conv_w = jax.random.normal(k_w1, (F, C, 3, 3), jnp.float32) * 0.1
    conv_b = jax.random.normal(k_b1, (F,), jnp.float32) * 0.1
    fc_w = jax.random.normal(k_w2, ((H // 2) * (W // 2) * F, NUM_CLASSES), jnp.float32) * 0.05
    fc_b = jax.random.normal(k_b2, (NUM_CLASSES,), jnp.float32) * 0.05

    # One-time parameter prep (hoisted out of the per-forward path, per review).
    wK, bK = prepare_conv_params(conv_w, conv_b)
    fc_w_pad, fc_b_pad = prepare_fc_params(fc_w, fc_b)

    fwd = jax.jit(functools.partial(model_wrapper_forward, num_classes=NUM_CLASSES))
    out = jax.block_until_ready(fwd(x, wK, bK, fc_w_pad, fc_b_pad))
    assert out.shape == (N, NUM_CLASSES) and out.dtype == jnp.float32

    ref = _reference_forward(x, conv_w, conv_b, fc_w, fc_b)
    max_err = float(jnp.max(jnp.abs(out - ref)))
    tol = 0.03 * float(jnp.max(jnp.abs(ref))) + 0.05       # bf16 FC operands, f32 accumulation
    assert max_err <= tol, f"mismatch vs reference: {max_err} > {tol}"
    print("KERNEL_OK")
</pallas_src>

<mosaic_0001>
module attributes {stable_mosaic.version = 11 : i64} {
  func.func @_conv_relu_pool_kernel(%arg0: i32, %arg1: memref<1x456x3xf32, #tpu.memory_space<vmem>>, %arg2: memref<32x128xf32, #tpu.memory_space<vmem>>, %arg3: memref<1x128xf32, #tpu.memory_space<vmem>>, %arg4: memref<1x64x128xbf16, #tpu.memory_space<vmem>>, %arg5: memref<384x32xf32, #tpu.memory_space<vmem>>, %arg6: memref<256x128xf32, #tpu.memory_space<vmem>>) attributes {dimension_semantics = [#tpu.dimension_semantics<parallel>], iteration_bounds = array<i64: 2>, scalar_prefetch = 0 : i64, scratch_operands = 2 : i64, tpu.core_type = #tpu.core_type<tc>, window_params = [{transform_indices = @transform_0, window_bounds = array<i64: 1, 456, 3>}, {pipeline_mode = #tpu.pipeline_mode<synchronous>, transform_indices = @transform_1, window_bounds = array<i64: 32, 128>}, {pipeline_mode = #tpu.pipeline_mode<synchronous>, transform_indices = @transform_2, window_bounds = array<i64: 1, 128>}, {transform_indices = @transform_3, window_bounds = array<i64: 1, 64, 128>}]} {
    %c0 = arith.constant 0 : index
    %c0_0 = arith.constant 0 : index
    %c0_1 = arith.constant 0 : index
    %0 = vector.load %arg1[%c0, %c0_0, %c0_1] : memref<1x456x3xf32, #tpu.memory_space<vmem>>, vector<1x384x3xf32>
    %1 = vector.shape_cast %0 : vector<1x384x3xf32> to vector<384x3xf32>
    %c0_2 = arith.constant 0 : index
    %c0_3 = arith.constant 0 : index
    %2 = vector.load %arg5[%c0_2, %c0_3] : memref<384x32xf32, #tpu.memory_space<vmem>>, vector<384x3xf32>
    tpu.vector_store %arg5[%c0_2, %c0_3], %1 {strides = array<i32>} : memref<384x32xf32, #tpu.memory_space<vmem>>, vector<384x3xf32>,
    %c0_4 = arith.constant 0 : index
    %c1 = arith.constant 1 : index
    %c0_5 = arith.constant 0 : index
    %3 = vector.load %arg1[%c0_4, %c1, %c0_5] : memref<1x456x3xf32, #tpu.memory_space<vmem>>, vector<1x384x3xf32>
    %4 = vector.shape_cast %3 : vector<1x384x3xf32> to vector<384x3xf32>
    %c0_6 = arith.constant 0 : index
    %c3 = arith.constant 3 : index
    %5 = vector.load %arg5[%c0_6, %c3] : memref<384x32xf32, #tpu.memory_space<vmem>>, vector<384x3xf32>
    tpu.vector_store %arg5[%c0_6, %c3], %4 {strides = array<i32>} : memref<384x32xf32, #tpu.memory_space<vmem>>, vector<384x3xf32>,
    %c0_7 = arith.constant 0 : index
    %c2 = arith.constant 2 : index
    %c0_8 = arith.constant 0 : index
    %6 = vector.load %arg1[%c0_7, %c2, %c0_8] : memref<1x456x3xf32, #tpu.memory_space<vmem>>, vector<1x384x3xf32>
    %7 = vector.shape_cast %6 : vector<1x384x3xf32> to vector<384x3xf32>
    %c0_9 = arith.constant 0 : index
    %c6 = arith.constant 6 : index
    %8 = vector.load %arg5[%c0_9, %c6] : memref<384x32xf32, #tpu.memory_space<vmem>>, vector<384x3xf32>
    tpu.vector_store %arg5[%c0_9, %c6], %7 {strides = array<i32>} : memref<384x32xf32, #tpu.memory_space<vmem>>, vector<384x3xf32>,
    %c0_10 = arith.constant 0 : index
    %c24 = arith.constant 24 : index
    %c0_11 = arith.constant 0 : index
    %9 = vector.load %arg1[%c0_10, %c24, %c0_11] : memref<1x456x3xf32, #tpu.memory_space<vmem>>, vector<1x384x3xf32>
    %10 = vector.shape_cast %9 : vector<1x384x3xf32> to vector<384x3xf32>
    %c0_12 = arith.constant 0 : index
    %c9 = arith.constant 9 : index
    %11 = vector.load %arg5[%c0_12, %c9] : memref<384x32xf32, #tpu.memory_space<vmem>>, vector<384x3xf32>
    tpu.vector_store %arg5[%c0_12, %c9], %10 {strides = array<i32>} : memref<384x32xf32, #tpu.memory_space<vmem>>, vector<384x3xf32>,
    %c0_13 = arith.constant 0 : index
    %c25 = arith.constant 25 : index
    %c0_14 = arith.constant 0 : index
    %12 = vector.load %arg1[%c0_13, %c25, %c0_14] : memref<1x456x3xf32, #tpu.memory_space<vmem>>, vector<1x384x3xf32>
    %13 = vector.shape_cast %12 : vector<1x384x3xf32> to vector<384x3xf32>
    %c0_15 = arith.constant 0 : index
    %c12 = arith.constant 12 : index
    %14 = vector.load %arg5[%c0_15, %c12] : memref<384x32xf32, #tpu.memory_space<vmem>>, vector<384x3xf32>
    tpu.vector_store %arg5[%c0_15, %c12], %13 {strides = array<i32>} : memref<384x32xf32, #tpu.memory_space<vmem>>, vector<384x3xf32>,
    %c0_16 = arith.constant 0 : index
    %c26 = arith.constant 26 : index
    %c0_17 = arith.constant 0 : index
    %15 = vector.load %arg1[%c0_16, %c26, %c0_17] : memref<1x456x3xf32, #tpu.memory_space<vmem>>, vector<1x384x3xf32>
    %16 = vector.shape_cast %15 : vector<1x384x3xf32> to vector<384x3xf32>
    %c0_18 = arith.constant 0 : index
    %c15 = arith.constant 15 : index
    %17 = vector.load %arg5[%c0_18, %c15] : memref<384x32xf32, #tpu.memory_space<vmem>>, vector<384x3xf32>
    tpu.vector_store %arg5[%c0_18, %c15], %16 {strides = array<i32>} : memref<384x32xf32, #tpu.memory_space<vmem>>, vector<384x3xf32>,
    %c0_19 = arith.constant 0 : index
    %c48 = arith.constant 48 : index
    %c0_20 = arith.constant 0 : index
    %18 = vector.load %arg1[%c0_19, %c48, %c0_20] : memref<1x456x3xf32, #tpu.memory_space<vmem>>, vector<1x384x3xf32>
    %19 = vector.shape_cast %18 : vector<1x384x3xf32> to vector<384x3xf32>
    %c0_21 = arith.constant 0 : index
    %c18 = arith.constant 18 : index
    %20 = vector.load %arg5[%c0_21, %c18] : memref<384x32xf32, #tpu.memory_space<vmem>>, vector<384x3xf32>
    tpu.vector_store %arg5[%c0_21, %c18], %19 {strides = array<i32>} : memref<384x32xf32, #tpu.memory_space<vmem>>, vector<384x3xf32>,
    %c0_22 = arith.constant 0 : index
    %c49 = arith.constant 49 : index
    %c0_23 = arith.constant 0 : index
    %21 = vector.load %arg1[%c0_22, %c49, %c0_23] : memref<1x456x3xf32, #tpu.memory_space<vmem>>, vector<1x384x3xf32>
    %22 = vector.shape_cast %21 : vector<1x384x3xf32> to vector<384x3xf32>
    %c0_24 = arith.constant 0 : index
    %c21 = arith.constant 21 : index
    %23 = vector.load %arg5[%c0_24, %c21] : memref<384x32xf32, #tpu.memory_space<vmem>>, vector<384x3xf32>
    tpu.vector_store %arg5[%c0_24, %c21], %22 {strides = array<i32>} : memref<384x32xf32, #tpu.memory_space<vmem>>, vector<384x3xf32>,
    %c0_25 = arith.constant 0 : index
    %c50 = arith.constant 50 : index
    %c0_26 = arith.constant 0 : index
    %24 = vector.load %arg1[%c0_25, %c50, %c0_26] : memref<1x456x3xf32, #tpu.memory_space<vmem>>, vector<1x384x3xf32>
    %25 = vector.shape_cast %24 : vector<1x384x3xf32> to vector<384x3xf32>
    %c0_27 = arith.constant 0 : index
    %c24_28 = arith.constant 24 : index
    %26 = vector.load %arg5[%c0_27, %c24_28] : memref<384x32xf32, #tpu.memory_space<vmem>>, vector<384x3xf32>
    tpu.vector_store %arg5[%c0_27, %c24_28], %25 {strides = array<i32>} : memref<384x32xf32, #tpu.memory_space<vmem>>, vector<384x3xf32>,
    %cst = arith.constant 0.000000e+00 : f32
    %27 = vector.broadcast %cst : f32 to vector<384x5xf32>
    %c0_29 = arith.constant 0 : index
    %c27 = arith.constant 27 : index
    %28 = vector.load %arg5[%c0_29, %c27] : memref<384x32xf32, #tpu.memory_space<vmem>>, vector<384x5xf32>
    tpu.vector_store %arg5[%c0_29, %c27], %27 {strides = array<i32>} : memref<384x32xf32, #tpu.memory_space<vmem>>, vector<384x5xf32>,
    %c0_30 = arith.constant 0 : index
    %c0_31 = arith.constant 0 : index
    %29 = vector.load %arg5[%c0_30, %c0_31] : memref<384x32xf32, #tpu.memory_space<vmem>>, vector<384x32xf32>
    %c0_32 = arith.constant 0 : index
    %c0_33 = arith.constant 0 : index
    %30 = vector.load %arg2[%c0_32, %c0_33] : memref<32x128xf32, #tpu.memory_space<vmem>>, vector<32x128xf32>
    %cst_34 = arith.constant dense<0.000000e+00> : vector<384x128xf32>
    %31 = tpu.matmul %29, %30, %cst_34 {dimension_numbers = #tpu.dot_dimension_numbers<[1], [0], [0], [1], [0, 0, 1, 1], [], []>} : vector<384x32xf32>, vector<32x128xf32>, vector<384x128xf32> -> vector<384x128xf32>
    %c0_35 = arith.constant 0 : index
    %c0_36 = arith.constant 0 : index
    %32 = vector.load %arg3[%c0_35, %c0_36] : memref<1x128xf32, #tpu.memory_space<vmem>>, vector<1x128xf32>
    %33 = vector.broadcast %32 : vector<1x128xf32> to vector<384x128xf32>
    %34 = arith.addf %31, %33 : vector<384x128xf32>
    %cst_37 = arith.constant 0.000000e+00 : f32
    %35 = vector.broadcast %cst_37 : f32 to vector<384x128xf32>
    %36 = arith.maximumf %34, %35 : vector<384x128xf32>
    %37 = vector.shape_cast %36 : vector<384x128xf32> to vector<16x24x128xf32>
    %38 = vector.extract_strided_slice %37 {offsets = [0, 0, 0], sizes = [16, 16, 128], strides = [1, 1, 1]} : vector<16x24x128xf32> to vector<16x16x128xf32>
    %39 = vector.shape_cast %38 : vector<16x16x128xf32> to vector<256x128xf32>
    %c0_38 = arith.constant 0 : index
    %c0_39 = arith.constant 0 : index
    %40 = vector.load %arg6[%c0_38, %c0_39] : memref<256x128xf32, #tpu.memory_space<vmem>>, vector<256x128xf32>
    tpu.vector_store %arg6[%c0_38, %c0_39], %39 {strides = array<i32>} : memref<256x128xf32, #tpu.memory_space<vmem>>, vector<256x128xf32>,
    %c0_40 = arith.constant 0 : index
    %c0_41 = arith.constant 0 : index
    %41 = tpu.strided_load %arg6[%c0_40, %c0_41] {strides = array<i32: 2, 1>} : memref<256x128xf32, #tpu.memory_space<vmem>>, vector<128x128xf32>
    %c1_42 = arith.constant 1 : index
    %c0_43 = arith.constant 0 : index
    %42 = tpu.strided_load %arg6[%c1_42, %c0_43] {strides = array<i32: 2, 1>} : memref<256x128xf32, #tpu.memory_space<vmem>>, vector<128x128xf32>
    %43 = arith.maximumf %41, %42 : vector<128x128xf32>
    %44 = vector.shape_cast %43 : vector<128x128xf32> to vector<8x16x128xf32>
    %45 = vector.extract_strided_slice %44 {offsets = [0, 0, 0], sizes = [8, 8, 128], strides = [1, 1, 1]} : vector<8x16x128xf32> to vector<8x8x128xf32>
    %46 = vector.extract_strided_slice %44 {offsets = [0, 8, 0], sizes = [8, 8, 128], strides = [1, 1, 1]} : vector<8x16x128xf32> to vector<8x8x128xf32>
    %47 = arith.maximumf %45, %46 : vector<8x8x128xf32>
    %48 = vector.shape_cast %47 : vector<8x8x128xf32> to vector<1x64x128xf32>
    %49 = arith.truncf %48 : vector<1x64x128xf32> to vector<1x64x128xbf16>
    %c0_44 = arith.constant 0 : index
    %c0_45 = arith.constant 0 : index
    %c0_46 = arith.constant 0 : index
    %50 = vector.load %arg4[%c0_44, %c0_45, %c0_46] : memref<1x64x128xbf16, #tpu.memory_space<vmem>>, vector<1x64x128xbf16>
    tpu.vector_store %arg4[%c0_44, %c0_45, %c0_46], %49 {strides = array<i32>} : memref<1x64x128xbf16, #tpu.memory_space<vmem>>, vector<1x64x128xbf16>,
    return
  }
  func.func @transform_0(%arg0: i32) -> (i32, i32, i32) {
    %c0_i32 = arith.constant 0 : i32
    %c0_i32_0 = arith.constant 0 : i32
    %c0_i32_1 = arith.constant 0 : i32
    return %arg0, %c0_i32, %c0_i32_0 : i32, i32, i32
  }
  func.func @transform_1(%arg0: i32) -> (i32, i32) {
    %c0_i32 = arith.constant 0 : i32
    %c0_i32_0 = arith.constant 0 : i32
    %c0_i32_1 = arith.constant 0 : i32
    return %c0_i32, %c0_i32_0 : i32, i32
  }
  func.func @transform_2(%arg0: i32) -> (i32, i32) {
    %c0_i32 = arith.constant 0 : i32
    %c0_i32_0 = arith.constant 0 : i32
    %c0_i32_1 = arith.constant 0 : i32
    return %c0_i32, %c0_i32_0 : i32, i32
  }
  func.func @transform_3(%arg0: i32) -> (i32, i32, i32) {
    %c0_i32 = arith.constant 0 : i32
    %c0_i32_0 = arith.constant 0 : i32
    %c0_i32_1 = arith.constant 0 : i32
    return %arg0, %c0_i32, %c0_i32_0 : i32, i32, i32
  }
}

module attributes {stable_mosaic.version = 11 : i64} {
  func.func @_matmul_bias_kernel(%arg0: i32, %arg1: i32, %arg2: i32, %arg3: memref<8x8192xbf16, #tpu.memory_space<vmem>>, %arg4: memref<8192x128xbf16, #tpu.memory_space<vmem>>, %arg5: memref<1x128xf32, #tpu.memory_space<vmem>>, %arg6: memref<8x128xf32, #tpu.memory_space<vmem>>, %arg7: memref<8x128xf32, #tpu.memory_space<vmem>>) attributes {dimension_semantics = [#tpu.dimension_semantics<parallel>, #tpu.dimension_semantics<parallel>, #tpu.dimension_semantics<arbitrary>], iteration_bounds = array<i64: 1, 1, 1>, scalar_prefetch = 0 : i64, scratch_operands = 1 : i64, tpu.core_type = #tpu.core_type<tc>, window_params = [{transform_indices = @transform_0, window_bounds = array<i64: 8, 8192>}, {transform_indices = @transform_1, window_bounds = array<i64: 8192, 128>}, {transform_indices = @transform_2, window_bounds = array<i64: 1, 128>}, {transform_indices = @transform_3, window_bounds = array<i64: 8, 128>}]} {
    %c0_i32 = arith.constant 0 : i32
    %0 = arith.cmpi eq, %arg2, %c0_i32 : i32
    %1 = arith.extui %0 : i1 to i32
    %c0_i32_0 = arith.constant 0 : i32
    %2 = arith.cmpi ne, %1, %c0_i32_0 : i32
    scf.if %2 {
      %cst_10 = arith.constant 0.000000e+00 : f32
      %12 = vector.broadcast %cst_10 : f32 to vector<8x128xf32>
      %c0_11 = arith.constant 0 : index
      %c0_12 = arith.constant 0 : index
      %13 = vector.load %arg7[%c0_11, %c0_12] : memref<8x128xf32, #tpu.memory_space<vmem>>, vector<8x128xf32>
      tpu.vector_store %arg7[%c0_11, %c0_12], %12 {strides = array<i32>} : memref<8x128xf32, #tpu.memory_space<vmem>>, vector<8x128xf32>,
    } else {
    }
    %c0 = arith.constant 0 : index
    %c0_1 = arith.constant 0 : index
    %3 = vector.load %arg7[%c0, %c0_1] : memref<8x128xf32, #tpu.memory_space<vmem>>, vector<8x128xf32>
    %c0_2 = arith.constant 0 : index
    %c0_3 = arith.constant 0 : index
    %4 = vector.load %arg3[%c0_2, %c0_3] : memref<8x8192xbf16, #tpu.memory_space<vmem>>, vector<8x8192xbf16>
    %c0_4 = arith.constant 0 : index
    %c0_5 = arith.constant 0 : index
    %5 = vector.load %arg4[%c0_4, %c0_5] : memref<8192x128xbf16, #tpu.memory_space<vmem>>, vector<8192x128xbf16>
    %cst = arith.constant dense<0.000000e+00> : vector<8x128xf32>
    %6 = tpu.matmul %4, %5, %cst {dimension_numbers = #tpu.dot_dimension_numbers<[1], [0], [0], [1], [0, 0, 1, 1], [], []>} : vector<8x8192xbf16>, vector<8192x128xbf16>, vector<8x128xf32> -> vector<8x128xf32>
    %7 = arith.addf %3, %6 : vector<8x128xf32>
    %c0_6 = arith.constant 0 : index
    %c0_7 = arith.constant 0 : index
    %8 = vector.load %arg7[%c0_6, %c0_7] : memref<8x128xf32, #tpu.memory_space<vmem>>, vector<8x128xf32>
    tpu.vector_store %arg7[%c0_6, %c0_7], %7 {strides = array<i32>} : memref<8x128xf32, #tpu.memory_space<vmem>>, vector<8x128xf32>,
    %c0_i32_8 = arith.constant 0 : i32
    %9 = arith.cmpi eq, %arg2, %c0_i32_8 : i32
    %10 = arith.extui %9 : i1 to i32
    %c0_i32_9 = arith.constant 0 : i32
    %11 = arith.cmpi ne, %10, %c0_i32_9 : i32
    scf.if %11 {
      %c0_10 = arith.constant 0 : index
      %c0_11 = arith.constant 0 : index
      %12 = vector.load %arg7[%c0_10, %c0_11] : memref<8x128xf32, #tpu.memory_space<vmem>>, vector<8x128xf32>
      %c0_12 = arith.constant 0 : index
      %c0_13 = arith.constant 0 : index
      %13 = vector.load %arg5[%c0_12, %c0_13] : memref<1x128xf32, #tpu.memory_space<vmem>>, vector<1x128xf32>
      %14 = vector.broadcast %13 : vector<1x128xf32> to vector<8x128xf32>
      %15 = arith.addf %12, %14 : vector<8x128xf32>
      %c0_14 = arith.constant 0 : index
      %c0_15 = arith.constant 0 : index
      %16 = vector.load %arg6[%c0_14, %c0_15] : memref<8x128xf32, #tpu.memory_space<vmem>>, vector<8x128xf32>
      tpu.vector_store %arg6[%c0_14, %c0_15], %15 {strides = array<i32>} : memref<8x128xf32, #tpu.memory_space<vmem>>, vector<8x128xf32>,
    } else {
    }
    return
  }
  func.func @transform_0(%arg0: i32, %arg1: i32, %arg2: i32) -> (i32, i32) {
    %c0_i32 = arith.constant 0 : i32
    return %arg0, %arg2 : i32, i32
  }
  func.func @transform_1(%arg0: i32, %arg1: i32, %arg2: i32) -> (i32, i32) {
    %c0_i32 = arith.constant 0 : i32
    return %arg2, %arg1 : i32, i32
  }
  func.func @transform_2(%arg0: i32, %arg1: i32, %arg2: i32) -> (i32, i32) {
    %c0_i32 = arith.constant 0 : i32
    %c0_i32_0 = arith.constant 0 : i32
    return %c0_i32, %arg1 : i32, i32
  }
  func.func @transform_3(%arg0: i32, %arg1: i32, %arg2: i32) -> (i32, i32) {
    %c0_i32 = arith.constant 0 : i32
    return %arg0, %arg1 : i32, i32
  }
}

</mosaic_0001>

<bundles_post_ra>
// kernel: model_wrapper_forward.2
= control target key start
LH: loop header
LB: loop body
LE: loop exit
PB: predicated region body
PF: predicated region fallthrough
CT: control target
= control target key end

     0   :  { %8 = vsyncpa [#allocation5], 0  ;;  %s5592_s0 = inlined_call_operand.vmem [shape: f32[2,456,3], index: 0, kind: input, shape index: {}]   ;;  %s5593_s1 = inlined_call_operand.hbm [shape: f32[32,128], index: 1, kind: input, shape index: {}]   ;;  %s5594_s2 = inlined_call_operand.hbm [shape: f32[1,128], index: 2, kind: input, shape index: {}]   ;;  %s5595_s3 = inlined_call_operand.vmem [shape: bf16[2,64,128], index: 3, kind: output, shape index: {}]  }
   0x1   :  { %9 = vsyncpa [#allocation7], 0  ;;  %s3811_s12 = smov 0  }
   0x2 LB: > { %s3817_s13 = sadd.s32 4294967295, %s3776_s12   ;;  %p3420_p0 = scmp.ge.s32.totalorder %s3776_s12, 1  ;;  %s3776_s12 = sphi %s3811_s12, %s15_s12  }
   0x3   : > { %p114_p1 = scmp.lt.s32.totalorder %s3776_s12, 3  ;;  %s3778_s14 = smov [#allocation4]  }
   0x4   : > { %s126_s15 = sshll.u32 %s3778_s14, 4  ;;  %p5596_p3 = scmp.eq.s32.totalorder %s3817_s13, 0  ;;  %s127_s15 = int_to_ptr.vmem [resolvable:$true] %s126_s15 }
   0x5   : > { %p3821_p2 = pnand %p3420_p0, %p114_p1  ;;  %s3779_s17 = smov [#allocation6]  }
   0x6   : > { %s140_s18 = sshll.u32 %s3779_s17, 4  ;;  %s3706_s22 = scalar_lea.hbm %s5593_s1, 512  ;;  %s3834_s18 = int_to_ptr.vmem [resolvable:$true] %s140_s18 }
   0x7   : > { %s5598_s16 = scalar_select %p3821_p2, 1, 0 }
   0x8   : > { %p3674_p4 = pneg %p3821_p2  ;;  %p3707_p6 = scmp.ne.s32.totalorder %s5593_s1, %s3706_s22 }
   0x9   : > { %p3713_p10 = scmp.lt.u32.totalorder %s3706_s22, %s5593_s1 }
   0xa   : > { %p3830_p5 = pnand %p5596_p3, %p3674_p4 }
   0xc   : > { %p3708_p7 = pneg %p3830_p5 }
   0xe   : > { %p3709_p8 = pnand %p3708_p7, %p3707_p6 }
  0x10   : > { %p3710_p9 = pneg %p3709_p8 }
  0x12   : > { %p3715_p11 = pnand %p3713_p10, %p3710_p9 }
  0x14   : > { %3718 = shalt.err (!%p3715_p11)
}
  0x15   : > { %s3719_s27 = scalar_lea.vmem %s127_s15, 512  ;;  %p3727_p1 = scmp.lt.s32.totalorder %s127_s15, %s127_s15 }
  0x16   : > { %p3720_p12 = scmp.ne.s32.totalorder %s127_s15, %s3719_s27  ;;  %p3728_p4 = scmp.lt.s32.totalorder %s3719_s27, %s3719_s27 }
  0x18   : > { %p3722_p13 = pnand %p3720_p12, %p3708_p7  ;;  %p3729_p3 = por %p3728_p4, %p3727_p1 }
  0x1a   : > { %p3723_p0 = pneg %p3722_p13 }
  0x1c   : > { %p3730_p2 = pnand %p3729_p3, %p3723_p0 }
  0x1e   : > { %3733 = shalt.err (!%p3730_p2)
}
  0x1f   : > { %s3780_s28 = smov 128   ;;  %s3781_s29 = smov 8  }
  0x20   : > { %3677 = dma.hbm_to_vmem [thread:$0]  (!%p3830_p5), %s5593_s1, 512, %s127_s15, [#allocation5], %s3780_s28, %s3780_s28, %s3781_s29  }
  0x21   : > { %s3734_s7 = scalar_lea.hbm %s5594_s2, 16 }
  0x22   : > { %p3735_p6 = scmp.ne.s32.totalorder %s5594_s2, %s3734_s7  ;;  %p3741_p8 = scmp.lt.u32.totalorder %s3734_s7, %s5594_s2 }
  0x24   : > { %p3737_p2 = pnand %p3735_p6, %p3708_p7 }
  0x26   : > { %p3738_p3 = pneg %p3737_p2 }
  0x28   : > { %p3743_p9 = pnand %p3741_p8, %p3738_p3 }
  0x2a   : > { %3746 = shalt.err (!%p3743_p9)
}
  0x2b   : > { %s3747_s14 = scalar_lea.vmem %s3834_s18, 16  ;;  %s3754_s15 = scalar_lea.vmem %s3834_s18, 32 }
  0x2c   : > { %p3748_p10 = scmp.ne.s32.totalorder %s3834_s18, %s3747_s14  ;;  %p3755_p13 = scmp.lt.s32.totalorder %s3834_s18, %s3834_s18 }
  0x2d   : > { %p3756_p0 = scmp.lt.s32.totalorder %s3754_s15, %s3747_s14 }
  0x2e   : > { %p3750_p11 = pnand %p3748_p10, %p3708_p7 }
  0x2f   : > { %p3757_p1 = por %p3756_p0, %p3755_p13 }
  0x30   : > { %p3751_p12 = pneg %p3750_p11 }
  0x32   : > { %p3758_p4 = pnand %p3757_p1, %p3751_p12 }
  0x34   : > { %3761 = shalt.err (!%p3758_p4)
}
  0x35   : > { %3680 = dma.hbm_to_vmem [thread:$0]  (!%p3830_p5), %s5594_s2, 16, %s3834_s18, [#allocation7]  }
  0x36   : > { %p5600_p6 = scmp.ne.s32.totalorder %s5598_s16, 0 }
  0x37   : > { %p5601_p7 = scmp.eq.s32.totalorder (!%p5600_p6), %s3817_s13, 0 }
  0x38   : > { %161 = sbr.rel (%p5600_p6) target bundleno = 1196 (0x4ac), region = 32 }
  0x3f   : > { %3767 = dma.done.wait (%p5601_p7), [#allocation5], 512   ;;  %p5602_p2 = pmov %p5601_p7 }
  0x41   : > { %3769 = vsyncadd (%p5602_p2), [#allocation5], 4294966784  ;;  %p5603_p3 = pmov %p5602_p2 }
  0x42   : > { %p5604_p8 = pmov %p5602_p2 }
  0x43   : > { %3771 = dma.done.wait (%p5603_p3), [#allocation7], 16  }
  0x44   : > { %3773 = vsyncadd (%p5604_p8), [#allocation7], 4294967280  ;;  %p189_p9 = scmp.lt.s32.totalorder %s3817_s13, 1  ;;  %s3782_s22 = smov 3   ;;  %vm247_vm0 = vcmask 23552   ;;  %vm536_vm1 = vcmask 48152  }
  0x45   : > { %s3783_s23 = smov 6   ;;  %s3784_s24 = smov 9   ;;  %vm825_vm2 = vcmask 72752   ;;  %vm1114_vm3 = vcmask 97352   ;;  %vm1403_vm4 = vcmask 121952   ;;  %vm1692_vm5 = vcmask 146552  }
  0x46   : > { %s5606_s13 = smov (!%p189_p9, %s3817_s13), 1  ;;  %s3785_s25 = smov 12   ;;  %vm1981_vm6 = vcmask 171152   ;;  %vm2270_vm7 = vcmask 195752   ;;  %vm2559_vm8 = vcmask 220352   ;;  %vm2608_vm9 = vcmask 261336  }
  0x47   : > { %s3665_s16 = smul.u32 456, %s5606_s13  ;;  %s3786_s26 = smov 15   ;;  %vm2716_vm10 = vcmask 261120  }
  0x48   : > { %s3787_s27 = smov 18   ;;  %s3788_s28 = smov 21  }
  0x49   : > { %s3902_s21 = scalar_lea.vmem %s5592_s0, %s3665_s16  ;;  %s3789_s29 = smov 24  }
  0x4a   : > { %v298_v0 = vld [vmem:[%s3902_s21 + $0x11] sm:$0xff]  ;;  %v296_v1 = vld [vmem:[%s3902_s21 + $0x1] sm:$0xff]  ;;  %v299_v2 = vld [vmem:[%s3902_s21 + $0x19] sm:$0xff]  ;;  %s3489_s30 = sshll.u32 %s5606_s13, 5 }
  0x4b   : > { %396 = vrot.lane.b32.xlu1 %v298_v0, %s3782_s22  ;;  %392 = vrot.lane.b32.xlu0 %v296_v1, %s3782_s22  ;;  %v297_v3 = vld [vmem:[%s3902_s21 + $0x9] sm:$0xff]  ;;  %v300_v5 = vld [vmem:[%s3902_s21 + $0x21] sm:$0xff]  ;;  %s5567_s6 = scalar_lea.vmem %s5595_s3, %s3489_s30 }
  0x4c   : > { %v301_v4 = vld [vmem:[%s3902_s21 + $0x29] sm:$0xff]  ;;  %v303_v6 = vld [vmem:[%s3902_s21 + $0x39] sm:$0xff]  ;;  %v302_v7 = vld [vmem:[%s3902_s21 + $0x31] sm:$0xff] }
  0x4d   : > { %v305_v8 = vld [vmem:[%s3902_s21 + $0x49] sm:$0xff]  ;;  %v304_v9 = vld [vmem:[%s3902_s21 + $0x41] sm:$0xff]  ;;  %v307_v10 = vld [vmem:[%s3902_s21 + $0x59] sm:$0xff] }
  0x4e   : > { %v306_v11 = vld [vmem:[%s3902_s21 + $0x51] sm:$0xff]  ;;  %v199_v13 = vld [vmem:[%s3902_s21] sm:$0xff]  ;;  %v309_v14 = vld [vmem:[%s3902_s21 + $0x69] sm:$0xff] }
  0x4f   : > { %398 = vrot.lane.b32.xlu1 %v299_v2, %s3782_s22  ;;  %394 = vrot.lane.b32.xlu0 %v297_v3, %s3782_s22  ;;  %v201_v12 = vld [vmem:[%s3902_s21 + $0x10] sm:$0xff]  ;;  %v308_v15 = vld [vmem:[%s3902_s21 + $0x61] sm:$0xff]  ;;  %248 = vst.msk [vmem:[#allocation2] sm:$0xff] %vm247_vm0, %v199_v13 }
  0x50   : > { %250 = vst.msk [vmem:[#allocation2 + $0x10] sm:$0xff] %vm247_vm0, %v201_v12  ;;  %v3935_v16 = vld [vmem:[%s3902_s21 + $0x18] sm:$0xff]  ;;  %v200_v17 = vld [vmem:[%s3902_s21 + $0x8] sm:$0xff]  ;;  %v3945_v19 = vld [vmem:[%s3902_s21 + $0x20] sm:$0xff] }
  0x51   : > { %251 = vst.msk [vmem:[#allocation2 + $0x18] sm:$0xff] %vm247_vm0, %v3935_v16  ;;  %249 = vst.msk [vmem:[#allocation2 + $0x8] sm:$0xff] %vm247_vm0, %v200_v17  ;;  %v3942_v18 = vld [vmem:[%s3902_s21 + $0x28] sm:$0xff]  ;;  %v3954_v20 = vld [vmem:[%s3902_s21 + $0x38] sm:$0xff] }
  0x52   : > { %253 = vst.msk [vmem:[#allocation2 + $0x28] sm:$0xff] %vm247_vm0, %v3942_v18  ;;  %252 = vst.msk [vmem:[#allocation2 + $0x20] sm:$0xff] %vm247_vm0, %v3945_v19  ;;  %v311_v21 = vld [vmem:[%s3902_s21 + $0x79] sm:$0xff]  ;;  %v310_v22 = vld [vmem:[%s3902_s21 + $0x71] sm:$0xff] }
  0x53   : > { %402 = vrot.lane.b32.xlu1 %v301_v4, %s3782_s22  ;;  %400 = vrot.lane.b32.xlu0 %v300_v5, %s3782_s22  ;;  %255 = vst.msk [vmem:[#allocation2 + $0x38] sm:$0xff] %vm247_vm0, %v3954_v20  ;;  %v3961_v23 = vld [vmem:[%s3902_s21 + $0x30] sm:$0xff]  ;;  %v3966_v24 = vld [vmem:[%s3902_s21 + $0x48] sm:$0xff] }
  0x54   : > { %254 = vst.msk [vmem:[#allocation2 + $0x30] sm:$0xff] %vm247_vm0, %v3961_v23  ;;  %v3969_v25 = vld [vmem:[%s3902_s21 + $0x40] sm:$0xff]  ;;  %257 = vst.msk [vmem:[#allocation2 + $0x48] sm:$0xff] %vm247_vm0, %v3966_v24  ;;  %v3976_v26 = vld [vmem:[%s3902_s21 + $0x58] sm:$0xff] }
  0x55   : > { %256 = vst.msk [vmem:[#allocation2 + $0x40] sm:$0xff] %vm247_vm0, %v3969_v25  ;;  %v3979_v27 = vld [vmem:[%s3902_s21 + $0x50] sm:$0xff]  ;;  %259 = vst.msk [vmem:[#allocation2 + $0x58] sm:$0xff] %vm247_vm0, %v3976_v26  ;;  %v312_v29 = vld [vmem:[%s3902_s21 + $0x81] sm:$0xff] }
  0x56   : > { %v313_v28 = vld [vmem:[%s3902_s21 + $0x89] sm:$0xff]  ;;  %258 = vst.msk [vmem:[#allocation2 + $0x50] sm:$0xff] %vm247_vm0, %v3979_v27  ;;  %v3993_v31 = vld [vmem:[%s3902_s21 + $0x60] sm:$0xff]  ;;  %v4000_v32 = vld [vmem:[%s3902_s21 + $0x78] sm:$0xff] }
  0x57   : > { %406 = vrot.lane.b32.xlu1 %v303_v6, %s3782_s22  ;;  %404 = vrot.lane.b32.xlu0 %v302_v7, %s3782_s22  ;;  %v3990_v30 = vld [vmem:[%s3902_s21 + $0x68] sm:$0xff]  ;;  %260 = vst.msk [vmem:[#allocation2 + $0x60] sm:$0xff] %vm247_vm0, %v3993_v31  ;;  %v4003_v33 = vld [vmem:[%s3902_s21 + $0x70] sm:$0xff]  ;;  %263 = vst.msk [vmem:[#allocation2 + $0x78] sm:$0xff] %vm247_vm0, %v4000_v32 }
  0x58   : > { %261 = vst.msk [vmem:[#allocation2 + $0x68] sm:$0xff] %vm247_vm0, %v3990_v30  ;;  %262 = vst.msk [vmem:[#allocation2 + $0x70] sm:$0xff] %vm247_vm0, %v4003_v33  ;;  %v4010_v34 = vld [vmem:[%s3902_s21 + $0x88] sm:$0xff]  ;;  %v315_v35 = vld [vmem:[%s3902_s21 + $0x99] sm:$0xff] }
  0x59   : > { %265 = vst.msk [vmem:[#allocation2 + $0x88] sm:$0xff] %vm247_vm0, %v4010_v34  ;;  %v4018_v36 = vld [vmem:[%s3902_s21 + $0x80] sm:$0xff]  ;;  %v314_v37 = vld [vmem:[%s3902_s21 + $0x91] sm:$0xff]  ;;  %v4034_v40 = vld [vmem:[%s3902_s21 + $0xa8] sm:$0xff] }
  0x5a   : > { %264 = vst.msk [vmem:[#allocation2 + $0x80] sm:$0xff] %vm247_vm0, %v4018_v36  ;;  %v4024_v38 = vld [vmem:[%s3902_s21 + $0x98] sm:$0xff]  ;;  %v4027_v39 = vld [vmem:[%s3902_s21 + $0x90] sm:$0xff]  ;;  %269 = vst.msk [vmem:[#allocation2 + $0xa8] sm:$0xff] %vm247_vm0, %v4034_v40 }
  0x5b   : > { %410 = vrot.lane.b32.xlu1 %v305_v8, %s3782_s22  ;;  %408 = vrot.lane.b32.xlu0 %v304_v9, %s3782_s22  ;;  %267 = vst.msk [vmem:[#allocation2 + $0x98] sm:$0xff] %vm247_vm0, %v4024_v38  ;;  %266 = vst.msk [vmem:[#allocation2 + $0x90] sm:$0xff] %vm247_vm0, %v4027_v39  ;;  %v4039_v41 = vld [vmem:[%s3902_s21 + $0xa0] sm:$0xff]  ;;  %v4046_v42 = vld [vmem:[%s3902_s21 + $0xb8] sm:$0xff] }
  0x5c   : > { %268 = vst.msk [vmem:[#allocation2 + $0xa0] sm:$0xff] %vm247_vm0, %v4039_v41  ;;  %v4049_v43 = vld [vmem:[%s3902_s21 + $0xb0] sm:$0xff]  ;;  %v316_v45 = vld [vmem:[%s3902_s21 + $0xa1] sm:$0xff]  ;;  %271 = vst.msk [vmem:[#allocation2 + $0xb8] sm:$0xff] %vm247_vm0, %v4046_v42 }
  0x5d   : > { %v317_v44 = vld [vmem:[%s3902_s21 + $0xa9] sm:$0xff]  ;;  %270 = vst.msk [vmem:[#allocation2 + $0xb0] sm:$0xff] %vm247_vm0, %v4049_v43  ;;  %v4063_v47 = vld [vmem:[%s3902_s21 + $0xc0] sm:$0xff]  ;;  %v4068_v48 = vld [vmem:[%s3902_s21 + $0xd8] sm:$0xff] }
  0x5e   : > { %v4058_v46 = vld [vmem:[%s3902_s21 + $0xc8] sm:$0xff]  ;;  %272 = vst.msk [vmem:[#allocation2 + $0xc0] sm:$0xff] %vm247_vm0, %v4063_v47  ;;  %v4071_v49 = vld [vmem:[%s3902_s21 + $0xd0] sm:$0xff]  ;;  %v319_v50 = vld [vmem:[%s3902_s21 + $0xb9] sm:$0xff] }
  0x5f   : > { %414 = vrot.lane.b32.xlu1 %v307_v10, %s3782_s22  ;;  %412 = vrot.lane.b32.xlu0 %v306_v11, %s3782_s22  ;;  %273 = vst.msk [vmem:[#allocation2 + $0xc8] sm:$0xff] %vm247_vm0, %v4058_v46  ;;  %275 = vst.msk [vmem:[#allocation2 + $0xd8] sm:$0xff] %vm247_vm0, %v4068_v48  ;;  %v318_v51 = vld [vmem:[%s3902_s21 + $0xb1] sm:$0xff]  ;;  %v4082_v52 = vld [vmem:[%s3902_s21 + $0xe8] sm:$0xff] }
  0x60   : > { %274 = vst.msk [vmem:[#allocation2 + $0xd0] sm:$0xff] %vm247_vm0, %v4071_v49  ;;  %v4085_v53 = vld [vmem:[%s3902_s21 + $0xe0] sm:$0xff]  ;;  %277 = vst.msk [vmem:[#allocation2 + $0xe8] sm:$0xff] %vm247_vm0, %v4082_v52  ;;  %v321_v54 = vld [vmem:[%s3902_s21 + $0xc9] sm:$0xff] }
  0x61   : > { %276 = vst.msk [vmem:[#allocation2 + $0xe0] sm:$0xff] %vm247_vm0, %v4085_v53  ;;  %v320_v55 = vld [vmem:[%s3902_s21 + $0xc1] sm:$0xff]  ;;  %v4096_v56 = vld [vmem:[%s3902_s21 + $0xf8] sm:$0xff]  ;;  %v4099_v57 = vld [vmem:[%s3902_s21 + $0xf0] sm:$0xff] }
  0x62   : > { %279 = vst.msk [vmem:[#allocation2 + $0xf8] sm:$0xff] %vm247_vm0, %v4096_v56  ;;  %278 = vst.msk [vmem:[#allocation2 + $0xf0] sm:$0xff] %vm247_vm0, %v4099_v57  ;;  %v323_v58 = vld [vmem:[%s3902_s21 + $0xd9] sm:$0xff]  ;;  %v322_v59 = vld [vmem:[%s3902_s21 + $0xd1] sm:$0xff] }
  0x63   : > { %418 = vrot.lane.b32.xlu1 %v309_v14, %s3782_s22  ;;  %416 = vrot.lane.b32.xlu0 %v308_v15, %s3782_s22  ;;  %v4110_v60 = vld [vmem:[%s3902_s21 + $0x108] sm:$0xff]  ;;  %v4113_v61 = vld [vmem:[%s3902_s21 + $0x100] sm:$0xff] }
  0x64   : > { %281 = vst.msk [vmem:[#allocation2 + $0x108] sm:$0xff] %vm247_vm0, %v4110_v60  ;;  %280 = vst.msk [vmem:[#allocation2 + $0x100] sm:$0xff] %vm247_vm0, %v4113_v61  ;;  %v325_v62 = vld [vmem:[%s3902_s21 + $0xe9] sm:$0xff]  ;;  %v324_v63 = vld [vmem:[%s3902_s21 + $0xe1] sm:$0xff] }
  0x65   : > { %v4124_v0 = vld [vmem:[%s3902_s21 + $0x118] sm:$0xff]  ;;  %v4127_v1 = vld [vmem:[%s3902_s21 + $0x110] sm:$0xff]  ;;  %v4138_v4 = vld [vmem:[%s3902_s21 + $0x128] sm:$0xff] }
  0x66   : > { %283 = vst.msk [vmem:[#allocation2 + $0x118] sm:$0xff] %vm247_vm0, %v4124_v0  ;;  %282 = vst.msk [vmem:[#allocation2 + $0x110] sm:$0xff] %vm247_vm0, %v4127_v1  ;;  %v327_v2 = vld [vmem:[%s3902_s21 + $0xf9] sm:$0xff]  ;;  %v326_v3 = vld [vmem:[%s3902_s21 + $0xf1] sm:$0xff] }
  0x67   : > { %422 = vrot.lane.b32.xlu1 %v311_v21, %s3782_s22  ;;  %420 = vrot.lane.b32.xlu0 %v310_v22, %s3782_s22  ;;  %v4141_v5 = vld [vmem:[%s3902_s21 + $0x120] sm:$0xff]  ;;  %285 = vst.msk [vmem:[#allocation2 + $0x128] sm:$0xff] %vm247_vm0, %v4138_v4  ;;  %v329_v6 = vld [vmem:[%s3902_s21 + $0x109] sm:$0xff] }
  0x68   : > { %284 = vst.msk [vmem:[#allocation2 + $0x120] sm:$0xff] %vm247_vm0, %v4141_v5  ;;  %v328_v7 = vld [vmem:[%s3902_s21 + $0x101] sm:$0xff]  ;;  %v4152_v8 = vld [vmem:[%s3902_s21 + $0x138] sm:$0xff]  ;;  %v4155_v9 = vld [vmem:[%s3902_s21 + $0x130] sm:$0xff] }
  0x69   : > { %287 = vst.msk [vmem:[#allocation2 + $0x138] sm:$0xff] %vm247_vm0, %v4152_v8  ;;  %286 = vst.msk [vmem:[#allocation2 + $0x130] sm:$0xff] %vm247_vm0, %v4155_v9  ;;  %v331_v10 = vld [vmem:[%s3902_s21 + $0x119] sm:$0xff]  ;;  %v330_v11 = vld [vmem:[%s3902_s21 + $0x111] sm:$0xff] }
  0x6a   : > { %v4166_v12 = vld [vmem:[%s3902_s21 + $0x148] sm:$0xff]  ;;  %v4169_v13 = vld [vmem:[%s3902_s21 + $0x140] sm:$0xff]  ;;  %v4180_v17 = vld [vmem:[%s3902_s21 + $0x158] sm:$0xff] }
  0x6b   : > { %426 = vrot.lane.b32.xlu1 %v313_v28, %s3782_s22  ;;  %424 = vrot.lane.b32.xlu0 %v312_v29, %s3782_s22  ;;  %289 = vst.msk [vmem:[#allocation2 + $0x148] sm:$0xff] %vm247_vm0, %v4166_v12  ;;  %288 = vst.msk [vmem:[#allocation2 + $0x140] sm:$0xff] %vm247_vm0, %v4169_v13  ;;  %v333_v14 = vld [vmem:[%s3902_s21 + $0x129] sm:$0xff]  ;;  %v332_v15 = vld [vmem:[%s3902_s21 + $0x121] sm:$0xff] }
  0x6c   : > { %v4183_v21 = vld [vmem:[%s3902_s21 + $0x150] sm:$0xff]  ;;  %291 = vst.msk [vmem:[#allocation2 + $0x158] sm:$0xff] %vm247_vm0, %v4180_v17  ;;  %v335_v22 = vld [vmem:[%s3902_s21 + $0x139] sm:$0xff]  ;;  %v4194_v29 = vld [vmem:[%s3902_s21 + $0x168] sm:$0xff] }
  0x6d   : > { %290 = vst.msk [vmem:[#allocation2 + $0x150] sm:$0xff] %vm247_vm0, %v4183_v21  ;;  %v334_v28 = vld [vmem:[%s3902_s21 + $0x131] sm:$0xff]  ;;  %293 = vst.msk [vmem:[#allocation2 + $0x168] sm:$0xff] %vm247_vm0, %v4194_v29 }
  0x6f   : > { %430 = vrot.lane.b32.xlu1 %v315_v35, %s3782_s22  ;;  %428 = vrot.lane.b32.xlu0 %v314_v37, %s3782_s22  ;;  %v4197_v35 = vld [vmem:[%s3902_s21 + $0x160] sm:$0xff]  ;;  %v337_v37 = vld [vmem:[%s3902_s21 + $0x149] sm:$0xff] }
  0x70   : > { %292 = vst.msk [vmem:[#allocation2 + $0x160] sm:$0xff] %vm247_vm0, %v4197_v35 }
  0x73   : > { %434 = vrot.lane.b32.xlu1 %v317_v44, %s3782_s22  ;;  %432 = vrot.lane.b32.xlu0 %v316_v45, %s3782_s22  ;;  %v336_v44 = vld [vmem:[%s3902_s21 + $0x141] sm:$0xff]  ;;  %v4208_v45 = vld [vmem:[%s3902_s21 + $0x178] sm:$0xff] }
  0x74   : > { %295 = vst.msk [vmem:[#allocation2 + $0x178] sm:$0xff] %vm247_vm0, %v4208_v45 }
  0x77   : > { %438 = vrot.lane.b32.xlu1 %v319_v50, %s3782_s22  ;;  %436 = vrot.lane.b32.xlu0 %v318_v51, %s3782_s22  ;;  %v4211_v50 = vld [vmem:[%s3902_s21 + $0x170] sm:$0xff]  ;;  %v339_v51 = vld [vmem:[%s3902_s21 + $0x159] sm:$0xff] }
  0x78   : > { %294 = vst.msk [vmem:[#allocation2 + $0x170] sm:$0xff] %vm247_vm0, %v4211_v50 }
  0x7b   : > { %442 = vrot.lane.b32.xlu1 %v321_v54, %s3782_s22  ;;  %440 = vrot.lane.b32.xlu0 %v320_v55, %s3782_s22  ;;  %v338_v54 = vld [vmem:[%s3902_s21 + $0x151] sm:$0xff]  ;;  %v341_v55 = vld [vmem:[%s3902_s21 + $0x169] sm:$0xff] }
  0x7f   : > { %446 = vrot.lane.b32.xlu1 %v323_v58, %s3782_s22  ;;  %444 = vrot.lane.b32.xlu0 %v322_v59, %s3782_s22  ;;  %v340_v58 = vld [vmem:[%s3902_s21 + $0x161] sm:$0xff]  ;;  %v343_v59 = vld [vmem:[%s3902_s21 + $0x179] sm:$0xff] }
  0x83   : > { %450 = vrot.lane.b32.xlu1 %v325_v62, %s3782_s22  ;;  %448 = vrot.lane.b32.xlu0 %v324_v63, %s3782_s22  ;;  %v342_v62 = vld [vmem:[%s3902_s21 + $0x171] sm:$0xff] }
  0x84   : > { %v586_v63 = vld [vmem:[%s3902_s21 + $0xa] sm:$0xff] }
  0x87   : > { %454 = vrot.lane.b32.xlu1 %v327_v2, %s3782_s22  ;;  %452 = vrot.lane.b32.xlu0 %v326_v3, %s3782_s22  ;;  %v585_v2 = vld [vmem:[%s3902_s21 + $0x2] sm:$0xff]  ;;  %v588_v3 = vld [vmem:[%s3902_s21 + $0x1a] sm:$0xff] }
  0x8b   : > { %458 = vrot.lane.b32.xlu1 %v329_v6, %s3782_s22  ;;  %456 = vrot.lane.b32.xlu0 %v328_v7, %s3782_s22  ;;  %v587_v6 = vld [vmem:[%s3902_s21 + $0x12] sm:$0xff]  ;;  %v590_v7 = vld [vmem:[%s3902_s21 + $0x2a] sm:$0xff] }
  0x8f   : > { %462 = vrot.lane.b32.xlu1 %v331_v10, %s3782_s22  ;;  %460 = vrot.lane.b32.xlu0 %v330_v11, %s3782_s22  ;;  %v589_v10 = vld [vmem:[%s3902_s21 + $0x22] sm:$0xff]  ;;  %v592_v11 = vld [vmem:[%s3902_s21 + $0x3a] sm:$0xff] }
  0x93   : > { %466 = vrot.lane.b32.xlu1 %v333_v14, %s3782_s22  ;;  %464 = vrot.lane.b32.xlu0 %v332_v15, %s3782_s22  ;;  %v591_v14 = vld [vmem:[%s3902_s21 + $0x32] sm:$0xff]  ;;  %v594_v15 = vld [vmem:[%s3902_s21 + $0x4a] sm:$0xff] }
  0x97   : > { %470 = vrot.lane.b32.xlu1 %v335_v22, %s3782_s22  ;;  %468 = vrot.lane.b32.xlu0 %v334_v28, %s3782_s22  ;;  %v593_v22 = vld [vmem:[%s3902_s21 + $0x42] sm:$0xff]  ;;  %v596_v28 = vld [vmem:[%s3902_s21 + $0x5a] sm:$0xff] }
  0x9b   : > { %474 = vrot.lane.b32.xlu1 %v337_v37, %s3782_s22  ;;  %472 = vrot.lane.b32.xlu0 %v336_v44, %s3782_s22  ;;  %v595_v37 = vld [vmem:[%s3902_s21 + $0x52] sm:$0xff] }
  0x9f   : > { %478 = vrot.lane.b32.xlu1 %v339_v51, %s3782_s22  ;;  %476 = vrot.lane.b32.xlu0 %v338_v54, %s3782_s22  ;;  %v598_v54 = vld [vmem:[%s3902_s21 + $0x6a] sm:$0xff] }
  0xa3   : > { %482 = vrot.lane.b32.xlu1 %v341_v55, %s3782_s22  ;;  %480 = vrot.lane.b32.xlu0 %v340_v58, %s3782_s22  ;;  %v597_v55 = vld [vmem:[%s3902_s21 + $0x62] sm:$0xff] }
  0xa7   : > { %486 = vrot.lane.b32.xlu1 %v343_v59, %s3782_s22  ;;  %484 = vrot.lane.b32.xlu0 %v342_v62, %s3782_s22  ;;  %v600_v62 = vld [vmem:[%s3902_s21 + $0x7a] sm:$0xff] }
  0xab   : > { %683 = vrot.lane.b32.xlu1 %v586_v63, %s3783_s23  ;;  %681 = vrot.lane.b32.xlu0 %v585_v2, %s3783_s23  ;;  %v599_v63 = vld [vmem:[%s3902_s21 + $0x72] sm:$0xff] }
  0xaf   : > { %687 = vrot.lane.b32.xlu1 %v588_v3, %s3783_s23  ;;  %685 = vrot.lane.b32.xlu0 %v587_v6, %s3783_s23  ;;  %v602_v6 = vld [vmem:[%s3902_s21 + $0x8a] sm:$0xff] }
  0xb3   : > { %691 = vrot.lane.b32.xlu1 %v590_v7, %s3783_s23  ;;  %689 = vrot.lane.b32.xlu0 %v589_v10, %s3783_s23  ;;  %v601_v7 = vld [vmem:[%s3902_s21 + $0x82] sm:$0xff] }
  0xb7   : > { %695 = vrot.lane.b32.xlu1 %v592_v11, %s3783_s23  ;;  %693 = vrot.lane.b32.xlu0 %v591_v14, %s3783_s23  ;;  %v604_v14 = vld [vmem:[%s3902_s21 + $0x9a] sm:$0xff] }
  0xbb   : > { %699 = vrot.lane.b32.xlu1 %v594_v15, %s3783_s23  ;;  %697 = vrot.lane.b32.xlu0 %v593_v22, %s3783_s23  ;;  %v603_v15 = vld [vmem:[%s3902_s21 + $0x92] sm:$0xff] }
  0xbd   : > { %v397_v44 = vpop.permute.xlu1 %396  ;;  %v393_v51 = vpop.permute.xlu0 %392 }
  0xbe   : > { %539 = vst.msk [vmem:[#allocation2 + $0x10] sm:$0xff] %vm536_vm1, %v397_v44  ;;  %537 = vst.msk [vmem:[#allocation2] sm:$0xff] %vm536_vm1, %v393_v51  ;;  %v605_v44 = vld [vmem:[%s3902_s21 + $0xa2] sm:$0xff] }
  0xbf   : > { %703 = vrot.lane.b32.xlu1 %v596_v28, %s3783_s23  ;;  %701 = vrot.lane.b32.xlu0 %v595_v37, %s3783_s23  ;;  %v606_v37 = vld [vmem:[%s3902_s21 + $0xaa] sm:$0xff] }
  0xc1   : > { %v399_v58 = vpop.permute.xlu1 %398  ;;  %v395_v59 = vpop.permute.xlu0 %394 }
  0xc2   : > { %540 = vst.msk [vmem:[#allocation2 + $0x18] sm:$0xff] %vm536_vm1, %v399_v58  ;;  %538 = vst.msk [vmem:[#allocation2 + $0x8] sm:$0xff] %vm536_vm1, %v395_v59  ;;  %v607_v58 = vld [vmem:[%s3902_s21 + $0xb2] sm:$0xff] }
  0xc3   : > { %707 = vrot.lane.b32.xlu1 %v598_v54, %s3783_s23  ;;  %705 = vrot.lane.b32.xlu0 %v597_v55, %s3783_s23  ;;  %v608_v55 = vld [vmem:[%s3902_s21 + $0xba] sm:$0xff] }
  0xc5   : > { %v403_v2 = vpop.permute.xlu1 %402  ;;  %v401_v3 = vpop.permute.xlu0 %400 }
  0xc6   : > { %542 = vst.msk [vmem:[#allocation2 + $0x28] sm:$0xff] %vm536_vm1, %v403_v2  ;;  %541 = vst.msk [vmem:[#allocation2 + $0x20] sm:$0xff] %vm536_vm1, %v401_v3  ;;  %v609_v2 = vld [vmem:[%s3902_s21 + $0xc2] sm:$0xff] }
  0xc7   : > { %711 = vrot.lane.b32.xlu1 %v600_v62, %s3783_s23  ;;  %709 = vrot.lane.b32.xlu0 %v599_v63, %s3783_s23  ;;  %v610_v63 = vld [vmem:[%s3902_s21 + $0xca] sm:$0xff] }
  0xc9   : > { %v407_v10 = vpop.permute.xlu1 %406  ;;  %v405_v11 = vpop.permute.xlu0 %404 }
  0xca   : > { %544 = vst.msk [vmem:[#allocation2 + $0x38] sm:$0xff] %vm536_vm1, %v407_v10  ;;  %543 = vst.msk [vmem:[#allocation2 + $0x30] sm:$0xff] %vm536_vm1, %v405_v11  ;;  %v611_v10 = vld [vmem:[%s3902_s21 + $0xd2] sm:$0xff] }
  0xcb   : > { %715 = vrot.lane.b32.xlu1 %v602_v6, %s3783_s23  ;;  %713 = vrot.lane.b32.xlu0 %v601_v7, %s3783_s23  ;;  %v612_v7 = vld [vmem:[%s3902_s21 + $0xda] sm:$0xff] }
  0xcd   : > { %v411_v22 = vpop.permute.xlu1 %410  ;;  %v409_v28 = vpop.permute.xlu0 %408 }
  0xce   : > { %546 = vst.msk [vmem:[#allocation2 + $0x48] sm:$0xff] %vm536_vm1, %v411_v22  ;;  %545 = vst.msk [vmem:[#allocation2 + $0x40] sm:$0xff] %vm536_vm1, %v409_v28  ;;  %v613_v22 = vld [vmem:[%s3902_s21 + $0xe2] sm:$0xff] }
  0xcf   : > { %719 = vrot.lane.b32.xlu1 %v604_v14, %s3783_s23  ;;  %717 = vrot.lane.b32.xlu0 %v603_v15, %s3783_s23  ;;  %v614_v15 = vld [vmem:[%s3902_s21 + $0xea] sm:$0xff] }
  0xd1   : > { %v415_v51 = vpop.permute.xlu1 %414  ;;  %v413_v54 = vpop.permute.xlu0 %412 }
  0xd2   : > { %548 = vst.msk [vmem:[#allocation2 + $0x58] sm:$0xff] %vm536_vm1, %v415_v51  ;;  %547 = vst.msk [vmem:[#allocation2 + $0x50] sm:$0xff] %vm536_vm1, %v413_v54  ;;  %v615_v51 = vld [vmem:[%s3902_s21 + $0xf2] sm:$0xff] }
  0xd3   : > { %723 = vrot.lane.b32.xlu1 %v606_v37, %s3783_s23  ;;  %721 = vrot.lane.b32.xlu0 %v605_v44, %s3783_s23  ;;  %v616_v44 = vld [vmem:[%s3902_s21 + $0xfa] sm:$0xff] }
  0xd5   : > { %v419_v59 = vpop.permute.xlu1 %418  ;;  %v417_v62 = vpop.permute.xlu0 %416 }
  0xd6   : > { %550 = vst.msk [vmem:[#allocation2 + $0x68] sm:$0xff] %vm536_vm1, %v419_v59  ;;  %549 = vst.msk [vmem:[#allocation2 + $0x60] sm:$0xff] %vm536_vm1, %v417_v62  ;;  %v617_v59 = vld [vmem:[%s3902_s21 + $0x102] sm:$0xff] }
  0xd7   : > { %727 = vrot.lane.b32.xlu1 %v608_v55, %s3783_s23  ;;  %725 = vrot.lane.b32.xlu0 %v607_v58, %s3783_s23  ;;  %v618_v58 = vld [vmem:[%s3902_s21 + $0x10a] sm:$0xff] }
  0xd9   : > { %v423_v3 = vpop.permute.xlu1 %422  ;;  %v421_v6 = vpop.permute.xlu0 %420 }
  0xda   : > { %552 = vst.msk [vmem:[#allocation2 + $0x78] sm:$0xff] %vm536_vm1, %v423_v3  ;;  %551 = vst.msk [vmem:[#allocation2 + $0x70] sm:$0xff] %vm536_vm1, %v421_v6  ;;  %v619_v3 = vld [vmem:[%s3902_s21 + $0x112] sm:$0xff] }
  0xdb   : > { %731 = vrot.lane.b32.xlu1 %v610_v63, %s3783_s23  ;;  %729 = vrot.lane.b32.xlu0 %v609_v2, %s3783_s23  ;;  %v620_v2 = vld [vmem:[%s3902_s21 + $0x11a] sm:$0xff] }
  0xdd   : > { %v427_v11 = vpop.permute.xlu1 %426  ;;  %v425_v14 = vpop.permute.xlu0 %424 }
  0xde   : > { %554 = vst.msk [vmem:[#allocation2 + $0x88] sm:$0xff] %vm536_vm1, %v427_v11  ;;  %553 = vst.msk [vmem:[#allocation2 + $0x80] sm:$0xff] %vm536_vm1, %v425_v14  ;;  %v621_v11 = vld [vmem:[%s3902_s21 + $0x122] sm:$0xff] }
  0xdf   : > { %735 = vrot.lane.b32.xlu1 %v612_v7, %s3783_s23  ;;  %733 = vrot.lane.b32.xlu0 %v611_v10, %s3783_s23  ;;  %v622_v10 = vld [vmem:[%s3902_s21 + $0x12a] sm:$0xff] }
  0xe1   : > { %v431_v28 = vpop.permute.xlu1 %430  ;;  %v429_v37 = vpop.permute.xlu0 %428 }
  0xe2   : > { %556 = vst.msk [vmem:[#allocation2 + $0x98] sm:$0xff] %vm536_vm1, %v431_v28  ;;  %555 = vst.msk [vmem:[#allocation2 + $0x90] sm:$0xff] %vm536_vm1, %v429_v37  ;;  %v623_v28 = vld [vmem:[%s3902_s21 + $0x132] sm:$0xff] }
  0xe3   : > { %739 = vrot.lane.b32.xlu1 %v614_v15, %s3783_s23  ;;  %737 = vrot.lane.b32.xlu0 %v613_v22, %s3783_s23  ;;  %v624_v22 = vld [vmem:[%s3902_s21 + $0x13a] sm:$0xff] }
  0xe5   : > { %v435_v54 = vpop.permute.xlu1 %434  ;;  %v433_v55 = vpop.permute.xlu0 %432 }
  0xe6   : > { %558 = vst.msk [vmem:[#allocation2 + $0xa8] sm:$0xff] %vm536_vm1, %v435_v54  ;;  %557 = vst.msk [vmem:[#allocation2 + $0xa0] sm:$0xff] %vm536_vm1, %v433_v55  ;;  %v625_v54 = vld [vmem:[%s3902_s21 + $0x142] sm:$0xff] }
  0xe7   : > { %743 = vrot.lane.b32.xlu1 %v616_v44, %s3783_s23  ;;  %741 = vrot.lane.b32.xlu0 %v615_v51, %s3783_s23  ;;  %v626_v51 = vld [vmem:[%s3902_s21 + $0x14a] sm:$0xff] }
  0xe9   : > { %v439_v62 = vpop.permute.xlu1 %438  ;;  %v437_v63 = vpop.permute.xlu0 %436 }
  0xea   : > { %560 = vst.msk [vmem:[#allocation2 + $0xb8] sm:$0xff] %vm536_vm1, %v439_v62  ;;  %559 = vst.msk [vmem:[#allocation2 + $0xb0] sm:$0xff] %vm536_vm1, %v437_v63  ;;  %v627_v62 = vld [vmem:[%s3902_s21 + $0x152] sm:$0xff] }
  0xeb   : > { %747 = vrot.lane.b32.xlu1 %v618_v58, %s3783_s23  ;;  %745 = vrot.lane.b32.xlu0 %v617_v59, %s3783_s23  ;;  %v628_v59 = vld [vmem:[%s3902_s21 + $0x15a] sm:$0xff] }
  0xed   : > { %v443_v6 = vpop.permute.xlu1 %442  ;;  %v441_v7 = vpop.permute.xlu0 %440 }
  0xee   : > { %562 = vst.msk [vmem:[#allocation2 + $0xc8] sm:$0xff] %vm536_vm1, %v443_v6  ;;  %561 = vst.msk [vmem:[#allocation2 + $0xc0] sm:$0xff] %vm536_vm1, %v441_v7  ;;  %v629_v6 = vld [vmem:[%s3902_s21 + $0x162] sm:$0xff] }
  0xef   : > { %751 = vrot.lane.b32.xlu1 %v620_v2, %s3783_s23  ;;  %749 = vrot.lane.b32.xlu0 %v619_v3, %s3783_s23  ;;  %v630_v3 = vld [vmem:[%s3902_s21 + $0x16a] sm:$0xff] }
  0xf1   : > { %v447_v14 = vpop.permute.xlu1 %446  ;;  %v445_v15 = vpop.permute.xlu0 %444 }
  0xf2   : > { %564 = vst.msk [vmem:[#allocation2 + $0xd8] sm:$0xff] %vm536_vm1, %v447_v14  ;;  %563 = vst.msk [vmem:[#allocation2 + $0xd0] sm:$0xff] %vm536_vm1, %v445_v15  ;;  %v631_v14 = vld [vmem:[%s3902_s21 + $0x172] sm:$0xff] }
  0xf3   : > { %755 = vrot.lane.b32.xlu1 %v622_v10, %s3783_s23  ;;  %753 = vrot.lane.b32.xlu0 %v621_v11, %s3783_s23  ;;  %v632_v11 = vld [vmem:[%s3902_s21 + $0x17a] sm:$0xff] }
  0xf5   : > { %v451_v37 = vpop.permute.xlu1 %450  ;;  %v449_v44 = vpop.permute.xlu0 %448 }
  0xf6   : > { %566 = vst.msk [vmem:[#allocation2 + $0xe8] sm:$0xff] %vm536_vm1, %v451_v37  ;;  %565 = vst.msk [vmem:[#allocation2 + $0xe0] sm:$0xff] %vm536_vm1, %v449_v44 }
  0xf7   : > { %759 = vrot.lane.b32.xlu1 %v624_v22, %s3783_s23  ;;  %757 = vrot.lane.b32.xlu0 %v623_v28, %s3783_s23 }
  0xf9   : > { %v455_v55 = vpop.permute.xlu1 %454  ;;  %v453_v58 = vpop.permute.xlu0 %452 }
  0xfa   : > { %568 = vst.msk [vmem:[#allocation2 + $0xf8] sm:$0xff] %vm536_vm1, %v455_v55  ;;  %567 = vst.msk [vmem:[#allocation2 + $0xf0] sm:$0xff] %vm536_vm1, %v453_v58  ;;  %v920_v58 = vld [vmem:[%s3902_s21 + $0x188] sm:$0xff] }
  0xfb   : > { %763 = vrot.lane.b32.xlu1 %v626_v51, %s3783_s23  ;;  %761 = vrot.lane.b32.xlu0 %v625_v54, %s3783_s23 }
  0xfd   : > { %v459_v63 = vpop.permute.xlu1 %458  ;;  %v457_v2 = vpop.permute.xlu0 %456 }
  0xfe   : > { %570 = vst.msk [vmem:[#allocation2 + $0x108] sm:$0xff] %vm536_vm1, %v459_v63  ;;  %569 = vst.msk [vmem:[#allocation2 + $0x100] sm:$0xff] %vm536_vm1, %v457_v2  ;;  %v4516_v2 = vld [vmem:[%s3902_s21 + $0x31] sm:$0xff] }
  0xff   : > { %767 = vrot.lane.b32.xlu1 %v628_v59, %s3783_s23  ;;  %765 = vrot.lane.b32.xlu0 %v627_v62, %s3783_s23  ;;  %v1164_v59 = vld [vmem:[%s3902_s21 + $0x21] sm:$0xff]  ;;  %v1163_v62 = vld [vmem:[%s3902_s21 + $0x19] sm:$0xff] }
 0x101   : > { %v463_v7 = vpop.permute.xlu1 %462  ;;  %v461_v10 = vpop.permute.xlu0 %460 }
 0x102   : > { %572 = vst.msk [vmem:[#allocation2 + $0x118] sm:$0xff] %vm536_vm1, %v463_v7  ;;  %571 = vst.msk [vmem:[#allocation2 + $0x110] sm:$0xff] %vm536_vm1, %v461_v10  ;;  %v4525_v10 = vld [vmem:[%s3902_s21 + $0x41] sm:$0xff] }
 0x103   : > { %771 = vrot.lane.b32.xlu1 %v630_v3, %s3783_s23  ;;  %769 = vrot.lane.b32.xlu0 %v629_v6, %s3783_s23  ;;  %v1165_v3 = vld [vmem:[%s3902_s21 + $0x29] sm:$0xff] }
 0x105   : > { %v467_v15 = vpop.permute.xlu1 %466  ;;  %v465_v22 = vpop.permute.xlu0 %464 }
 0x106   : > { %574 = vst.msk [vmem:[#allocation2 + $0x128] sm:$0xff] %vm536_vm1, %v467_v15  ;;  %573 = vst.msk [vmem:[#allocation2 + $0x120] sm:$0xff] %vm536_vm1, %v465_v22  ;;  %v4537_v22 = vld [vmem:[%s3902_s21 + $0x51] sm:$0xff] }
 0x107   : > { %775 = vrot.lane.b32.xlu1 %v632_v11, %s3783_s23  ;;  %773 = vrot.lane.b32.xlu0 %v631_v14, %s3783_s23  ;;  %v4528_v11 = vld [vmem:[%s3902_s21 + $0x39] sm:$0xff] }
 0x109   : > { %v471_v28 = vpop.permute.xlu1 %470  ;;  %v469_v37 = vpop.permute.xlu0 %468 }
 0x10a   : > { %576 = vst.msk [vmem:[#allocation2 + $0x138] sm:$0xff] %vm536_vm1, %v471_v28  ;;  %575 = vst.msk [vmem:[#allocation2 + $0x130] sm:$0xff] %vm536_vm1, %v469_v37  ;;  %v4540_v28 = vld [vmem:[%s3902_s21 + $0x49] sm:$0xff] }
 0x10b   : > { %972 = vrot.lane.b32.xlu1 %v3945_v19, %s3784_s24  ;;  %970 = vrot.lane.b32.xlu0 %v3935_v16, %s3784_s24 }
 0x10d   : > { %v475_v44 = vpop.permute.xlu1 %474  ;;  %v473_v51 = vpop.permute.xlu0 %472 }
 0x10e   : > { %578 = vst.msk [vmem:[#allocation2 + $0x148] sm:$0xff] %vm536_vm1, %v475_v44  ;;  %577 = vst.msk [vmem:[#allocation2 + $0x140] sm:$0xff] %vm536_vm1, %v473_v51  ;;  %v4549_v51 = vld [vmem:[%s3902_s21 + $0x61] sm:$0xff] }
 0x10f   : > { %976 = vrot.lane.b32.xlu1 %v3961_v23, %s3784_s24  ;;  %974 = vrot.lane.b32.xlu0 %v3942_v18, %s3784_s24 }
 0x111   : > { %v479_v54 = vpop.permute.xlu1 %478  ;;  %v477_v55 = vpop.permute.xlu0 %476 }
 0x112   : > { %580 = vst.msk [vmem:[#allocation2 + $0x158] sm:$0xff] %vm536_vm1, %v479_v54  ;;  %579 = vst.msk [vmem:[#allocation2 + $0x150] sm:$0xff] %vm536_vm1, %v477_v55  ;;  %v4552_v54 = vld [vmem:[%s3902_s21 + $0x59] sm:$0xff] }
 0x113   : > { %980 = vrot.lane.b32.xlu1 %v3969_v25, %s3784_s24  ;;  %978 = vrot.lane.b32.xlu0 %v3954_v20, %s3784_s24 }
 0x115   : > { %v483_v16 = vpop.permute.xlu1 %482  ;;  %v481_v19 = vpop.permute.xlu0 %480 }
 0x116   : > { %582 = vst.msk [vmem:[#allocation2 + $0x168] sm:$0xff] %vm536_vm1, %v483_v16  ;;  %581 = vst.msk [vmem:[#allocation2 + $0x160] sm:$0xff] %vm536_vm1, %v481_v19  ;;  %v4561_v19 = vld [vmem:[%s3902_s21 + $0x71] sm:$0xff] }
 0x117   : > { %984 = vrot.lane.b32.xlu1 %v3979_v27, %s3784_s24  ;;  %982 = vrot.lane.b32.xlu0 %v3966_v24, %s3784_s24 }
 0x119   : > { %v487_v18 = vpop.permute.xlu1 %486  ;;  %v485_v23 = vpop.permute.xlu0 %484 }
 0x11a   : > { %584 = vst.msk [vmem:[#allocation2 + $0x178] sm:$0xff] %vm536_vm1, %v487_v18  ;;  %583 = vst.msk [vmem:[#allocation2 + $0x170] sm:$0xff] %vm536_vm1, %v485_v23  ;;  %v4564_v18 = vld [vmem:[%s3902_s21 + $0x69] sm:$0xff] }
 0x11b   : > { %988 = vrot.lane.b32.xlu1 %v3993_v31, %s3784_s24  ;;  %986 = vrot.lane.b32.xlu0 %v3976_v26, %s3784_s24 }
 0x11d   : > { %v684_v20 = vpop.permute.xlu1 %683  ;;  %v682_v25 = vpop.permute.xlu0 %681 }
 0x11e   : > { %827 = vst.msk [vmem:[#allocation2 + $0x8] sm:$0xff] %vm825_vm2, %v684_v20  ;;  %826 = vst.msk [vmem:[#allocation2] sm:$0xff] %vm825_vm2, %v682_v25  ;;  %v1176_v25 = vld [vmem:[%s3902_s21 + $0x81] sm:$0xff] }
 0x11f   : > { %992 = vrot.lane.b32.xlu1 %v4003_v33, %s3784_s24  ;;  %990 = vrot.lane.b32.xlu0 %v3990_v30, %s3784_s24 }
 0x121   : > { %v688_v24 = vpop.permute.xlu1 %687  ;;  %v686_v27 = vpop.permute.xlu0 %685 }
 0x122   : > { %829 = vst.msk [vmem:[#allocation2 + $0x18] sm:$0xff] %vm825_vm2, %v688_v24  ;;  %828 = vst.msk [vmem:[#allocation2 + $0x10] sm:$0xff] %vm825_vm2, %v686_v27  ;;  %v4574_v24 = vld [vmem:[%s3902_s21 + $0x79] sm:$0xff] }
 0x123   : > { %996 = vrot.lane.b32.xlu1 %v4018_v36, %s3784_s24  ;;  %994 = vrot.lane.b32.xlu0 %v4000_v32, %s3784_s24 }
 0x125   : > { %v692_v26 = vpop.permute.xlu1 %691  ;;  %v690_v31 = vpop.permute.xlu0 %689 }
 0x126   : > { %831 = vst.msk [vmem:[#allocation2 + $0x28] sm:$0xff] %vm825_vm2, %v692_v26  ;;  %830 = vst.msk [vmem:[#allocation2 + $0x20] sm:$0xff] %vm825_vm2, %v690_v31  ;;  %v1178_v31 = vld [vmem:[%s3902_s21 + $0x91] sm:$0xff] }
 0x127   : > { %1000 = vrot.lane.b32.xlu1 %v4027_v39, %s3784_s24  ;;  %998 = vrot.lane.b32.xlu0 %v4010_v34, %s3784_s24 }
 0x129   : > { %v696_v30 = vpop.permute.xlu1 %695  ;;  %v694_v33 = vpop.permute.xlu0 %693 }
 0x12a   : > { %833 = vst.msk [vmem:[#allocation2 + $0x38] sm:$0xff] %vm825_vm2, %v696_v30  ;;  %832 = vst.msk [vmem:[#allocation2 + $0x30] sm:$0xff] %vm825_vm2, %v694_v33  ;;  %v1177_v30 = vld [vmem:[%s3902_s21 + $0x89] sm:$0xff] }
 0x12b   : > { %1004 = vrot.lane.b32.xlu1 %v4039_v41, %s3784_s24  ;;  %1002 = vrot.lane.b32.xlu0 %v4024_v38, %s3784_s24 }
 0x12d   : > { %v700_v32 = vpop.permute.xlu1 %699  ;;  %v698_v36 = vpop.permute.xlu0 %697 }
 0x12e   : > { %835 = vst.msk [vmem:[#allocation2 + $0x48] sm:$0xff] %vm825_vm2, %v700_v32  ;;  %834 = vst.msk [vmem:[#allocation2 + $0x40] sm:$0xff] %vm825_vm2, %v698_v36  ;;  %v1180_v36 = vld [vmem:[%s3902_s21 + $0xa1] sm:$0xff] }
 0x12f   : > { %1008 = vrot.lane.b32.xlu1 %v4049_v43, %s3784_s24  ;;  %1006 = vrot.lane.b32.xlu0 %v4034_v40, %s3784_s24 }
 0x131   : > { %v704_v34 = vpop.permute.xlu1 %703  ;;  %v702_v39 = vpop.permute.xlu0 %701 }
 0x132   : > { %837 = vst.msk [vmem:[#allocation2 + $0x58] sm:$0xff] %vm825_vm2, %v704_v34  ;;  %836 = vst.msk [vmem:[#allocation2 + $0x50] sm:$0xff] %vm825_vm2, %v702_v39  ;;  %v1179_v34 = vld [vmem:[%s3902_s21 + $0x99] sm:$0xff] }
 0x133   : > { %1012 = vrot.lane.b32.xlu1 %v4063_v47, %s3784_s24  ;;  %1010 = vrot.lane.b32.xlu0 %v4046_v42, %s3784_s24 }
 0x135   : > { %v708_v38 = vpop.permute.xlu1 %707  ;;  %v706_v41 = vpop.permute.xlu0 %705 }
 0x136   : > { %839 = vst.msk [vmem:[#allocation2 + $0x68] sm:$0xff] %vm825_vm2, %v708_v38  ;;  %838 = vst.msk [vmem:[#allocation2 + $0x60] sm:$0xff] %vm825_vm2, %v706_v41  ;;  %v1182_v41 = vld [vmem:[%s3902_s21 + $0xb1] sm:$0xff] }
 0x137   : > { %1016 = vrot.lane.b32.xlu1 %v4071_v49, %s3784_s24  ;;  %1014 = vrot.lane.b32.xlu0 %v4058_v46, %s3784_s24 }
 0x139   : > { %v712_v40 = vpop.permute.xlu1 %711  ;;  %v710_v43 = vpop.permute.xlu0 %709 }
 0x13a   : > { %841 = vst.msk [vmem:[#allocation2 + $0x78] sm:$0xff] %vm825_vm2, %v712_v40  ;;  %840 = vst.msk [vmem:[#allocation2 + $0x70] sm:$0xff] %vm825_vm2, %v710_v43  ;;  %v1181_v40 = vld [vmem:[%s3902_s21 + $0xa9] sm:$0xff] }
 0x13b   : > { %1020 = vrot.lane.b32.xlu1 %v4085_v53, %s3784_s24  ;;  %1018 = vrot.lane.b32.xlu0 %v4068_v48, %s3784_s24 }
 0x13d   : > { %v716_v42 = vpop.permute.xlu1 %715  ;;  %v714_v47 = vpop.permute.xlu0 %713 }
 0x13e   : > { %843 = vst.msk [vmem:[#allocation2 + $0x88] sm:$0xff] %vm825_vm2, %v716_v42  ;;  %842 = vst.msk [vmem:[#allocation2 + $0x80] sm:$0xff] %vm825_vm2, %v714_v47  ;;  %v1184_v47 = vld [vmem:[%s3902_s21 + $0xc1] sm:$0xff] }
 0x13f   : > { %1024 = vrot.lane.b32.xlu1 %v4099_v57, %s3784_s24  ;;  %1022 = vrot.lane.b32.xlu0 %v4082_v52, %s3784_s24 }
 0x141   : > { %v720_v46 = vpop.permute.xlu1 %719  ;;  %v718_v49 = vpop.permute.xlu0 %717 }
 0x142   : > { %845 = vst.msk [vmem:[#allocation2 + $0x98] sm:$0xff] %vm825_vm2, %v720_v46  ;;  %844 = vst.msk [vmem:[#allocation2 + $0x90] sm:$0xff] %vm825_vm2, %v718_v49  ;;  %v1183_v46 = vld [vmem:[%s3902_s21 + $0xb9] sm:$0xff] }
 0x143   : > { %1028 = vrot.lane.b32.xlu1 %v4113_v61, %s3784_s24  ;;  %1026 = vrot.lane.b32.xlu0 %v4096_v56, %s3784_s24 }
 0x145   : > { %v724_v48 = vpop.permute.xlu1 %723  ;;  %v722_v53 = vpop.permute.xlu0 %721 }
 0x146   : > { %847 = vst.msk [vmem:[#allocation2 + $0xa8] sm:$0xff] %vm825_vm2, %v724_v48  ;;  %846 = vst.msk [vmem:[#allocation2 + $0xa0] sm:$0xff] %vm825_vm2, %v722_v53  ;;  %v1186_v53 = vld [vmem:[%s3902_s21 + $0xd1] sm:$0xff] }
 0x147   : > { %1032 = vrot.lane.b32.xlu1 %v4127_v1, %s3784_s24  ;;  %1030 = vrot.lane.b32.xlu0 %v4110_v60, %s3784_s24 }
 0x149   : > { %v728_v52 = vpop.permute.xlu1 %727  ;;  %v726_v57 = vpop.permute.xlu0 %725 }
 0x14a   : > { %849 = vst.msk [vmem:[#allocation2 + $0xb8] sm:$0xff] %vm825_vm2, %v728_v52  ;;  %848 = vst.msk [vmem:[#allocation2 + $0xb0] sm:$0xff] %vm825_vm2, %v726_v57  ;;  %v1185_v52 = vld [vmem:[%s3902_s21 + $0xc9] sm:$0xff] }
 0x14b   : > { %1036 = vrot.lane.b32.xlu1 %v4141_v5, %s3784_s24  ;;  %1034 = vrot.lane.b32.xlu0 %v4124_v0, %s3784_s24 }
 0x14d   : > { %v732_v56 = vpop.permute.xlu1 %731  ;;  %v730_v61 = vpop.permute.xlu0 %729 }
 0x14e   : > { %851 = vst.msk [vmem:[#allocation2 + $0xc8] sm:$0xff] %vm825_vm2, %v732_v56  ;;  %850 = vst.msk [vmem:[#allocation2 + $0xc0] sm:$0xff] %vm825_vm2, %v730_v61  ;;  %v1188_v61 = vld [vmem:[%s3902_s21 + $0xe1] sm:$0xff] }
 0x14f   : > { %1040 = vrot.lane.b32.xlu1 %v4155_v9, %s3784_s24  ;;  %1038 = vrot.lane.b32.xlu0 %v4138_v4, %s3784_s24 }
 0x151   : > { %v736_v60 = vpop.permute.xlu1 %735  ;;  %v734_v1 = vpop.permute.xlu0 %733 }
 0x152   : > { %853 = vst.msk [vmem:[#allocation2 + $0xd8] sm:$0xff] %vm825_vm2, %v736_v60  ;;  %852 = vst.msk [vmem:[#allocation2 + $0xd0] sm:$0xff] %vm825_vm2, %v734_v1  ;;  %v1187_v60 = vld [vmem:[%s3902_s21 + $0xd9] sm:$0xff] }
 0x153   : > { %1044 = vrot.lane.b32.xlu1 %v4169_v13, %s3784_s24  ;;  %1042 = vrot.lane.b32.xlu0 %v4152_v8, %s3784_s24 }
 0x155   : > { %v740_v0 = vpop.permute.xlu1 %739  ;;  %v738_v5 = vpop.permute.xlu0 %737 }
 0x156   : > { %855 = vst.msk [vmem:[#allocation2 + $0xe8] sm:$0xff] %vm825_vm2, %v740_v0  ;;  %854 = vst.msk [vmem:[#allocation2 + $0xe0] sm:$0xff] %vm825_vm2, %v738_v5  ;;  %v4618_v5 = vld [vmem:[%s3902_s21 + $0xf1] sm:$0xff] }
 0x157   : > { %1048 = vrot.lane.b32.xlu1 %v4183_v21, %s3784_s24  ;;  %1046 = vrot.lane.b32.xlu0 %v4166_v12, %s3784_s24  ;;  %v919_v12 = vld [vmem:[%s3902_s21 + $0x180] sm:$0xff] }
 0x159   : > { %v744_v4 = vpop.permute.xlu1 %743  ;;  %v742_v9 = vpop.permute.xlu0 %741 }
 0x15a   : > { %857 = vst.msk [vmem:[#allocation2 + $0xf8] sm:$0xff] %vm825_vm2, %v744_v4  ;;  %856 = vst.msk [vmem:[#allocation2 + $0xf0] sm:$0xff] %vm825_vm2, %v742_v9  ;;  %v1189_v4 = vld [vmem:[%s3902_s21 + $0xe9] sm:$0xff] }
 0x15b   : > { %1052 = vrot.lane.b32.xlu1 %v4197_v35, %s3784_s24  ;;  %1050 = vrot.lane.b32.xlu0 %v4180_v17, %s3784_s24  ;;  %v921_v17 = vld [vmem:[%s3902_s21 + $0x190] sm:$0xff] }
 0x15d   : > { %v748_v8 = vpop.permute.xlu1 %747  ;;  %v746_v13 = vpop.permute.xlu0 %745 }
 0x15e   : > { %859 = vst.msk [vmem:[#allocation2 + $0x108] sm:$0xff] %vm825_vm2, %v748_v8  ;;  %858 = vst.msk [vmem:[#allocation2 + $0x100] sm:$0xff] %vm825_vm2, %v746_v13  ;;  %v4627_v13 = vld [vmem:[%s3902_s21 + $0x101] sm:$0xff] }
 0x15f   : > { %1056 = vrot.lane.b32.xlu1 %v4211_v50, %s3784_s24  ;;  %1054 = vrot.lane.b32.xlu0 %v4194_v29, %s3784_s24 }
 0x161   : > { %v752_v21 = vpop.permute.xlu1 %751  ;;  %v750_v35 = vpop.permute.xlu0 %749 }
 0x162   : > { %861 = vst.msk [vmem:[#allocation2 + $0x118] sm:$0xff] %vm825_vm2, %v752_v21  ;;  %860 = vst.msk [vmem:[#allocation2 + $0x110] sm:$0xff] %vm825_vm2, %v750_v35 }
 0x163   : > { %1060 = vrot.lane.b32.xlu1 %v919_v12, %s3784_s24  ;;  %1058 = vrot.lane.b32.xlu0 %v4208_v45, %s3784_s24  ;;  %v4630_v12 = vld [vmem:[%s3902_s21 + $0xf9] sm:$0xff] }
 0x165   : > { %v756_v50 = vpop.permute.xlu1 %755  ;;  %v754_v29 = vpop.permute.xlu0 %753 }
 0x166   : > { %863 = vst.msk [vmem:[#allocation2 + $0x128] sm:$0xff] %vm825_vm2, %v756_v50  ;;  %862 = vst.msk [vmem:[#allocation2 + $0x120] sm:$0xff] %vm825_vm2, %v754_v29 }
 0x167   : > { %1064 = vrot.lane.b32.xlu1 %v921_v17, %s3784_s24  ;;  %1062 = vrot.lane.b32.xlu0 %v920_v58, %s3784_s24  ;;  %v4639_v17 = vld [vmem:[%s3902_s21 + $0x111] sm:$0xff]  ;;  %v4642_v58 = vld [vmem:[%s3902_s21 + $0x109] sm:$0xff] }
 0x169   : > { %v760_v63 = vpop.permute.xlu1 %759  ;;  %v758_v45 = vpop.permute.xlu0 %757 }
 0x16a   : > { %865 = vst.msk [vmem:[#allocation2 + $0x138] sm:$0xff] %vm825_vm2, %v760_v63  ;;  %864 = vst.msk [vmem:[#allocation2 + $0x130] sm:$0xff] %vm825_vm2, %v758_v45 }
 0x16b   : > { %1261 = vrot.lane.b32.xlu1 %v1164_v59, %s3785_s25  ;;  %1259 = vrot.lane.b32.xlu0 %v1163_v62, %s3785_s25  ;;  %v4651_v59 = vld [vmem:[%s3902_s21 + $0x121] sm:$0xff]  ;;  %v4654_v62 = vld [vmem:[%s3902_s21 + $0x119] sm:$0xff] }
 0x16d   : > { %v764_v6 = vpop.permute.xlu1 %763  ;;  %v762_v7 = vpop.permute.xlu0 %761 }
 0x16e   : > { %867 = vst.msk [vmem:[#allocation2 + $0x148] sm:$0xff] %vm825_vm2, %v764_v6  ;;  %866 = vst.msk [vmem:[#allocation2 + $0x140] sm:$0xff] %vm825_vm2, %v762_v7  ;;  %v4666_v6 = vld [vmem:[%s3902_s21 + $0x129] sm:$0xff] }
 0x16f   : > { %1265 = vrot.lane.b32.xlu1 %v4516_v2, %s3785_s25  ;;  %1263 = vrot.lane.b32.xlu0 %v1165_v3, %s3785_s25  ;;  %v4663_v3 = vld [vmem:[%s3902_s21 + $0x131] sm:$0xff] }
 0x171   : > { %v768_v14 = vpop.permute.xlu1 %767  ;;  %v766_v15 = vpop.permute.xlu0 %765 }
 0x172   : > { %869 = vst.msk [vmem:[#allocation2 + $0x158] sm:$0xff] %vm825_vm2, %v768_v14  ;;  %868 = vst.msk [vmem:[#allocation2 + $0x150] sm:$0xff] %vm825_vm2, %v766_v15  ;;  %v4675_v15 = vld [vmem:[%s3902_s21 + $0x141] sm:$0xff] }
 0x173   : > { %1269 = vrot.lane.b32.xlu1 %v4525_v10, %s3785_s25  ;;  %1267 = vrot.lane.b32.xlu0 %v4528_v11, %s3785_s25 }
 0x175   : > { %v772_v37 = vpop.permute.xlu1 %771  ;;  %v770_v44 = vpop.permute.xlu0 %769 }
 0x176   : > { %871 = vst.msk [vmem:[#allocation2 + $0x168] sm:$0xff] %vm825_vm2, %v772_v37  ;;  %870 = vst.msk [vmem:[#allocation2 + $0x160] sm:$0xff] %vm825_vm2, %v770_v44  ;;  %v4678_v37 = vld [vmem:[%s3902_s21 + $0x139] sm:$0xff] }
 0x177   : > { %1273 = vrot.lane.b32.xlu1 %v4537_v22, %s3785_s25  ;;  %1271 = vrot.lane.b32.xlu0 %v4540_v28, %s3785_s25 }
 0x179   : > { %v776_v55 = vpop.permute.xlu1 %775  ;;  %v774_v16 = vpop.permute.xlu0 %773 }
 0x17a   : > { %873 = vst.msk [vmem:[#allocation2 + $0x178] sm:$0xff] %vm825_vm2, %v776_v55  ;;  %872 = vst.msk [vmem:[#allocation2 + $0x170] sm:$0xff] %vm825_vm2, %v774_v16  ;;  %v4687_v16 = vld [vmem:[%s3902_s21 + $0x151] sm:$0xff] }
 0x17b   : > { %1277 = vrot.lane.b32.xlu1 %v4549_v51, %s3785_s25  ;;  %1275 = vrot.lane.b32.xlu0 %v4552_v54, %s3785_s25 }
 0x17d   : > { %v973_v23 = vpop.permute.xlu1 %972  ;;  %v971_v20 = vpop.permute.xlu0 %970 }
 0x17e   : > { %1116 = vst.msk [vmem:[#allocation2 + $0x8] sm:$0xff] %vm1114_vm3, %v973_v23  ;;  %1115 = vst.msk [vmem:[#allocation2] sm:$0xff] %vm1114_vm3, %v971_v20  ;;  %v4690_v23 = vld [vmem:[%s3902_s21 + $0x149] sm:$0xff] }
 0x17f   : > { %1281 = vrot.lane.b32.xlu1 %v4561_v19, %s3785_s25  ;;  %1279 = vrot.lane.b32.xlu0 %v4564_v18, %s3785_s25 }
 0x181   : > { %v977_v27 = vpop.permute.xlu1 %976  ;;  %v975_v26 = vpop.permute.xlu0 %974 }
 0x182   : > { %1118 = vst.msk [vmem:[#allocation2 + $0x18] sm:$0xff] %vm1114_vm3, %v977_v27  ;;  %1117 = vst.msk [vmem:[#allocation2 + $0x10] sm:$0xff] %vm1114_vm3, %v975_v26  ;;  %v1204_v27 = vld [vmem:[%s3902_s21 + $0x161] sm:$0xff]  ;;  %v4700_v26 = vld [vmem:[%s3902_s21 + $0x159] sm:$0xff] }
 0x183   : > { %1285 = vrot.lane.b32.xlu1 %v1176_v25, %s3785_s25  ;;  %1283 = vrot.lane.b32.xlu0 %v4574_v24, %s3785_s25 }
 0x185   : > { %v981_v33 = vpop.permute.xlu1 %980  ;;  %v979_v32 = vpop.permute.xlu0 %978 }
 0x186   : > { %1120 = vst.msk [vmem:[#allocation2 + $0x28] sm:$0xff] %vm1114_vm3, %v981_v33  ;;  %1119 = vst.msk [vmem:[#allocation2 + $0x20] sm:$0xff] %vm1114_vm3, %v979_v32  ;;  %v1206_v33 = vld [vmem:[%s3902_s21 + $0x171] sm:$0xff]  ;;  %v1205_v32 = vld [vmem:[%s3902_s21 + $0x169] sm:$0xff] }
 0x187   : > { %1289 = vrot.lane.b32.xlu1 %v1178_v31, %s3785_s25  ;;  %1287 = vrot.lane.b32.xlu0 %v1177_v30, %s3785_s25 }
 0x189   : > { %v985_v39 = vpop.permute.xlu1 %984  ;;  %v983_v38 = vpop.permute.xlu0 %982 }
 0x18a   : > { %1122 = vst.msk [vmem:[#allocation2 + $0x38] sm:$0xff] %vm1114_vm3, %v985_v39  ;;  %1121 = vst.msk [vmem:[#allocation2 + $0x30] sm:$0xff] %vm1114_vm3, %v983_v38  ;;  %v1208_v39 = vld [vmem:[%s3902_s21 + $0x181] sm:$0xff]  ;;  %v1207_v38 = vld [vmem:[%s3902_s21 + $0x179] sm:$0xff] }
 0x18b   : > { %1293 = vrot.lane.b32.xlu1 %v1180_v36, %s3785_s25  ;;  %1291 = vrot.lane.b32.xlu0 %v1179_v34, %s3785_s25 }
 0x18d   : > { %v989_v43 = vpop.permute.xlu1 %988  ;;  %v987_v42 = vpop.permute.xlu0 %986 }
 0x18e   : > { %1124 = vst.msk [vmem:[#allocation2 + $0x48] sm:$0xff] %vm1114_vm3, %v989_v43  ;;  %1123 = vst.msk [vmem:[#allocation2 + $0x40] sm:$0xff] %vm1114_vm3, %v987_v42  ;;  %v1210_v43 = vld [vmem:[%s3902_s21 + $0x191] sm:$0xff]  ;;  %v1209_v42 = vld [vmem:[%s3902_s21 + $0x189] sm:$0xff] }
 0x18f   : > { %1297 = vrot.lane.b32.xlu1 %v1182_v41, %s3785_s25  ;;  %1295 = vrot.lane.b32.xlu0 %v1181_v40, %s3785_s25 }
 0x191   : > { %v993_v49 = vpop.permute.xlu1 %992  ;;  %v991_v48 = vpop.permute.xlu0 %990 }
 0x192   : > { %1126 = vst.msk [vmem:[#allocation2 + $0x58] sm:$0xff] %vm1114_vm3, %v993_v49  ;;  %1125 = vst.msk [vmem:[#allocation2 + $0x50] sm:$0xff] %vm1114_vm3, %v991_v48  ;;  %v1453_v49 = vld [vmem:[%s3902_s21 + $0x22] sm:$0xff]  ;;  %v1452_v48 = vld [vmem:[%s3902_s21 + $0x1a] sm:$0xff] }
 0x193   : > { %1301 = vrot.lane.b32.xlu1 %v1184_v47, %s3785_s25  ;;  %1299 = vrot.lane.b32.xlu0 %v1183_v46, %s3785_s25 }
 0x195   : > { %v997_v57 = vpop.permute.xlu1 %996  ;;  %v995_v56 = vpop.permute.xlu0 %994 }
 0x196   : > { %1128 = vst.msk [vmem:[#allocation2 + $0x68] sm:$0xff] %vm1114_vm3, %v997_v57  ;;  %1127 = vst.msk [vmem:[#allocation2 + $0x60] sm:$0xff] %vm1114_vm3, %v995_v56  ;;  %v4732_v57 = vld [vmem:[%s3902_s21 + $0x32] sm:$0xff]  ;;  %v1454_v56 = vld [vmem:[%s3902_s21 + $0x2a] sm:$0xff] }
 0x197   : > { %1305 = vrot.lane.b32.xlu1 %v1186_v53, %s3785_s25  ;;  %1303 = vrot.lane.b32.xlu0 %v1185_v52, %s3785_s25 }
 0x199   : > { %v1001_v1 = vpop.permute.xlu1 %1000  ;;  %v999_v0 = vpop.permute.xlu0 %998 }
 0x19a   : > { %1130 = vst.msk [vmem:[#allocation2 + $0x78] sm:$0xff] %vm1114_vm3, %v1001_v1  ;;  %1129 = vst.msk [vmem:[#allocation2 + $0x70] sm:$0xff] %vm1114_vm3, %v999_v0  ;;  %v4741_v1 = vld [vmem:[%s3902_s21 + $0x42] sm:$0xff]  ;;  %v4744_v0 = vld [vmem:[%s3902_s21 + $0x3a] sm:$0xff] }
 0x19b   : > { %1309 = vrot.lane.b32.xlu1 %v1188_v61, %s3785_s25  ;;  %1307 = vrot.lane.b32.xlu0 %v1187_v60, %s3785_s25 }
 0x19d   : > { %v1005_v9 = vpop.permute.xlu1 %1004  ;;  %v1003_v8 = vpop.permute.xlu0 %1002 }
 0x19e   : > { %1132 = vst.msk [vmem:[#allocation2 + $0x88] sm:$0xff] %vm1114_vm3, %v1005_v9  ;;  %1131 = vst.msk [vmem:[#allocation2 + $0x80] sm:$0xff] %vm1114_vm3, %v1003_v8  ;;  %v4753_v8 = vld [vmem:[%s3902_s21 + $0x52] sm:$0xff] }
 0x19f   : > { %1313 = vrot.lane.b32.xlu1 %v4618_v5, %s3785_s25  ;;  %1311 = vrot.lane.b32.xlu0 %v1189_v4, %s3785_s25 }
 0x1a1   : > { %v1009_v21 = vpop.permute.xlu1 %1008  ;;  %v1007_v35 = vpop.permute.xlu0 %1006 }
 0x1a2   : > { %1134 = vst.msk [vmem:[#allocation2 + $0x98] sm:$0xff] %vm1114_vm3, %v1009_v21  ;;  %1133 = vst.msk [vmem:[#allocation2 + $0x90] sm:$0xff] %vm1114_vm3, %v1007_v35  ;;  %v4756_v21 = vld [vmem:[%s3902_s21 + $0x4a] sm:$0xff] }
 0x1a3   : > { %1317 = vrot.lane.b32.xlu1 %v4627_v13, %s3785_s25  ;;  %1315 = vrot.lane.b32.xlu0 %v4630_v12, %s3785_s25 }
 0x1a5   : > { %v1013_v50 = vpop.permute.xlu1 %1012  ;;  %v1011_v29 = vpop.permute.xlu0 %1010 }
 0x1a6   : > { %1136 = vst.msk [vmem:[#allocation2 + $0xa8] sm:$0xff] %vm1114_vm3, %v1013_v50  ;;  %1135 = vst.msk [vmem:[#allocation2 + $0xa0] sm:$0xff] %vm1114_vm3, %v1011_v29  ;;  %v4765_v29 = vld [vmem:[%s3902_s21 + $0x62] sm:$0xff] }
 0x1a7   : > { %1321 = vrot.lane.b32.xlu1 %v4639_v17, %s3785_s25  ;;  %1319 = vrot.lane.b32.xlu0 %v4642_v58, %s3785_s25 }
 0x1a9   : > { %v1017_v63 = vpop.permute.xlu1 %1016  ;;  %v1015_v45 = vpop.permute.xlu0 %1014 }
 0x1aa   : > { %1138 = vst.msk [vmem:[#allocation2 + $0xb8] sm:$0xff] %vm1114_vm3, %v1017_v63  ;;  %1137 = vst.msk [vmem:[#allocation2 + $0xb0] sm:$0xff] %vm1114_vm3, %v1015_v45  ;;  %v4768_v63 = vld [vmem:[%s3902_s21 + $0x5a] sm:$0xff] }
 0x1ab   : > { %1325 = vrot.lane.b32.xlu1 %v4651_v59, %s3785_s25  ;;  %1323 = vrot.lane.b32.xlu0 %v4654_v62, %s3785_s25 }
 0x1ad   : > { %v1021_v7 = vpop.permute.xlu1 %1020  ;;  %v1019_v14 = vpop.permute.xlu0 %1018 }
 0x1ae   : > { %1140 = vst.msk [vmem:[#allocation2 + $0xc8] sm:$0xff] %vm1114_vm3, %v1021_v7  ;;  %1139 = vst.msk [vmem:[#allocation2 + $0xc0] sm:$0xff] %vm1114_vm3, %v1019_v14  ;;  %v4777_v14 = vld [vmem:[%s3902_s21 + $0x72] sm:$0xff] }
 0x1af   : > { %1329 = vrot.lane.b32.xlu1 %v4663_v3, %s3785_s25  ;;  %1327 = vrot.lane.b32.xlu0 %v4666_v6, %s3785_s25 }
 0x1b1   : > { %v1025_v44 = vpop.permute.xlu1 %1024  ;;  %v1023_v55 = vpop.permute.xlu0 %1022 }
 0x1b2   : > { %1142 = vst.msk [vmem:[#allocation2 + $0xd8] sm:$0xff] %vm1114_vm3, %v1025_v44  ;;  %1141 = vst.msk [vmem:[#allocation2 + $0xd0] sm:$0xff] %vm1114_vm3, %v1023_v55  ;;  %v4780_v44 = vld [vmem:[%s3902_s21 + $0x6a] sm:$0xff] }
 0x1b3   : > { %1333 = vrot.lane.b32.xlu1 %v4675_v15, %s3785_s25  ;;  %1331 = vrot.lane.b32.xlu0 %v4678_v37, %s3785_s25 }
 0x1b5   : > { %v1029_v20 = vpop.permute.xlu1 %1028  ;;  %v1027_v25 = vpop.permute.xlu0 %1026 }
 0x1b6   : > { %1144 = vst.msk [vmem:[#allocation2 + $0xe8] sm:$0xff] %vm1114_vm3, %v1029_v20  ;;  %1143 = vst.msk [vmem:[#allocation2 + $0xe0] sm:$0xff] %vm1114_vm3, %v1027_v25  ;;  %v4789_v25 = vld [vmem:[%s3902_s21 + $0x82] sm:$0xff] }
 0x1b7   : > { %1337 = vrot.lane.b32.xlu1 %v4687_v16, %s3785_s25  ;;  %1335 = vrot.lane.b32.xlu0 %v4690_v23, %s3785_s25 }
 0x1b9   : > { %v1033_v31 = vpop.permute.xlu1 %1032  ;;  %v1031_v30 = vpop.permute.xlu0 %1030 }
 0x1ba   : > { %1146 = vst.msk [vmem:[#allocation2 + $0xf8] sm:$0xff] %vm1114_vm3, %v1033_v31  ;;  %1145 = vst.msk [vmem:[#allocation2 + $0xf0] sm:$0xff] %vm1114_vm3, %v1031_v30 }
 0x1bb   : > { %1341 = vrot.lane.b32.xlu1 %v1204_v27, %s3785_s25  ;;  %1339 = vrot.lane.b32.xlu0 %v4700_v26, %s3785_s25  ;;  %v4792_v27 = vld [vmem:[%s3902_s21 + $0x7a] sm:$0xff] }
 0x1bd   : > { %v1037_v36 = vpop.permute.xlu1 %1036  ;;  %v1035_v34 = vpop.permute.xlu0 %1034 }
 0x1be   : > { %1148 = vst.msk [vmem:[#allocation2 + $0x108] sm:$0xff] %vm1114_vm3, %v1037_v36  ;;  %1147 = vst.msk [vmem:[#allocation2 + $0x100] sm:$0xff] %vm1114_vm3, %v1035_v34 }
 0x1bf   : > { %1345 = vrot.lane.b32.xlu1 %v1206_v33, %s3785_s25  ;;  %1343 = vrot.lane.b32.xlu0 %v1205_v32, %s3785_s25  ;;  %v4801_v33 = vld [vmem:[%s3902_s21 + $0x92] sm:$0xff]  ;;  %v4804_v32 = vld [vmem:[%s3902_s21 + $0x8a] sm:$0xff] }
 0x1c1   : > { %v1041_v41 = vpop.permute.xlu1 %1040  ;;  %v1039_v40 = vpop.permute.xlu0 %1038 }
 0x1c2   : > { %1150 = vst.msk [vmem:[#allocation2 + $0x118] sm:$0xff] %vm1114_vm3, %v1041_v41  ;;  %1149 = vst.msk [vmem:[#allocation2 + $0x110] sm:$0xff] %vm1114_vm3, %v1039_v40 }
 0x1c3   : > { %1349 = vrot.lane.b32.xlu1 %v1208_v39, %s3785_s25  ;;  %1347 = vrot.lane.b32.xlu0 %v1207_v38, %s3785_s25  ;;  %v4813_v39 = vld [vmem:[%s3902_s21 + $0xa2] sm:$0xff]  ;;  %v4816_v38 = vld [vmem:[%s3902_s21 + $0x9a] sm:$0xff] }
 0x1c5   : > { %v1045_v47 = vpop.permute.xlu1 %1044  ;;  %v1043_v46 = vpop.permute.xlu0 %1042 }
 0x1c6   : > { %1152 = vst.msk [vmem:[#allocation2 + $0x128] sm:$0xff] %vm1114_vm3, %v1045_v47  ;;  %1151 = vst.msk [vmem:[#allocation2 + $0x120] sm:$0xff] %vm1114_vm3, %v1043_v46 }
 0x1c7   : > { %1353 = vrot.lane.b32.xlu1 %v1210_v43, %s3785_s25  ;;  %1351 = vrot.lane.b32.xlu0 %v1209_v42, %s3785_s25  ;;  %v1476_v43 = vld [vmem:[%s3902_s21 + $0xda] sm:$0xff]  ;;  %v4826_v42 = vld [vmem:[%s3902_s21 + $0xaa] sm:$0xff] }
 0x1c9   : > { %v1049_v53 = vpop.permute.xlu1 %1048  ;;  %v1047_v52 = vpop.permute.xlu0 %1046 }
 0x1ca   : > { %1154 = vst.msk [vmem:[#allocation2 + $0x138] sm:$0xff] %vm1114_vm3, %v1049_v53  ;;  %1153 = vst.msk [vmem:[#allocation2 + $0x130] sm:$0xff] %vm1114_vm3, %v1047_v52 }
 0x1cb   : > { %1550 = vrot.lane.b32.xlu1 %v1453_v49, %s3786_s26  ;;  %1548 = vrot.lane.b32.xlu0 %v1452_v48, %s3786_s26  ;;  %v1741_v49 = vld [vmem:[%s3902_s21 + $0x30] sm:$0xff]  ;;  %v1477_v48 = vld [vmem:[%s3902_s21 + $0xe2] sm:$0xff] }
 0x1cd   : > { %v1053_v61 = vpop.permute.xlu1 %1052  ;;  %v1051_v60 = vpop.permute.xlu0 %1050 }
 0x1ce   : > { %1156 = vst.msk [vmem:[#allocation2 + $0x148] sm:$0xff] %vm1114_vm3, %v1053_v61  ;;  %1155 = vst.msk [vmem:[#allocation2 + $0x140] sm:$0xff] %vm1114_vm3, %v1051_v60  ;;  %v1765_v61 = vld [vmem:[%s3902_s21 + $0xf0] sm:$0xff] }
 0x1cf   : > { %1554 = vrot.lane.b32.xlu1 %v4732_v57, %s3786_s26  ;;  %1552 = vrot.lane.b32.xlu0 %v1454_v56, %s3786_s26  ;;  %v1742_v56 = vld [vmem:[%s3902_s21 + $0x38] sm:$0xff] }
 0x1d1   : > { %v1057_v4 = vpop.permute.xlu1 %1056  ;;  %v1055_v9 = vpop.permute.xlu0 %1054 }
 0x1d2   : > { %1158 = vst.msk [vmem:[#allocation2 + $0x158] sm:$0xff] %vm1114_vm3, %v1057_v4  ;;  %1157 = vst.msk [vmem:[#allocation2 + $0x150] sm:$0xff] %vm1114_vm3, %v1055_v9  ;;  %v1766_v9 = vld [vmem:[%s3902_s21 + $0xf8] sm:$0xff] }
 0x1d3   : > { %1558 = vrot.lane.b32.xlu1 %v4741_v1, %s3786_s26  ;;  %1556 = vrot.lane.b32.xlu0 %v4744_v0, %s3786_s26 }
 0x1d5   : > { %v1061_v35 = vpop.permute.xlu1 %1060  ;;  %v1059_v50 = vpop.permute.xlu0 %1058 }
 0x1d6   : > { %1160 = vst.msk [vmem:[#allocation2 + $0x168] sm:$0xff] %vm1114_vm3, %v1061_v35  ;;  %1159 = vst.msk [vmem:[#allocation2 + $0x160] sm:$0xff] %vm1114_vm3, %v1059_v50 }
 0x1d7   : > { %1562 = vrot.lane.b32.xlu1 %v4753_v8, %s3786_s26  ;;  %1560 = vrot.lane.b32.xlu0 %v4756_v21, %s3786_s26 }
 0x1d9   : > { %v1065_v45 = vpop.permute.xlu1 %1064  ;;  %v1063_v7 = vpop.permute.xlu0 %1062 }
 0x1da   : > { %1162 = vst.msk [vmem:[#allocation2 + $0x178] sm:$0xff] %vm1114_vm3, %v1065_v45  ;;  %1161 = vst.msk [vmem:[#allocation2 + $0x170] sm:$0xff] %vm1114_vm3, %v1063_v7 }
 0x1db   : > { %1566 = vrot.lane.b32.xlu1 %v4765_v29, %s3786_s26  ;;  %1564 = vrot.lane.b32.xlu0 %v4768_v63, %s3786_s26 }
 0x1dd   : > { %v1262_v55 = vpop.permute.xlu1 %1261  ;;  %v1260_v20 = vpop.permute.xlu0 %1259 }
 0x1de   : > { %1405 = vst.msk [vmem:[#allocation2 + $0x8] sm:$0xff] %vm1403_vm4, %v1262_v55  ;;  %1404 = vst.msk [vmem:[#allocation2] sm:$0xff] %vm1403_vm4, %v1260_v20 }
 0x1df   : > { %1570 = vrot.lane.b32.xlu1 %v4777_v14, %s3786_s26  ;;  %1568 = vrot.lane.b32.xlu0 %v4780_v44, %s3786_s26 }
 0x1e1   : > { %v1266_v31 = vpop.permute.xlu1 %1265  ;;  %v1264_v30 = vpop.permute.xlu0 %1263 }
 0x1e2   : > { %1407 = vst.msk [vmem:[#allocation2 + $0x18] sm:$0xff] %vm1403_vm4, %v1266_v31  ;;  %1406 = vst.msk [vmem:[#allocation2 + $0x10] sm:$0xff] %vm1403_vm4, %v1264_v30 }
 0x1e3   : > { %1574 = vrot.lane.b32.xlu1 %v4789_v25, %s3786_s26  ;;  %1572 = vrot.lane.b32.xlu0 %v4792_v27, %s3786_s26 }
 0x1e5   : > { %v1270_v36 = vpop.permute.xlu1 %1269  ;;  %v1268_v34 = vpop.permute.xlu0 %1267 }
 0x1e6   : > { %1409 = vst.msk [vmem:[#allocation2 + $0x28] sm:$0xff] %vm1403_vm4, %v1270_v36  ;;  %1408 = vst.msk [vmem:[#allocation2 + $0x20] sm:$0xff] %vm1403_vm4, %v1268_v34 }
 0x1e7   : > { %1578 = vrot.lane.b32.xlu1 %v4801_v33, %s3786_s26  ;;  %1576 = vrot.lane.b32.xlu0 %v4804_v32, %s3786_s26 }
 0x1e9   : > { %v1274_v41 = vpop.permute.xlu1 %1273  ;;  %v1272_v40 = vpop.permute.xlu0 %1271 }
 0x1ea   : > { %1411 = vst.msk [vmem:[#allocation2 + $0x38] sm:$0xff] %vm1403_vm4, %v1274_v41  ;;  %1410 = vst.msk [vmem:[#allocation2 + $0x30] sm:$0xff] %vm1403_vm4, %v1272_v40  ;;  %v1744_v40 = vld [vmem:[%s3902_s21 + $0x48] sm:$0xff] }
 0x1eb   : > { %1582 = vrot.lane.b32.xlu1 %v4813_v39, %s3786_s26  ;;  %1580 = vrot.lane.b32.xlu0 %v4816_v38, %s3786_s26 }
 0x1ed   : > { %v1278_v47 = vpop.permute.xlu1 %1277  ;;  %v1276_v46 = vpop.permute.xlu0 %1275 }
 0x1ee   : > { %1413 = vst.msk [vmem:[#allocation2 + $0x48] sm:$0xff] %vm1403_vm4, %v1278_v47  ;;  %1412 = vst.msk [vmem:[#allocation2 + $0x40] sm:$0xff] %vm1403_vm4, %v1276_v46 }
 0x1ef   : > { %1596 = vrot.lane.b32.xlu1 %v1476_v43, %s3786_s26  ;;  %1584 = vrot.lane.b32.xlu0 %v4826_v42, %s3786_s26  ;;  %v1767_v43 = vld [vmem:[%s3902_s21 + $0x100] sm:$0xff] }
 0x1f1   : > { %v1282_v53 = vpop.permute.xlu1 %1281  ;;  %v1280_v52 = vpop.permute.xlu0 %1279 }
 0x1f2   : > { %1415 = vst.msk [vmem:[#allocation2 + $0x58] sm:$0xff] %vm1403_vm4, %v1282_v53  ;;  %1414 = vst.msk [vmem:[#allocation2 + $0x50] sm:$0xff] %vm1403_vm4, %v1280_v52 }
 0x1f3   : > { %1837 = vrot.lane.b32.xlu1 %v1741_v49, %s3787_s27  ;;  %1598 = vrot.lane.b32.xlu0 %v1477_v48, %s3786_s26 }
 0x1f5   : > { %v1286_v60 = vpop.permute.xlu1 %1285  ;;  %v1284_v4 = vpop.permute.xlu0 %1283 }
 0x1f6   : > { %1417 = vst.msk [vmem:[#allocation2 + $0x68] sm:$0xff] %vm1403_vm4, %v1286_v60  ;;  %1416 = vst.msk [vmem:[#allocation2 + $0x60] sm:$0xff] %vm1403_vm4, %v1284_v4 }
 0x1f7   : > { %1839 = vrot.lane.b32.xlu1 %v1742_v56, %s3787_s27  ;;  %1885 = vrot.lane.b32.xlu0 %v1765_v61, %s3787_s27 }
 0x1f9   : > { %v1290_v35 = vpop.permute.xlu1 %1289  ;;  %v1288_v50 = vpop.permute.xlu0 %1287 }
 0x1fa   : > { %1419 = vst.msk [vmem:[#allocation2 + $0x78] sm:$0xff] %vm1403_vm4, %v1290_v35  ;;  %1418 = vst.msk [vmem:[#allocation2 + $0x70] sm:$0xff] %vm1403_vm4, %v1288_v50  ;;  %v1746_v50 = vld [vmem:[%s3902_s21 + $0x58] sm:$0xff] }
 0x1fb   : > { %2126 = vrot.lane.b32.xlu1 %v4516_v2, %s3788_s28  ;;  %1887 = vrot.lane.b32.xlu0 %v1766_v9, %s3787_s27  ;;  %v1478_v2 = vld [vmem:[%s3902_s21 + $0xea] sm:$0xff] }
 0x1fd   : > { %v1294_v45 = vpop.permute.xlu1 %1293  ;;  %v1292_v7 = vpop.permute.xlu0 %1291 }
 0x1fe   : > { %1421 = vst.msk [vmem:[#allocation2 + $0x88] sm:$0xff] %vm1403_vm4, %v1294_v45  ;;  %1420 = vst.msk [vmem:[#allocation2 + $0x80] sm:$0xff] %vm1403_vm4, %v1292_v7  ;;  %v1769_v45 = vld [vmem:[%s3902_s21 + $0x110] sm:$0xff] }
 0x1ff   : > { %2128 = vrot.lane.b32.xlu1 %v4528_v11, %s3788_s28  ;;  %2174 = vrot.lane.b32.xlu0 %v4618_v5, %s3788_s28  ;;  %v2343_v11 = vld [vmem:[%s3902_s21 + $0xf2] sm:$0xff]  ;;  %v2344_v5 = vld [vmem:[%s3902_s21 + $0xfa] sm:$0xff] }
 0x201   : > { %v1298_v55 = vpop.permute.xlu1 %1297  ;;  %v1296_v20 = vpop.permute.xlu0 %1295 }
 0x202   : > { %1423 = vst.msk [vmem:[#allocation2 + $0x98] sm:$0xff] %vm1403_vm4, %v1298_v55  ;;  %1422 = vst.msk [vmem:[#allocation2 + $0x90] sm:$0xff] %vm1403_vm4, %v1296_v20 }
 0x203   : > { %2415 = vrot.lane.b32.xlu1 %v4732_v57, %s3789_s29  ;;  %2176 = vrot.lane.b32.xlu0 %v4630_v12, %s3788_s28  ;;  %v1743_v12 = vld [vmem:[%s3902_s21 + $0x40] sm:$0xff] }
 0x205   : > { %v1302_v31 = vpop.permute.xlu1 %1301  ;;  %v1300_v30 = vpop.permute.xlu0 %1299 }
 0x206   : > { %1425 = vst.msk [vmem:[#allocation2 + $0xa8] sm:$0xff] %vm1403_vm4, %v1302_v31  ;;  %1424 = vst.msk [vmem:[#allocation2 + $0xa0] sm:$0xff] %vm1403_vm4, %v1300_v30 }
 0x207   : > { %1600 = vrot.lane.b32.xlu1 %v1478_v2, %s3786_s26  ;;  %2463 = vrot.lane.b32.xlu0 %v2343_v11, %s3789_s29 }
 0x209   : > { %v1306_v57 = vpop.permute.xlu1 %1305  ;;  %v1304_v36 = vpop.permute.xlu0 %1303 }
 0x20a   : > { %1427 = vst.msk [vmem:[#allocation2 + $0xb8] sm:$0xff] %vm1403_vm4, %v1306_v57  ;;  %1426 = vst.msk [vmem:[#allocation2 + $0xb0] sm:$0xff] %vm1403_vm4, %v1304_v36 }
 0x20b   : > { %2465 = vrot.lane.b32.xlu1 %v2344_v5, %s3789_s29  ;;  %2417 = vrot.lane.b32.xlu0 %v4744_v0, %s3789_s29  ;;  %v1768_v0 = vld [vmem:[%s3902_s21 + $0x108] sm:$0xff] }
 0x20d   : > { %v1310_v34 = vpop.permute.xlu1 %1309  ;;  %v1308_v41 = vpop.permute.xlu0 %1307 }
 0x20e   : > { %1429 = vst.msk [vmem:[#allocation2 + $0xc8] sm:$0xff] %vm1403_vm4, %v1310_v34  ;;  %1428 = vst.msk [vmem:[#allocation2 + $0xc0] sm:$0xff] %vm1403_vm4, %v1308_v41  ;;  %v1748_v41 = vld [vmem:[%s3902_s21 + $0x68] sm:$0xff] }
 0x20f   : > { %1841 = vrot.lane.b32.xlu1 %v1743_v12, %s3787_s27  ;;  %1602 = vrot.lane.b32.xlu0 %v2343_v11, %s3786_s26 }
 0x211   : > { %v1314_v47 = vpop.permute.xlu1 %1313  ;;  %v1312_v46 = vpop.permute.xlu0 %1311 }
 0x212   : > { %1431 = vst.msk [vmem:[#allocation2 + $0xd8] sm:$0xff] %vm1403_vm4, %v1314_v47  ;;  %1430 = vst.msk [vmem:[#allocation2 + $0xd0] sm:$0xff] %vm1403_vm4, %v1312_v46 }
 0x213   : > { %1843 = vrot.lane.b32.xlu1 %v1744_v40, %s3787_s27  ;;  %1889 = vrot.lane.b32.xlu0 %v1767_v43, %s3787_s27  ;;  %v1771_v40 = vld [vmem:[%s3902_s21 + $0x120] sm:$0xff] }
 0x215   : > { %v1318_v49 = vpop.permute.xlu1 %1317  ;;  %v1316_v48 = vpop.permute.xlu0 %1315 }
 0x216   : > { %1433 = vst.msk [vmem:[#allocation2 + $0xe8] sm:$0xff] %vm1403_vm4, %v1318_v49  ;;  %1432 = vst.msk [vmem:[#allocation2 + $0xe0] sm:$0xff] %vm1403_vm4, %v1316_v48 }
 0x217   : > { %2130 = vrot.lane.b32.xlu1 %v4525_v10, %s3788_s28  ;;  %1891 = vrot.lane.b32.xlu0 %v1768_v0, %s3787_s27  ;;  %v2345_v10 = vld [vmem:[%s3902_s21 + $0x102] sm:$0xff] }
 0x219   : > { %v1322_v53 = vpop.permute.xlu1 %1321  ;;  %v1320_v52 = vpop.permute.xlu0 %1319 }
 0x21a   : > { %1435 = vst.msk [vmem:[#allocation2 + $0xf8] sm:$0xff] %vm1403_vm4, %v1322_v53  ;;  %1434 = vst.msk [vmem:[#allocation2 + $0xf0] sm:$0xff] %vm1403_vm4, %v1320_v52 }
 0x21b   : > { %2132 = vrot.lane.b32.xlu1 %v4540_v28, %s3788_s28  ;;  %2178 = vrot.lane.b32.xlu0 %v4627_v13, %s3788_s28  ;;  %v2346_v28 = vld [vmem:[%s3902_s21 + $0x10a] sm:$0xff] }
 0x21d   : > { %v1326_v56 = vpop.permute.xlu1 %1325  ;;  %v1324_v61 = vpop.permute.xlu0 %1323 }
 0x21e   : > { %1437 = vst.msk [vmem:[#allocation2 + $0x108] sm:$0xff] %vm1403_vm4, %v1326_v56  ;;  %1436 = vst.msk [vmem:[#allocation2 + $0x100] sm:$0xff] %vm1403_vm4, %v1324_v61 }
 0x21f   : > { %2419 = vrot.lane.b32.xlu1 %v4741_v1, %s3789_s29  ;;  %2180 = vrot.lane.b32.xlu0 %v4642_v58, %s3788_s28  ;;  %v1745_v58 = vld [vmem:[%s3902_s21 + $0x50] sm:$0xff] }
 0x221   : > { %v1330_v60 = vpop.permute.xlu1 %1329  ;;  %v1328_v4 = vpop.permute.xlu0 %1327 }
 0x222   : > { %1439 = vst.msk [vmem:[#allocation2 + $0x118] sm:$0xff] %vm1403_vm4, %v1330_v60  ;;  %1438 = vst.msk [vmem:[#allocation2 + $0x110] sm:$0xff] %vm1403_vm4, %v1328_v4  ;;  %v1750_v4 = vld [vmem:[%s3902_s21 + $0x78] sm:$0xff] }
 0x223   : > { %1604 = vrot.lane.b32.xlu1 %v2344_v5, %s3786_s26  ;;  %2467 = vrot.lane.b32.xlu0 %v2345_v10, %s3789_s29 }
 0x225   : > { %v1334_v13 = vpop.permute.xlu1 %1333  ;;  %v1332_v1 = vpop.permute.xlu0 %1331 }
 0x226   : > { %1441 = vst.msk [vmem:[#allocation2 + $0x128] sm:$0xff] %vm1403_vm4, %v1334_v13  ;;  %1440 = vst.msk [vmem:[#allocation2 + $0x120] sm:$0xff] %vm1403_vm4, %v1332_v1 }
 0x227   : > { %2469 = vrot.lane.b32.xlu1 %v2346_v28, %s3789_s29  ;;  %2421 = vrot.lane.b32.xlu0 %v4756_v21, %s3789_s29  ;;  %v1770_v21 = vld [vmem:[%s3902_s21 + $0x118] sm:$0xff] }
 0x229   : > { %v1338_v9 = vpop.permute.xlu1 %1337  ;;  %v1336_v35 = vpop.permute.xlu0 %1335 }
 0x22a   : > { %1443 = vst.msk [vmem:[#allocation2 + $0x138] sm:$0xff] %vm1403_vm4, %v1338_v9  ;;  %1442 = vst.msk [vmem:[#allocation2 + $0x130] sm:$0xff] %vm1403_vm4, %v1336_v35 }
 0x22b   : > { %1845 = vrot.lane.b32.xlu1 %v1745_v58, %s3787_s27  ;;  %1606 = vrot.lane.b32.xlu0 %v2345_v10, %s3786_s26 }
 0x22d   : > { %v1342_v7 = vpop.permute.xlu1 %1341  ;;  %v1340_v55 = vpop.permute.xlu0 %1339 }
 0x22e   : > { %1445 = vst.msk [vmem:[#allocation2 + $0x148] sm:$0xff] %vm1403_vm4, %v1342_v7  ;;  %1444 = vst.msk [vmem:[#allocation2 + $0x140] sm:$0xff] %vm1403_vm4, %v1340_v55 }
 0x22f   : > { %1847 = vrot.lane.b32.xlu1 %v1746_v50, %s3787_s27  ;;  %1893 = vrot.lane.b32.xlu0 %v1769_v45, %s3787_s27 }
 0x231   : > { %v1346_v20 = vpop.permute.xlu1 %1345  ;;  %v1344_v2 = vpop.permute.xlu0 %1343 }
 0x232   : > { %1447 = vst.msk [vmem:[#allocation2 + $0x158] sm:$0xff] %vm1403_vm4, %v1346_v20  ;;  %1446 = vst.msk [vmem:[#allocation2 + $0x150] sm:$0xff] %vm1403_vm4, %v1344_v2  ;;  %v1751_v20 = vld [vmem:[%s3902_s21 + $0x80] sm:$0xff] }
 0x233   : > { %2134 = vrot.lane.b32.xlu1 %v4537_v22, %s3788_s28  ;;  %1895 = vrot.lane.b32.xlu0 %v1770_v21, %s3787_s27  ;;  %v2347_v22 = vld [vmem:[%s3902_s21 + $0x112] sm:$0xff] }
 0x235   : > { %v1350_v11 = vpop.permute.xlu1 %1349  ;;  %v1348_v31 = vpop.permute.xlu0 %1347 }
 0x236   : > { %1449 = vst.msk [vmem:[#allocation2 + $0x168] sm:$0xff] %vm1403_vm4, %v1350_v11  ;;  %1448 = vst.msk [vmem:[#allocation2 + $0x160] sm:$0xff] %vm1403_vm4, %v1348_v31  ;;  %v1775_v31 = vld [vmem:[%s3902_s21 + $0x140] sm:$0xff] }
 0x237   : > { %2136 = vrot.lane.b32.xlu1 %v4552_v54, %s3788_s28  ;;  %2182 = vrot.lane.b32.xlu0 %v4639_v17, %s3788_s28  ;;  %v2348_v17 = vld [vmem:[%s3902_s21 + $0x11a] sm:$0xff] }
 0x239   : > { %v1354_v30 = vpop.permute.xlu1 %1353  ;;  %v1352_v5 = vpop.permute.xlu0 %1351 }
 0x23a   : > { %1451 = vst.msk [vmem:[#allocation2 + $0x178] sm:$0xff] %vm1403_vm4, %v1354_v30  ;;  %1450 = vst.msk [vmem:[#allocation2 + $0x170] sm:$0xff] %vm1403_vm4, %v1352_v5 }
 0x23b   : > { %2423 = vrot.lane.b32.xlu1 %v4753_v8, %s3789_s29  ;;  %2184 = vrot.lane.b32.xlu0 %v4654_v62, %s3788_s28  ;;  %v1747_v62 = vld [vmem:[%s3902_s21 + $0x60] sm:$0xff] }
 0x23d   : > { %v1551_v54 = vpop.permute.xlu1 %1550  ;;  %v1549_v57 = vpop.permute.xlu0 %1548 }
 0x23e   : > { %1694 = vst.msk [vmem:[#allocation2 + $0x8] sm:$0xff] %vm1692_vm5, %v1551_v54  ;;  %1693 = vst.msk [vmem:[#allocation2] sm:$0xff] %vm1692_vm5, %v1549_v57  ;;  %v1776_v54 = vld [vmem:[%s3902_s21 + $0x148] sm:$0xff] }
 0x23f   : > { %1608 = vrot.lane.b32.xlu1 %v2346_v28, %s3786_s26  ;;  %2471 = vrot.lane.b32.xlu0 %v2347_v22, %s3789_s29  ;;  %v1773_v28 = vld [vmem:[%s3902_s21 + $0x130] sm:$0xff] }
 0x241   : > { %v1555_v8 = vpop.permute.xlu1 %1554  ;;  %v1553_v36 = vpop.permute.xlu0 %1552 }
 0x242   : > { %1696 = vst.msk [vmem:[#allocation2 + $0x18] sm:$0xff] %vm1692_vm5, %v1555_v8  ;;  %1695 = vst.msk [vmem:[#allocation2 + $0x10] sm:$0xff] %vm1692_vm5, %v1553_v36  ;;  %v2041_v8 = vld [vmem:[%s3902_s21 + $0x89] sm:$0xff] }
 0x243   : > { %2473 = vrot.lane.b32.xlu1 %v2348_v17, %s3789_s29  ;;  %2425 = vrot.lane.b32.xlu0 %v4768_v63, %s3789_s29  ;;  %v1772_v63 = vld [vmem:[%s3902_s21 + $0x128] sm:$0xff] }
 0x245   : > { %v1559_v12 = vpop.permute.xlu1 %1558  ;;  %v1557_v34 = vpop.permute.xlu0 %1556 }
 0x246   : > { %1698 = vst.msk [vmem:[#allocation2 + $0x28] sm:$0xff] %vm1692_vm5, %v1559_v12  ;;  %1697 = vst.msk [vmem:[#allocation2 + $0x20] sm:$0xff] %vm1692_vm5, %v1557_v34 }
 0x247   : > { %1849 = vrot.lane.b32.xlu1 %v1747_v62, %s3787_s27  ;;  %1610 = vrot.lane.b32.xlu0 %v2347_v22, %s3786_s26  ;;  %v2040_v22 = vld [vmem:[%s3902_s21 + $0x81] sm:$0xff] }
 0x249   : > { %v1563_v43 = vpop.permute.xlu1 %1562  ;;  %v1561_v47 = vpop.permute.xlu0 %1560 }
 0x24a   : > { %1700 = vst.msk [vmem:[#allocation2 + $0x38] sm:$0xff] %vm1692_vm5, %v1563_v43  ;;  %1699 = vst.msk [vmem:[#allocation2 + $0x30] sm:$0xff] %vm1692_vm5, %v1561_v47 }
 0x24b   : > { %1851 = vrot.lane.b32.xlu1 %v1748_v41, %s3787_s27  ;;  %1897 = vrot.lane.b32.xlu0 %v1771_v40, %s3787_s27  ;;  %v2353_v41 = vld [vmem:[%s3902_s21 + $0x142] sm:$0xff] }
 0x24d   : > { %v1567_v46 = vpop.permute.xlu1 %1566  ;;  %v1565_v0 = vpop.permute.xlu0 %1564 }
 0x24e   : > { %1702 = vst.msk [vmem:[#allocation2 + $0x48] sm:$0xff] %vm1692_vm5, %v1567_v46  ;;  %1701 = vst.msk [vmem:[#allocation2 + $0x40] sm:$0xff] %vm1692_vm5, %v1565_v0  ;;  %v1777_v0 = vld [vmem:[%s3902_s21 + $0x150] sm:$0xff] }
 0x24f   : > { %2138 = vrot.lane.b32.xlu1 %v4549_v51, %s3788_s28  ;;  %1899 = vrot.lane.b32.xlu0 %v1772_v63, %s3787_s27  ;;  %v2349_v51 = vld [vmem:[%s3902_s21 + $0x122] sm:$0xff] }
 0x251   : > { %v1571_v49 = vpop.permute.xlu1 %1570  ;;  %v1569_v48 = vpop.permute.xlu0 %1568 }
 0x252   : > { %1704 = vst.msk [vmem:[#allocation2 + $0x58] sm:$0xff] %vm1692_vm5, %v1571_v49  ;;  %1703 = vst.msk [vmem:[#allocation2 + $0x50] sm:$0xff] %vm1692_vm5, %v1569_v48 }
 0x253   : > { %2140 = vrot.lane.b32.xlu1 %v4564_v18, %s3788_s28  ;;  %2186 = vrot.lane.b32.xlu0 %v4651_v59, %s3788_s28  ;;  %v2350_v18 = vld [vmem:[%s3902_s21 + $0x12a] sm:$0xff] }
 0x255   : > { %v1575_v53 = vpop.permute.xlu1 %1574  ;;  %v1573_v52 = vpop.permute.xlu0 %1572 }
 0x256   : > { %1706 = vst.msk [vmem:[#allocation2 + $0x68] sm:$0xff] %vm1692_vm5, %v1575_v53  ;;  %1705 = vst.msk [vmem:[#allocation2 + $0x60] sm:$0xff] %vm1692_vm5, %v1573_v52  ;;  %v2042_v53 = vld [vmem:[%s3902_s21 + $0x91] sm:$0xff] }
 0x257   : > { %2427 = vrot.lane.b32.xlu1 %v4765_v29, %s3789_s29  ;;  %2188 = vrot.lane.b32.xlu0 %v4666_v6, %s3788_s28  ;;  %v1749_v6 = vld [vmem:[%s3902_s21 + $0x70] sm:$0xff]  ;;  %v1778_v52 = vld [vmem:[%s3902_s21 + $0x158] sm:$0xff] }
 0x259   : > { %v1579_v56 = vpop.permute.xlu1 %1578  ;;  %v1577_v61 = vpop.permute.xlu0 %1576 }
 0x25a   : > { %1708 = vst.msk [vmem:[#allocation2 + $0x78] sm:$0xff] %vm1692_vm5, %v1579_v56  ;;  %1707 = vst.msk [vmem:[#allocation2 + $0x70] sm:$0xff] %vm1692_vm5, %v1577_v61  ;;  %v2043_v61 = vld [vmem:[%s3902_s21 + $0x99] sm:$0xff] }
 0x25b   : > { %1612 = vrot.lane.b32.xlu1 %v2348_v17, %s3786_s26  ;;  %2475 = vrot.lane.b32.xlu0 %v2349_v51, %s3789_s29 }
 0x25d   : > { %v1583_v59 = vpop.permute.xlu1 %1582  ;;  %v1581_v29 = vpop.permute.xlu0 %1580 }
 0x25e   : > { %1710 = vst.msk [vmem:[#allocation2 + $0x88] sm:$0xff] %vm1692_vm5, %v1583_v59  ;;  %1709 = vst.msk [vmem:[#allocation2 + $0x80] sm:$0xff] %vm1692_vm5, %v1581_v29 }
 0x25f   : > { %2477 = vrot.lane.b32.xlu1 %v2350_v18, %s3789_s29  ;;  %2429 = vrot.lane.b32.xlu0 %v4780_v44, %s3789_s29  ;;  %v1774_v44 = vld [vmem:[%s3902_s21 + $0x138] sm:$0xff] }
 0x261   : > { %v1597_v10 = vpop.permute.xlu1 %1596  ;;  %v1585_v60 = vpop.permute.xlu0 %1584 }
 0x262   : > { %1717 = vst.msk [vmem:[#allocation2 + $0xc0] sm:$0xff] %vm1692_vm5, %v1597_v10  ;;  %1711 = vst.msk [vmem:[#allocation2 + $0x90] sm:$0xff] %vm1692_vm5, %v1585_v60  ;;  %v2355_v10 = vld [vmem:[%s3902_s21 + $0x152] sm:$0xff] }
 0x263   : > { %1853 = vrot.lane.b32.xlu1 %v1749_v6, %s3787_s27  ;;  %1614 = vrot.lane.b32.xlu0 %v2349_v51, %s3786_s26 }
 0x265   : > { %v1838_v13 = vpop.permute.xlu1 %1837  ;;  %v1599_v1 = vpop.permute.xlu0 %1598 }
 0x266   : > { %1982 = vst.msk [vmem:[#allocation2] sm:$0xff] %vm1981_vm6, %v1838_v13 }
 0x267   : > { %1718 = vst.msk [vmem:[#allocation2 + $0xc8] sm:$0xff] %vm1692_vm5, %v1599_v1  ;;  %1855 = vrot.lane.b32.xlu1 %v1750_v4, %s3787_s27  ;;  %1901 = vrot.lane.b32.xlu0 %v1773_v28, %s3787_s27 }
 0x269   : > { %v1840_v58 = vpop.permute.xlu1 %1839  ;;  %v1886_v9 = vpop.permute.xlu0 %1885 }
 0x26a   : > { %1983 = vst.msk [vmem:[#allocation2 + $0x8] sm:$0xff] %vm1981_vm6, %v1840_v58  ;;  %2006 = vst.msk [vmem:[#allocation2 + $0xc0] sm:$0xff] %vm1981_vm6, %v1886_v9 }
 0x26b   : > { %2142 = vrot.lane.b32.xlu1 %v4561_v19, %s3788_s28  ;;  %1903 = vrot.lane.b32.xlu0 %v1774_v44, %s3787_s27  ;;  %v2351_v19 = vld [vmem:[%s3902_s21 + $0x132] sm:$0xff]  ;;  %v1779_v44 = vld [vmem:[%s3902_s21 + $0x160] sm:$0xff] }
 0x26d   : > { %v2127_v35 = vpop.permute.xlu1 %2126  ;;  %v1888_v50 = vpop.permute.xlu0 %1887 }
 0x26e   : > { %2271 = vst.msk [vmem:[#allocation2] sm:$0xff] %vm2270_vm7, %v2127_v35  ;;  %v2044_v35 = vld [vmem:[%s3902_s21 + $0xa1] sm:$0xff] }
 0x26f   : > { %2007 = vst.msk [vmem:[#allocation2 + $0xc8] sm:$0xff] %vm1981_vm6, %v1888_v50  ;;  %2144 = vrot.lane.b32.xlu1 %v4574_v24, %s3788_s28  ;;  %2190 = vrot.lane.b32.xlu0 %v4663_v3, %s3788_s28  ;;  %v3790_v3 = vmov 0.0   ;;  %v1780_v50 = vld [vmem:[%s3902_s21 + $0x168] sm:$0xff] }
 0x271   : > { %v2129_v45 = vpop.permute.xlu1 %2128  ;;  %v2175_v7 = vpop.permute.xlu0 %2174 }
 0x272   : > { %2272 = vst.msk [vmem:[#allocation2 + $0x8] sm:$0xff] %vm2270_vm7, %v2129_v45  ;;  %2295 = vst.msk [vmem:[#allocation2 + $0xc0] sm:$0xff] %vm2270_vm7, %v2175_v7 }
 0x273   : > { %2431 = vrot.lane.b32.xlu1 %v4777_v14, %s3789_s29  ;;  %2192 = vrot.lane.b32.xlu0 %v4678_v37, %s3788_s28  ;;  %v2352_v14 = vld [vmem:[%s3902_s21 + $0x13a] sm:$0xff] }
 0x275   : > { %v2416_v24 = vpop.permute.xlu1 %2415  ;;  %v2177_v55 = vpop.permute.xlu0 %2176 }
 0x276   : > { %2560 = vst.msk [vmem:[#allocation2] sm:$0xff] %vm2559_vm8, %v2416_v24  ;;  %v2068_v24 = vld [vmem:[%s3902_s21 + $0x161] sm:$0xff] }
 0x277   : > { %2296 = vst.msk [vmem:[#allocation2 + $0xc8] sm:$0xff] %vm2270_vm7, %v2177_v55  ;;  %1616 = vrot.lane.b32.xlu1 %v2350_v18, %s3786_s26  ;;  %2479 = vrot.lane.b32.xlu0 %v2351_v19, %s3789_s29 }
 0x278   : > { %2609 = vst.msk [vmem:[#allocation2] sm:$0xff] %vm2608_vm9, %v3790_v3 }
 0x279   : > { %v1601_v37 = vpop.permute.xlu1 %1600  ;;  %v2464_v21 = vpop.permute.xlu0 %2463 }
 0x27a   : > { %1719 = vst.msk [vmem:[#allocation2 + $0xd0] sm:$0xff] %vm1692_vm5, %v1601_v37  ;;  %v2069_v37 = vld [vmem:[%s3902_s21 + $0x169] sm:$0xff] }
 0x27b   : > { %2584 = vst.msk [vmem:[#allocation2 + $0xc0] sm:$0xff] %vm2559_vm8, %v2464_v21  ;;  %2481 = vrot.lane.b32.xlu1 %v2352_v14, %s3789_s29  ;;  %2433 = vrot.lane.b32.xlu0 %v4792_v27, %s3789_s29  ;;  %v1752_v27 = vld [vmem:[%s3902_s21 + $0x88] sm:$0xff] }
 0x27c   : > { %2633 = vst.msk [vmem:[#allocation2 + $0xc0] sm:$0xff] %vm2608_vm9, %v3790_v3 }
 0x27d   : > { %v2466_v2 = vpop.permute.xlu1 %2465  ;;  %v2418_v11 = vpop.permute.xlu0 %2417 }
 0x27e   : > { %2585 = vst.msk [vmem:[#allocation2 + $0xc8] sm:$0xff] %vm2559_vm8, %v2466_v2  ;;  %2561 = vst.msk [vmem:[#allocation2 + $0x8] sm:$0xff] %vm2559_vm8, %v2418_v11  ;;  %v2357_v2 = vld [vmem:[%s3902_s21 + $0x162] sm:$0xff] }
 0x27f   : > { %2634 = vst.msk [vmem:[#allocation2 + $0xc8] sm:$0xff] %vm2608_vm9, %v3790_v3  ;;  %2610 = vst.msk [vmem:[#allocation2 + $0x8] sm:$0xff] %vm2608_vm9, %v3790_v3  ;;  %1857 = vrot.lane.b32.xlu1 %v1751_v20, %s3787_s27  ;;  %1618 = vrot.lane.b32.xlu0 %v2351_v19, %s3786_s26  ;;  %v2045_v19 = vld [vmem:[%s3902_s21 + $0xa9] sm:$0xff] }
 0x281   : > { %v1842_v30 = vpop.permute.xlu1 %1841  ;;  %v1603_v5 = vpop.permute.xlu0 %1602 }
 0x282   : > { %1984 = vst.msk [vmem:[#allocation2 + $0x10] sm:$0xff] %vm1981_vm6, %v1842_v30 }
 0x283   : > { %1720 = vst.msk [vmem:[#allocation2 + $0xd8] sm:$0xff] %vm1692_vm5, %v1603_v5  ;;  %1859 = vrot.lane.b32.xlu1 %v1752_v27, %s3787_s27  ;;  %1905 = vrot.lane.b32.xlu0 %v1775_v31, %s3787_s27  ;;  %v2358_v31 = vld [vmem:[%s3902_s21 + $0x16a] sm:$0xff] }
 0x284   : > { %v1757_v5 = vld [vmem:[%s3902_s21 + $0xb0] sm:$0xff] }
 0x285   : > { %v1844_v57 = vpop.permute.xlu1 %1843  ;;  %v1890_v17 = vpop.permute.xlu0 %1889 }
 0x286   : > { %1985 = vst.msk [vmem:[#allocation2 + $0x18] sm:$0xff] %vm1981_vm6, %v1844_v57  ;;  %2008 = vst.msk [vmem:[#allocation2 + $0xd0] sm:$0xff] %vm1981_vm6, %v1890_v17  ;;  %v1781_v57 = vld [vmem:[%s3902_s21 + $0x170] sm:$0xff] }
 0x287   : > { %2146 = vrot.lane.b32.xlu1 %v2040_v22, %s3788_s28  ;;  %1907 = vrot.lane.b32.xlu0 %v1776_v54, %s3787_s27 }
 0x289   : > { %v2131_v36 = vpop.permute.xlu1 %2130  ;;  %v1892_v62 = vpop.permute.xlu0 %1891 }
 0x28a   : > { %2273 = vst.msk [vmem:[#allocation2 + $0x10] sm:$0xff] %vm2270_vm7, %v2131_v36  ;;  %v2046_v36 = vld [vmem:[%s3902_s21 + $0xb1] sm:$0xff] }
 0x28b   : > { %2009 = vst.msk [vmem:[#allocation2 + $0xd8] sm:$0xff] %vm1981_vm6, %v1892_v62  ;;  %2148 = vrot.lane.b32.xlu1 %v2041_v8, %s3788_s28  ;;  %2194 = vrot.lane.b32.xlu0 %v4675_v15, %s3788_s28  ;;  %v2354_v15 = vld [vmem:[%s3902_s21 + $0x14a] sm:$0xff]  ;;  %v1782_v62 = vld [vmem:[%s3902_s21 + $0x178] sm:$0xff] }
 0x28d   : > { %v2133_v12 = vpop.permute.xlu1 %2132  ;;  %v2179_v34 = vpop.permute.xlu0 %2178 }
 0x28e   : > { %2274 = vst.msk [vmem:[#allocation2 + $0x18] sm:$0xff] %vm2270_vm7, %v2133_v12  ;;  %2297 = vst.msk [vmem:[#allocation2 + $0xd0] sm:$0xff] %vm2270_vm7, %v2179_v34 }
 0x28f   : > { %2435 = vrot.lane.b32.xlu1 %v4789_v25, %s3789_s29  ;;  %2196 = vrot.lane.b32.xlu0 %v4690_v23, %s3788_s28  ;;  %v1753_v23 = vld [vmem:[%s3902_s21 + $0x90] sm:$0xff] }
 0x291   : > { %v2420_v40 = vpop.permute.xlu1 %2419  ;;  %v2181_v43 = vpop.permute.xlu0 %2180 }
 0x292   : > { %2562 = vst.msk [vmem:[#allocation2 + $0x10] sm:$0xff] %vm2559_vm8, %v2420_v40  ;;  %v2070_v40 = vld [vmem:[%s3902_s21 + $0x171] sm:$0xff] }
 0x293   : > { %2298 = vst.msk [vmem:[#allocation2 + $0xd8] sm:$0xff] %vm2270_vm7, %v2181_v43  ;;  %1620 = vrot.lane.b32.xlu1 %v2352_v14, %s3786_s26  ;;  %2483 = vrot.lane.b32.xlu0 %v2353_v41, %s3789_s29 }
 0x294   : > { %2611 = vst.msk [vmem:[#allocation2 + $0x10] sm:$0xff] %vm2608_vm9, %v3790_v3 }
 0x295   : > { %v1605_v25 = vpop.permute.xlu1 %1604  ;;  %v2468_v47 = vpop.permute.xlu0 %2467 }
 0x296   : > { %1721 = vst.msk [vmem:[#allocation2 + $0xe0] sm:$0xff] %vm1692_vm5, %v1605_v25  ;;  %v2335_v25 = vld [vmem:[%s3902_s21 + $0xb2] sm:$0xff] }
 0x297   : > { %2586 = vst.msk [vmem:[#allocation2 + $0xd0] sm:$0xff] %vm2559_vm8, %v2468_v47  ;;  %2485 = vrot.lane.b32.xlu1 %v2354_v15, %s3789_s29  ;;  %2437 = vrot.lane.b32.xlu0 %v4804_v32, %s3789_s29  ;;  %v1754_v32 = vld [vmem:[%s3902_s21 + $0x98] sm:$0xff] }
 0x298   : > { %2635 = vst.msk [vmem:[#allocation2 + $0xd0] sm:$0xff] %vm2608_vm9, %v3790_v3  ;;  %v2071_v47 = vld [vmem:[%s3902_s21 + $0x179] sm:$0xff] }
 0x299   : > { %v2470_v63 = vpop.permute.xlu1 %2469  ;;  %v2422_v46 = vpop.permute.xlu0 %2421 }
 0x29a   : > { %2587 = vst.msk [vmem:[#allocation2 + $0xd8] sm:$0xff] %vm2559_vm8, %v2470_v63  ;;  %2563 = vst.msk [vmem:[#allocation2 + $0x18] sm:$0xff] %vm2559_vm8, %v2422_v46  ;;  %v2359_v46 = vld [vmem:[%s3902_s21 + $0x172] sm:$0xff] }
 0x29b   : > { %2636 = vst.msk [vmem:[#allocation2 + $0xd8] sm:$0xff] %vm2608_vm9, %v3790_v3  ;;  %2612 = vst.msk [vmem:[#allocation2 + $0x18] sm:$0xff] %vm2608_vm9, %v3790_v3  ;;  %1861 = vrot.lane.b32.xlu1 %v1753_v23, %s3787_s27  ;;  %1622 = vrot.lane.b32.xlu0 %v2353_v41, %s3786_s26  ;;  %v2047_v41 = vld [vmem:[%s3902_s21 + $0xb9] sm:$0xff] }
 0x29d   : > { %v1846_v49 = vpop.permute.xlu1 %1845  ;;  %v1607_v48 = vpop.permute.xlu0 %1606 }
 0x29e   : > { %1986 = vst.msk [vmem:[#allocation2 + $0x20] sm:$0xff] %vm1981_vm6, %v1846_v49  ;;  %v5224_v49 = vld [vmem:[%s3902_s21 + $0x17a] sm:$0xff] }
 0x29f   : > { %1722 = vst.msk [vmem:[#allocation2 + $0xe8] sm:$0xff] %vm1692_vm5, %v1607_v48  ;;  %1863 = vrot.lane.b32.xlu1 %v1754_v32, %s3787_s27  ;;  %1909 = vrot.lane.b32.xlu0 %v1777_v0, %s3787_s27  ;;  %v5227_v48 = vld [vmem:[%s3902_s21 + $0xba] sm:$0xff] }
 0x2a1   : > { %v1848_v51 = vpop.permute.xlu1 %1847  ;;  %v1894_v56 = vpop.permute.xlu0 %1893 }
 0x2a2   : > { %1987 = vst.msk [vmem:[#allocation2 + $0x28] sm:$0xff] %vm1981_vm6, %v1848_v51  ;;  %2010 = vst.msk [vmem:[#allocation2 + $0xe0] sm:$0xff] %vm1981_vm6, %v1894_v56 }
 0x2a3   : > { %2150 = vrot.lane.b32.xlu1 %v2042_v53, %s3788_s28  ;;  %1911 = vrot.lane.b32.xlu0 %v1778_v52, %s3787_s27 }
 0x2a5   : > { %v2135_v18 = vpop.permute.xlu1 %2134  ;;  %v1896_v59 = vpop.permute.xlu0 %1895 }
 0x2a6   : > { %2275 = vst.msk [vmem:[#allocation2 + $0x20] sm:$0xff] %vm2270_vm7, %v2135_v18  ;;  %v1759_v18 = vld [vmem:[%s3902_s21 + $0xc0] sm:$0xff] }
 0x2a7   : > { %2011 = vst.msk [vmem:[#allocation2 + $0xe8] sm:$0xff] %vm1981_vm6, %v1896_v59  ;;  %2152 = vrot.lane.b32.xlu1 %v2043_v61, %s3788_s28  ;;  %2198 = vrot.lane.b32.xlu0 %v4687_v16, %s3788_s28  ;;  %v2356_v16 = vld [vmem:[%s3902_s21 + $0x15a] sm:$0xff] }
 0x2a8   : > { %v1783_v61 = vld [vmem:[%s3902_s21 + $0x180] sm:$0xff] }
 0x2a9   : > { %v2137_v29 = vpop.permute.xlu1 %2136  ;;  %v2183_v6 = vpop.permute.xlu0 %2182 }
 0x2aa   : > { %2276 = vst.msk [vmem:[#allocation2 + $0x28] sm:$0xff] %vm2270_vm7, %v2137_v29  ;;  %2299 = vst.msk [vmem:[#allocation2 + $0xe0] sm:$0xff] %vm2270_vm7, %v2183_v6  ;;  %v1784_v6 = vld [vmem:[%s3902_s21 + $0x188] sm:$0xff] }
 0x2ab   : > { %2439 = vrot.lane.b32.xlu1 %v4801_v33, %s3789_s29  ;;  %2200 = vrot.lane.b32.xlu0 %v4700_v26, %s3788_s28  ;;  %v1755_v26 = vld [vmem:[%s3902_s21 + $0xa0] sm:$0xff] }
 0x2ad   : > { %v2424_v60 = vpop.permute.xlu1 %2423  ;;  %v2185_v4 = vpop.permute.xlu0 %2184 }
 0x2ae   : > { %2564 = vst.msk [vmem:[#allocation2 + $0x20] sm:$0xff] %vm2559_vm8, %v2424_v60 }
 0x2af   : > { %2300 = vst.msk [vmem:[#allocation2 + $0xe8] sm:$0xff] %vm2270_vm7, %v2185_v4  ;;  %1624 = vrot.lane.b32.xlu1 %v2354_v15, %s3786_s26  ;;  %2487 = vrot.lane.b32.xlu0 %v2355_v10, %s3789_s29 }
 0x2b0   : > { %2613 = vst.msk [vmem:[#allocation2 + $0x20] sm:$0xff] %vm2608_vm9, %v3790_v3 }
 0x2b1   : > { %v1609_v33 = vpop.permute.xlu1 %1608  ;;  %v2472_v28 = vpop.permute.xlu0 %2471 }
 0x2b2   : > { %1723 = vst.msk [vmem:[#allocation2 + $0xf0] sm:$0xff] %vm1692_vm5, %v1609_v33  ;;  %v2706_v33 = vld [vmem:[#allocation4 + $0x8] sm:$0xff] }
 0x2b3   : > { %2588 = vst.msk [vmem:[#allocation2 + $0xe0] sm:$0xff] %vm2559_vm8, %v2472_v28  ;;  %2489 = vrot.lane.b32.xlu1 %v2356_v16, %s3789_s29  ;;  %2441 = vrot.lane.b32.xlu0 %v4816_v38, %s3789_s29  ;;  %v1756_v38 = vld [vmem:[%s3902_s21 + $0xa8] sm:$0xff] }
 0x2b4   : > { %2637 = vst.msk [vmem:[#allocation2 + $0xe0] sm:$0xff] %vm2608_vm9, %v3790_v3  ;;  %v2072_v28 = vld [vmem:[%s3902_s21 + $0x181] sm:$0xff] }
 0x2b5   : > { %v2474_v13 = vpop.permute.xlu1 %2473  ;;  %v2426_v1 = vpop.permute.xlu0 %2425 }
 0x2b6   : > { %2589 = vst.msk [vmem:[#allocation2 + $0xe8] sm:$0xff] %vm2559_vm8, %v2474_v13  ;;  %2565 = vst.msk [vmem:[#allocation2 + $0x28] sm:$0xff] %vm2559_vm8, %v2426_v1 }
 0x2b7   : > { %2638 = vst.msk [vmem:[#allocation2 + $0xe8] sm:$0xff] %vm2608_vm9, %v3790_v3  ;;  %2614 = vst.msk [vmem:[#allocation2 + $0x28] sm:$0xff] %vm2608_vm9, %v3790_v3  ;;  %1865 = vrot.lane.b32.xlu1 %v1755_v26, %s3787_s27  ;;  %1626 = vrot.lane.b32.xlu0 %v2355_v10, %s3786_s26  ;;  %v1760_v10 = vld [vmem:[%s3902_s21 + $0xc8] sm:$0xff] }
 0x2b8   : > { %v2048_v26 = vld [vmem:[%s3902_s21 + $0xc1] sm:$0xff] }
 0x2b9   : > { %v1850_v58 = vpop.permute.xlu1 %1849  ;;  %v1611_v9 = vpop.permute.xlu0 %1610 }
 0x2ba   : > { %1988 = vst.msk [vmem:[#allocation2 + $0x30] sm:$0xff] %vm1981_vm6, %v1850_v58  ;;  %v2708_v58 = vld [vmem:[#allocation4 + $0x18] sm:$0xff] }
 0x2bb   : > { %1724 = vst.msk [vmem:[#allocation2 + $0xf8] sm:$0xff] %vm1692_vm5, %v1611_v9  ;;  %1867 = vrot.lane.b32.xlu1 %v1756_v38, %s3787_s27  ;;  %1913 = vrot.lane.b32.xlu0 %v1779_v44, %s3787_s27  ;;  %v2707_v44 = vld [vmem:[#allocation4 + $0x10] sm:$0xff] }
 0x2bc   : > { %v2073_v9 = vld [vmem:[%s3902_s21 + $0x189] sm:$0xff] }
 0x2bd   : > { %v1852_v45 = vpop.permute.xlu1 %1851  ;;  %v1898_v7 = vpop.permute.xlu0 %1897 }
 0x2be   : > { %1989 = vst.msk [vmem:[#allocation2 + $0x38] sm:$0xff] %vm1981_vm6, %v1852_v45  ;;  %2012 = vst.msk [vmem:[#allocation2 + $0xf0] sm:$0xff] %vm1981_vm6, %v1898_v7 }
 0x2bf   : > { %2154 = vrot.lane.b32.xlu1 %v2044_v35, %s3788_s28  ;;  %1915 = vrot.lane.b32.xlu0 %v1780_v50, %s3787_s27  ;;  %v2049_v35 = vld [vmem:[%s3902_s21 + $0xc9] sm:$0xff]  ;;  %v3657_v50 = vpack.c.bf16 %v2708_v58, %v2707_v44 }
 0x2c1   : > { %v2139_v55 = vpop.permute.xlu1 %2138  ;;  %v1900_v14 = vpop.permute.xlu0 %1899 }
 0x2c2   : > { %2277 = vst.msk [vmem:[#allocation2 + $0x30] sm:$0xff] %vm2270_vm7, %v2139_v55  ;;  %v2657_v55 = vld [vmem:[#allocation2] sm:$0xff] }
 0x2c3   : > { %2013 = vst.msk [vmem:[#allocation2 + $0xf8] sm:$0xff] %vm1981_vm6, %v1900_v14  ;;  %2156 = vrot.lane.b32.xlu1 %v2045_v19, %s3788_s28  ;;  %2202 = vrot.lane.b32.xlu0 %v2068_v24, %s3788_s28  ;;  %v5270_v19 = vld [vmem:[%s3902_s21 + $0x182] sm:$0xff] }
 0x2c4   : > { %v2337_v24 = vld [vmem:[%s3902_s21 + $0xc2] sm:$0xff]  ;;  %3581 = vmatprep.mubr.msk.f32.mxu0 %vm2716_vm10, %v2657_v55 }
 0x2c5   : > { %v2141_v21 = vpop.permute.xlu1 %2140  ;;  %v2187_v20 = vpop.permute.xlu0 %2186  ;;  %v2681_v14 = vld [vmem:[#allocation2 + $0xc0] sm:$0xff] }
 0x2c6   : > { %2278 = vst.msk [vmem:[#allocation2 + $0x38] sm:$0xff] %vm2270_vm7, %v2141_v21  ;;  %2301 = vst.msk [vmem:[#allocation2 + $0xf0] sm:$0xff] %vm2270_vm7, %v2187_v20  ;;  %3617 = vmatprep.mubr.msk.f32.mxu1 %vm2716_vm10, %v2681_v14  ;;  %v2658_v20 = vld [vmem:[#allocation2 + $0x8] sm:$0xff] }
 0x2c7   : > { %2443 = vrot.lane.b32.xlu1 %v4813_v39, %s3789_s29  ;;  %2204 = vrot.lane.b32.xlu0 %v2069_v37, %s3788_s28 }
 0x2c9   : > { %v2428_v11 = vpop.permute.xlu1 %2427  ;;  %v2189_v27 = vpop.permute.xlu0 %2188 }
 0x2ca   : > { %2566 = vst.msk [vmem:[#allocation2 + $0x30] sm:$0xff] %vm2559_vm8, %v2428_v11  ;;  %v2659_v11 = vld [vmem:[#allocation2 + $0x10] sm:$0xff] }
 0x2cb   : > { %2302 = vst.msk [vmem:[#allocation2 + $0xf8] sm:$0xff] %vm2270_vm7, %v2189_v27  ;;  %1628 = vrot.lane.b32.xlu1 %v2356_v16, %s3786_s26  ;;  %2491 = vrot.lane.b32.xlu0 %v2357_v2, %s3789_s29  ;;  %v2705_v16 = vld [vmem:[#allocation4] sm:$0xff]  ;;  %v2683_v27 = vld [vmem:[#allocation2 + $0xd0] sm:$0xff] }
 0x2cc   : > { %2615 = vst.msk [vmem:[#allocation2 + $0x30] sm:$0xff] %vm2608_vm9, %v3790_v3  ;;  %v3653_v13 = vpack.c.bf16 %v2706_v33, %v2705_v16  ;;  %v2051_v16 = vld [vmem:[%s3902_s21 + $0xd9] sm:$0xff] }
 0x2cd   : > { %v1613_v30 = vpop.permute.xlu1 %1612  ;;  %v2476_v39 = vpop.permute.xlu0 %2475 }
 0x2ce   : > { %1725 = vst.msk [vmem:[#allocation2 + $0x100] sm:$0xff] %vm1692_vm5, %v1613_v30  ;;  %3654 = vmatprep.subr.bf16.mxu0 %v3653_v13  ;;  %3661 = vmatprep.subr.bf16.mxu1 %v3653_v13 }
 0x2cf   : > { %2590 = vst.msk [vmem:[#allocation2 + $0xf0] sm:$0xff] %vm2559_vm8, %v2476_v39  ;;  %2493 = vrot.lane.b32.xlu1 %v2358_v31, %s3789_s29  ;;  %2445 = vrot.lane.b32.xlu0 %v4826_v42, %s3789_s29  ;;  %v1758_v42 = vld [vmem:[%s3902_s21 + $0xb8] sm:$0xff] }
 0x2d0   : > { %2639 = vst.msk [vmem:[#allocation2 + $0xf0] sm:$0xff] %vm2608_vm9, %v3790_v3  ;;  %3656 = vmatpush3.bf16.msra.mxu0 %v3653_v13  ;;  %3663 = vmatpush3.bf16.msra.mxu1 %v3653_v13  ;;  %v2660_v39 = vld [vmem:[#allocation2 + $0x18] sm:$0xff] }
 0x2d1   : > { %v2478_v22 = vpop.permute.xlu1 %2477  ;;  %v2430_v54 = vpop.permute.xlu0 %2429  ;;  %3658 = vmatprep.subr.bf16.mxu0 %v3657_v50  ;;  %3662 = vmatprep.subr.bf16.mxu1 %v3657_v50  ;;  %v2339_v13 = vld [vmem:[%s3902_s21 + $0xd2] sm:$0xff] }
 0x2d2   : > { %2591 = vst.msk [vmem:[#allocation2 + $0xf8] sm:$0xff] %vm2559_vm8, %v2478_v22  ;;  %2567 = vst.msk [vmem:[#allocation2 + $0x38] sm:$0xff] %vm2559_vm8, %v2430_v54  ;;  %v5295_v22 = vld [vmem:[%s3902_s21 + $0x18a] sm:$0xff] }
 0x2d3   : > { %2640 = vst.msk [vmem:[#allocation2 + $0xf8] sm:$0xff] %vm2608_vm9, %v3790_v3  ;;  %2616 = vst.msk [vmem:[#allocation2 + $0x38] sm:$0xff] %vm2608_vm9, %v3790_v3  ;;  %1869 = vrot.lane.b32.xlu1 %v1757_v5, %s3787_s27  ;;  %1630 = vrot.lane.b32.xlu0 %v2357_v2, %s3786_s26  ;;  %v2682_v2 = vld [vmem:[#allocation2 + $0xc8] sm:$0xff]  ;;  %v2684_v5 = vld [vmem:[#allocation2 + $0xd8] sm:$0xff] }
 0x2d4   : > { %3660 = vmatpush3.bf16.msra.mxu0 %v3657_v50  ;;  %3664 = vmatpush3.bf16.msra.mxu1 %v3657_v50  ;;  %v5298_v54 = vld [vmem:[%s3902_s21 + $0xca] sm:$0xff]  ;;  %v2340_v50 = vld [vmem:[%s3902_s21 + $0xda] sm:$0xff] }
 0x2d5   : > { %v1854_v17 = vpop.permute.xlu1 %1853  ;;  %v1615_v8 = vpop.permute.xlu0 %1614 }
 0x2d6   : > { %1990 = vst.msk [vmem:[#allocation2 + $0x40] sm:$0xff] %vm1981_vm6, %v1854_v17 }
 0x2d7   : > { %1726 = vst.msk [vmem:[#allocation2 + $0x108] sm:$0xff] %vm1692_vm5, %v1615_v8  ;;  %1871 = vrot.lane.b32.xlu1 %v1758_v42, %s3787_s27  ;;  %1917 = vrot.lane.b32.xlu0 %v1781_v57, %s3787_s27  ;;  %v2661_v42 = vld [vmem:[#allocation2 + $0x20] sm:$0xff] }
 0x2d8   : > { %3582 = vmatmul.mubr.msk.f32.vlgmr.msra.gmra.mrb[0].mxu0 %vm2716_vm10, %v2658_v20  ;;  %3618 = vmatmul.mubr.msk.f32.vlgmr.msra.gmra.mrb[0].mxu1 %vm2716_vm10, %v2682_v2  ;;  %v2685_v57 = vld [vmem:[#allocation2 + $0xe0] sm:$0xff] }
 0x2d9   : > { %v1856_v12 = vpop.permute.xlu1 %1855  ;;  %v1902_v34 = vpop.permute.xlu0 %1901  ;;  %3584 = vmatprep.mubr.msk.f32.mxu0 %vm2716_vm10, %v2659_v11  ;;  %3620 = vmatprep.mubr.msk.f32.mxu1 %vm2716_vm10, %v2683_v27  ;;  %v1763_v20 = vld [vmem:[%s3902_s21 + $0xe0] sm:$0xff]  ;;  %v1788_v27 = vld [vmem:[%s3902_s21 + $0x1a8] sm:$0xff] }
 0x2da   : > { %1991 = vst.msk [vmem:[#allocation2 + $0x48] sm:$0xff] %vm1981_vm6, %v1856_v12  ;;  %2014 = vst.msk [vmem:[#allocation2 + $0x100] sm:$0xff] %vm1981_vm6, %v1902_v34  ;;  %v2663_v12 = vld [vmem:[#allocation2 + $0x30] sm:$0xff] }
 0x2db   : > { %2158 = vrot.lane.b32.xlu1 %v2046_v36, %s3788_s28  ;;  %1919 = vrot.lane.b32.xlu0 %v1782_v62, %s3787_s27  ;;  %v2662_v36 = vld [vmem:[#allocation2 + $0x28] sm:$0xff]  ;;  %v2687_v34 = vld [vmem:[#allocation2 + $0xf0] sm:$0xff] }
 0x2dc   : > { %3585 = vmatmul.mubr.msk.f32.gmra.mrb[2].mxu0 %vm2716_vm10, %v2660_v39  ;;  %3621 = vmatmul.mubr.msk.f32.gmra.mrb[2].mxu1 %vm2716_vm10, %v2684_v5  ;;  %v2686_v62 = vld [vmem:[#allocation2 + $0xe8] sm:$0xff] }
 0x2dd   : > { %v2143_v43 = vpop.permute.xlu1 %2142  ;;  %v1904_v15 = vpop.permute.xlu0 %1903  ;;  %3587 = vmatprep.mubr.msk.f32.mxu0 %vm2716_vm10, %v2661_v42  ;;  %3623 = vmatprep.mubr.msk.f32.mxu1 %vm2716_vm10, %v2685_v57  ;;  %v2076_v5 = vld [vmem:[%s3902_s21 + $0x1a1] sm:$0xff]  ;;  %v2077_v57 = vld [vmem:[%s3902_s21 + $0x1a9] sm:$0xff] }
 0x2de   : > { %2279 = vst.msk [vmem:[#allocation2 + $0x40] sm:$0xff] %vm2270_vm7, %v2143_v43  ;;  %v2664_v43 = vld [vmem:[#allocation2 + $0x38] sm:$0xff] }
 0x2df   : > { %2015 = vst.msk [vmem:[#allocation2 + $0x108] sm:$0xff] %vm1981_vm6, %v1904_v15  ;;  %2160 = vrot.lane.b32.xlu1 %v2047_v41, %s3788_s28  ;;  %2206 = vrot.lane.b32.xlu0 %v2070_v40, %s3788_s28  ;;  %v2688_v15 = vld [vmem:[#allocation2 + $0xf8] sm:$0xff] }
 0x2e0   : > { %3588 = vmatmul.mubr.msk.f32.gmra.mrb[4].mxu0 %vm2716_vm10, %v2662_v36  ;;  %3624 = vmatmul.mubr.msk.f32.gmra.mrb[4].mxu1 %vm2716_vm10, %v2686_v62  ;;  %v2365_v62 = vld [vmem:[%s3902_s21 + $0x1a2] sm:$0xff] }
 0x2e1   : > { %v2145_v23 = vpop.permute.xlu1 %2144  ;;  %v2191_v63 = vpop.permute.xlu0 %2190  ;;  %3590 = vmatprep.mubr.msk.f32.mxu0 %vm2716_vm10, %v2663_v12  ;;  %3626 = vmatprep.mubr.msk.f32.mxu1 %vm2716_vm10, %v2687_v34  ;;  %v2341_v12 = vld [vmem:[%s3902_s21 + $0xe2] sm:$0xff] }
 0x2e2   : > { %2280 = vst.msk [vmem:[#allocation2 + $0x48] sm:$0xff] %vm2270_vm7, %v2145_v23  ;;  %2303 = vst.msk [vmem:[#allocation2 + $0x100] sm:$0xff] %vm2270_vm7, %v2191_v63 }
 0x2e3   : > { %2447 = vrot.lane.b32.xlu1 %v2335_v25, %s3789_s29  ;;  %2208 = vrot.lane.b32.xlu0 %v2071_v47, %s3788_s28  ;;  %v1761_v47 = vld [vmem:[%s3902_s21 + $0xd0] sm:$0xff] }
 0x2e4   : > { %3591 = vmatmul.mubr.msk.f32.gmra.mrb[6].mxu0 %vm2716_vm10, %v2664_v43  ;;  %3627 = vmatmul.mubr.msk.f32.gmra.mrb[6].mxu1 %vm2716_vm10, %v2688_v15  ;;  %v2366_v43 = vld [vmem:[%s3902_s21 + $0x1aa] sm:$0xff] }
 0x2e5   : > { %v2432_v32 = vpop.permute.xlu1 %2431  ;;  %v2193_v0 = vpop.permute.xlu0 %2192  ;;  %v2342_v15 = vld [vmem:[%s3902_s21 + $0xea] sm:$0xff] }
 0x2e6   : > { %2568 = vst.msk [vmem:[#allocation2 + $0x40] sm:$0xff] %vm2559_vm8, %v2432_v32 }
 0x2e7   : > { %2304 = vst.msk [vmem:[#allocation2 + $0x108] sm:$0xff] %vm2270_vm7, %v2193_v0  ;;  %1632 = vrot.lane.b32.xlu1 %v2358_v31, %s3786_s26  ;;  %2495 = vrot.lane.b32.xlu0 %v2359_v46, %s3789_s29 }
 0x2e8   : > { %2617 = vst.msk [vmem:[#allocation2 + $0x40] sm:$0xff] %vm2608_vm9, %v3790_v3 }
 0x2e9   : > { %v1617_v53 = vpop.permute.xlu1 %1616  ;;  %v2480_v52 = vpop.permute.xlu0 %2479 }
 0x2ea   : > { %1727 = vst.msk [vmem:[#allocation2 + $0x110] sm:$0xff] %vm1692_vm5, %v1617_v53  ;;  %v1762_v53 = vld [vmem:[%s3902_s21 + $0xd8] sm:$0xff] }
 0x2eb   : > { %2592 = vst.msk [vmem:[#allocation2 + $0x100] sm:$0xff] %vm2559_vm8, %v2480_v52  ;;  %2497 = vrot.lane.b32.xlu1 %v5224_v49, %s3789_s29  ;;  %2449 = vrot.lane.b32.xlu0 %v5227_v48, %s3789_s29 }
 0x2ec   : > { %2641 = vst.msk [vmem:[#allocation2 + $0x100] sm:$0xff] %vm2608_vm9, %v3790_v3 }
 0x2ed   : > { %v2482_v51 = vpop.permute.xlu1 %2481  ;;  %v2434_v56 = vpop.permute.xlu0 %2433 }
 0x2ee   : > { %2593 = vst.msk [vmem:[#allocation2 + $0x108] sm:$0xff] %vm2559_vm8, %v2482_v51  ;;  %2569 = vst.msk [vmem:[#allocation2 + $0x48] sm:$0xff] %vm2559_vm8, %v2434_v56 }
 0x2ef   : > { %2642 = vst.msk [vmem:[#allocation2 + $0x108] sm:$0xff] %vm2608_vm9, %v3790_v3  ;;  %2618 = vst.msk [vmem:[#allocation2 + $0x48] sm:$0xff] %vm2608_vm9, %v3790_v3  ;;  %1634 = vrot.lane.b32.xlu1 %v2359_v46, %s3786_s26  ;;  %1586 = vrot.lane.b32.xlu0 %v2335_v25, %s3786_s26  ;;  %v1785_v25 = vld [vmem:[%s3902_s21 + $0x190] sm:$0xff]  ;;  %v2665_v23 = vld [vmem:[#allocation2 + $0x40] sm:$0xff] }
 0x2f0   : > { %3593 = vmatprep.mubr.msk.f32.mxu0 %vm2716_vm10, %v2665_v23 }
 0x2f1   : > { %v1858_v59 = vpop.permute.xlu1 %1857  ;;  %v1619_v29 = vpop.permute.xlu0 %1618 }
 0x2f2   : > { %1992 = vst.msk [vmem:[#allocation2 + $0x50] sm:$0xff] %vm1981_vm6, %v1858_v59 }
 0x2f3   : > { %1728 = vst.msk [vmem:[#allocation2 + $0x118] sm:$0xff] %vm1692_vm5, %v1619_v29  ;;  %1921 = vrot.lane.b32.xlu1 %v1783_v61, %s3787_s27  ;;  %1873 = vrot.lane.b32.xlu0 %v1759_v18, %s3787_s27  ;;  %v2689_v63 = vld [vmem:[#allocation2 + $0x100] sm:$0xff]  ;;  %v2074_v29 = vld [vmem:[%s3902_s21 + $0x191] sm:$0xff] }
 0x2f4   : > { %3629 = vmatprep.mubr.msk.f32.mxu1 %vm2716_vm10, %v2689_v63 }
 0x2f5   : > { %v1860_v60 = vpop.permute.xlu1 %1859  ;;  %v1906_v4 = vpop.permute.xlu0 %1905 }
 0x2f6   : > { %1993 = vst.msk [vmem:[#allocation2 + $0x58] sm:$0xff] %vm1981_vm6, %v1860_v60  ;;  %2016 = vst.msk [vmem:[#allocation2 + $0x110] sm:$0xff] %vm1981_vm6, %v1906_v4  ;;  %v2666_v0 = vld [vmem:[#allocation2 + $0x48] sm:$0xff]  ;;  %v2075_v4 = vld [vmem:[%s3902_s21 + $0x199] sm:$0xff] }
 0x2f7   : > { %1923 = vrot.lane.b32.xlu1 %v1784_v6, %s3787_s27  ;;  %1875 = vrot.lane.b32.xlu0 %v1760_v10, %s3787_s27  ;;  %v2050_v6 = vld [vmem:[%s3902_s21 + $0xd1] sm:$0xff] }
 0x2f8   : > { %3594 = vmatmul.mubr.msk.f32.gmra.mrb[8].mxu0 %vm2716_vm10, %v2666_v0 }
 0x2f9   : > { %v2147_v1 = vpop.permute.xlu1 %2146  ;;  %v1908_v38 = vpop.permute.xlu0 %1907 }
 0x2fa   : > { %2281 = vst.msk [vmem:[#allocation2 + $0x50] sm:$0xff] %vm2270_vm7, %v2147_v1 }
 0x2fb   : > { %2017 = vst.msk [vmem:[#allocation2 + $0x118] sm:$0xff] %vm1981_vm6, %v1908_v38  ;;  %2210 = vrot.lane.b32.xlu1 %v2072_v28, %s3788_s28  ;;  %2162 = vrot.lane.b32.xlu0 %v2048_v26, %s3788_s28  ;;  %v2363_v26 = vld [vmem:[%s3902_s21 + $0x192] sm:$0xff] }
 0x2fd   : > { %v2149_v45 = vpop.permute.xlu1 %2148  ;;  %v2195_v7 = vpop.permute.xlu0 %2194 }
 0x2fe   : > { %2282 = vst.msk [vmem:[#allocation2 + $0x58] sm:$0xff] %vm2270_vm7, %v2149_v45  ;;  %2305 = vst.msk [vmem:[#allocation2 + $0x110] sm:$0xff] %vm2270_vm7, %v2195_v7 }
 0x2ff   : > { %2212 = vrot.lane.b32.xlu1 %v2073_v9, %s3788_s28  ;;  %2164 = vrot.lane.b32.xlu0 %v2049_v35, %s3788_s28  ;;  %v2364_v35 = vld [vmem:[%s3902_s21 + $0x19a] sm:$0xff] }
 0x301   : > { %v2436_v37 = vpop.permute.xlu1 %2435  ;;  %v2197_v21 = vpop.permute.xlu0 %2196 }
 0x302   : > { %2570 = vst.msk [vmem:[#allocation2 + $0x50] sm:$0xff] %vm2559_vm8, %v2436_v37 }
 0x303   : > { %2306 = vst.msk [vmem:[#allocation2 + $0x118] sm:$0xff] %vm2270_vm7, %v2197_v21  ;;  %2499 = vrot.lane.b32.xlu1 %v5270_v19, %s3789_s29  ;;  %2451 = vrot.lane.b32.xlu0 %v2337_v24, %s3789_s29  ;;  %v1787_v21 = vld [vmem:[%s3902_s21 + $0x1a0] sm:$0xff] }
 0x304   : > { %2619 = vst.msk [vmem:[#allocation2 + $0x50] sm:$0xff] %vm2608_vm9, %v3790_v3 }
 0x305   : > { %v1621_v31 = vpop.permute.xlu1 %1620  ;;  %v2484_v30 = vpop.permute.xlu0 %2483 }
 0x306   : > { %1729 = vst.msk [vmem:[#allocation2 + $0x120] sm:$0xff] %vm1692_vm5, %v1621_v31  ;;  %v1764_v31 = vld [vmem:[%s3902_s21 + $0xe8] sm:$0xff] }
 0x307   : > { %2594 = vst.msk [vmem:[#allocation2 + $0x110] sm:$0xff] %vm2559_vm8, %v2484_v30  ;;  %1636 = vrot.lane.b32.xlu1 %v5224_v49, %s3786_s26  ;;  %1588 = vrot.lane.b32.xlu0 %v5227_v48, %s3786_s26  ;;  %v2690_v49 = vld [vmem:[#allocation2 + $0x108] sm:$0xff]  ;;  %v1786_v48 = vld [vmem:[%s3902_s21 + $0x198] sm:$0xff] }
 0x308   : > { %2643 = vst.msk [vmem:[#allocation2 + $0x110] sm:$0xff] %vm2608_vm9, %v3790_v3  ;;  %3630 = vmatmul.mubr.msk.f32.gmra.mrb[8].mxu1 %vm2716_vm10, %v2690_v49 }
 0x309   : > { %v2486_v17 = vpop.permute.xlu1 %2485  ;;  %v2438_v8 = vpop.permute.xlu0 %2437 }
 0x30a   : > { %2595 = vst.msk [vmem:[#allocation2 + $0x118] sm:$0xff] %vm2559_vm8, %v2486_v17  ;;  %2571 = vst.msk [vmem:[#allocation2 + $0x58] sm:$0xff] %vm2559_vm8, %v2438_v8  ;;  %v2053_v17 = vld [vmem:[%s3902_s21 + $0xe9] sm:$0xff] }
 0x30b   : > { %2644 = vst.msk [vmem:[#allocation2 + $0x118] sm:$0xff] %vm2608_vm9, %v3790_v3  ;;  %2620 = vst.msk [vmem:[#allocation2 + $0x58] sm:$0xff] %vm2608_vm9, %v3790_v3  ;;  %2501 = vrot.lane.b32.xlu1 %v5295_v22, %s3789_s29  ;;  %2453 = vrot.lane.b32.xlu0 %v5298_v54, %s3789_s29  ;;  %v2667_v52 = vld [vmem:[#allocation2 + $0x50] sm:$0xff] }
 0x30c   : > { %3596 = vmatprep.mubr.msk.f32.mxu0 %vm2716_vm10, %v2667_v52 }
 0x30d   : > { %v1862_v41 = vpop.permute.xlu1 %1861  ;;  %v1623_v40 = vpop.permute.xlu0 %1622 }
 0x30e   : > { %1994 = vst.msk [vmem:[#allocation2 + $0x60] sm:$0xff] %vm1981_vm6, %v1862_v41 }
 0x30f   : > { %1730 = vst.msk [vmem:[#allocation2 + $0x128] sm:$0xff] %vm1692_vm5, %v1623_v40  ;;  %1638 = vrot.lane.b32.xlu1 %v5270_v19, %s3786_s26  ;;  %1590 = vrot.lane.b32.xlu0 %v2337_v24, %s3786_s26  ;;  %v2691_v51 = vld [vmem:[#allocation2 + $0x110] sm:$0xff] }
 0x310   : > { %3632 = vmatprep.mubr.msk.f32.mxu1 %vm2716_vm10, %v2691_v51 }
 0x311   : > { %v1864_v46 = vpop.permute.xlu1 %1863  ;;  %v1910_v32 = vpop.permute.xlu0 %1909 }
 0x312   : > { %1995 = vst.msk [vmem:[#allocation2 + $0x68] sm:$0xff] %vm1981_vm6, %v1864_v46  ;;  %2018 = vst.msk [vmem:[#allocation2 + $0x120] sm:$0xff] %vm1981_vm6, %v1910_v32  ;;  %v2668_v18 = vld [vmem:[#allocation2 + $0x58] sm:$0xff] }
 0x313   : > { %1925 = vrot.lane.b32.xlu1 %v1785_v25, %s3787_s27  ;;  %1877 = vrot.lane.b32.xlu0 %v1761_v47, %s3787_s27  ;;  %v2692_v59 = vld [vmem:[#allocation2 + $0x118] sm:$0xff] }
 0x314   : > { %3597 = vmatmul.mubr.msk.f32.gmra.mrb[10].mxu0 %vm2716_vm10, %v2668_v18  ;;  %3633 = vmatmul.mubr.msk.f32.gmra.mrb[10].mxu1 %vm2716_vm10, %v2692_v59 }
 0x315   : > { %v2151_v56 = vpop.permute.xlu1 %2150  ;;  %v1912_v61 = vpop.permute.xlu0 %1911 }
 0x316   : > { %2283 = vst.msk [vmem:[#allocation2 + $0x60] sm:$0xff] %vm2270_vm7, %v2151_v56 }
 0x317   : > { %2019 = vst.msk [vmem:[#allocation2 + $0x128] sm:$0xff] %vm1981_vm6, %v1912_v61  ;;  %1927 = vrot.lane.b32.xlu1 %v1786_v48, %s3787_s27  ;;  %1879 = vrot.lane.b32.xlu0 %v1762_v53, %s3787_s27 }
 0x319   : > { %v2153_v10 = vpop.permute.xlu1 %2152  ;;  %v2199_v60 = vpop.permute.xlu0 %2198 }
 0x31a   : > { %2284 = vst.msk [vmem:[#allocation2 + $0x68] sm:$0xff] %vm2270_vm7, %v2153_v10  ;;  %2307 = vst.msk [vmem:[#allocation2 + $0x120] sm:$0xff] %vm2270_vm7, %v2199_v60 }
 0x31b   : > { %2214 = vrot.lane.b32.xlu1 %v2074_v29, %s3788_s28  ;;  %2166 = vrot.lane.b32.xlu0 %v2050_v6, %s3788_s28 }
 0x31d   : > { %v2440_v33 = vpop.permute.xlu1 %2439  ;;  %v2201_v28 = vpop.permute.xlu0 %2200 }
 0x31e   : > { %2572 = vst.msk [vmem:[#allocation2 + $0x60] sm:$0xff] %vm2559_vm8, %v2440_v33 }
 0x31f   : > { %2308 = vst.msk [vmem:[#allocation2 + $0x128] sm:$0xff] %vm2270_vm7, %v2201_v28  ;;  %2216 = vrot.lane.b32.xlu1 %v2075_v4, %s3788_s28  ;;  %2168 = vrot.lane.b32.xlu0 %v2051_v16, %s3788_s28 }
 0x320   : > { %2621 = vst.msk [vmem:[#allocation2 + $0x60] sm:$0xff] %vm2608_vm9, %v3790_v3 }
 0x321   : > { %v1625_v1 = vpop.permute.xlu1 %1624  ;;  %v2488_v38 = vpop.permute.xlu0 %2487 }
 0x322   : > { %1731 = vst.msk [vmem:[#allocation2 + $0x130] sm:$0xff] %vm1692_vm5, %v1625_v1 }
 0x323   : > { %2596 = vst.msk [vmem:[#allocation2 + $0x120] sm:$0xff] %vm2559_vm8, %v2488_v38  ;;  %2503 = vrot.lane.b32.xlu1 %v2363_v26, %s3789_s29  ;;  %2455 = vrot.lane.b32.xlu0 %v2339_v13, %s3789_s29 }
 0x324   : > { %2645 = vst.msk [vmem:[#allocation2 + $0x120] sm:$0xff] %vm2608_vm9, %v3790_v3 }
 0x325   : > { %v2490_v44 = vpop.permute.xlu1 %2489  ;;  %v2442_v58 = vpop.permute.xlu0 %2441 }
 0x326   : > { %2597 = vst.msk [vmem:[#allocation2 + $0x128] sm:$0xff] %vm2559_vm8, %v2490_v44  ;;  %2573 = vst.msk [vmem:[#allocation2 + $0x68] sm:$0xff] %vm2559_vm8, %v2442_v58 }
 0x327   : > { %v2669_v9 = vld [vmem:[#allocation2 + $0x60] sm:$0xff]  ;;  %2646 = vst.msk [vmem:[#allocation2 + $0x128] sm:$0xff] %vm2608_vm9, %v3790_v3  ;;  %2622 = vst.msk [vmem:[#allocation2 + $0x68] sm:$0xff] %vm2608_vm9, %v3790_v3  ;;  %1640 = vrot.lane.b32.xlu1 %v5295_v22, %s3786_s26  ;;  %1592 = vrot.lane.b32.xlu0 %v5298_v54, %s3786_s26 }
 0x328   : > { %3599 = vmatprep.mubr.msk.f32.mxu0 %vm2716_vm10, %v2669_v9  ;;  %v2052_v22 = vld [vmem:[%s3902_s21 + $0xe1] sm:$0xff] }
 0x329   : > { %v1866_v45 = vpop.permute.xlu1 %1865  ;;  %v1627_v7 = vpop.permute.xlu0 %1626 }
 0x32a   : > { %1996 = vst.msk [vmem:[#allocation2 + $0x70] sm:$0xff] %vm1981_vm6, %v1866_v45 }
 0x32b   : > { %1732 = vst.msk [vmem:[#allocation2 + $0x138] sm:$0xff] %vm1692_vm5, %v1627_v7  ;;  %v2693_v19 = vld [vmem:[#allocation2 + $0x120] sm:$0xff]  ;;  %2505 = vrot.lane.b32.xlu1 %v2364_v35, %s3789_s29  ;;  %2457 = vrot.lane.b32.xlu0 %v2340_v50, %s3789_s29 }
 0x32c   : > { %3635 = vmatprep.mubr.msk.f32.mxu1 %vm2716_vm10, %v2693_v19 }
 0x32d   : > { %v1868_v24 = vpop.permute.xlu1 %1867  ;;  %v1914_v55 = vpop.permute.xlu0 %1913 }
 0x32e   : > { %1997 = vst.msk [vmem:[#allocation2 + $0x78] sm:$0xff] %vm1981_vm6, %v1868_v24  ;;  %2020 = vst.msk [vmem:[#allocation2 + $0x130] sm:$0xff] %vm1981_vm6, %v1914_v55  ;;  %v2670_v14 = vld [vmem:[#allocation2 + $0x68] sm:$0xff] }
 0x32f   : > { %v2694_v37 = vld [vmem:[#allocation2 + $0x128] sm:$0xff]  ;;  %1642 = vrot.lane.b32.xlu1 %v2363_v26, %s3786_s26  ;;  %1594 = vrot.lane.b32.xlu0 %v2339_v13, %s3786_s26 }
 0x330   : > { %3600 = vmatmul.mubr.msk.f32.gmra.mrb[12].mxu0 %vm2716_vm10, %v2670_v14  ;;  %3636 = vmatmul.mubr.msk.f32.gmra.mrb[12].mxu1 %vm2716_vm10, %v2694_v37 }
 0x331   : > { %v2155_v2 = vpop.permute.xlu1 %2154  ;;  %v1916_v11 = vpop.permute.xlu0 %1915 }
 0x332   : > { %2285 = vst.msk [vmem:[#allocation2 + $0x70] sm:$0xff] %vm2270_vm7, %v2155_v2 }
 0x333   : > { %2021 = vst.msk [vmem:[#allocation2 + $0x138] sm:$0xff] %vm1981_vm6, %v1916_v11  ;;  %1929 = vrot.lane.b32.xlu1 %v1787_v21, %s3787_s27  ;;  %1881 = vrot.lane.b32.xlu0 %v1763_v20, %s3787_s27 }
 0x335   : > { %v2157_v30 = vpop.permute.xlu1 %2156  ;;  %v2203_v39 = vpop.permute.xlu0 %2202 }
 0x336   : > { %2286 = vst.msk [vmem:[#allocation2 + $0x78] sm:$0xff] %vm2270_vm7, %v2157_v30  ;;  %2309 = vst.msk [vmem:[#allocation2 + $0x130] sm:$0xff] %vm2270_vm7, %v2203_v39 }
 0x337   : > { %1931 = vrot.lane.b32.xlu1 %v1788_v27, %s3787_s27  ;;  %1883 = vrot.lane.b32.xlu0 %v1764_v31, %s3787_s27 }
 0x339   : > { %v2444_v54 = vpop.permute.xlu1 %2443  ;;  %v2205_v42 = vpop.permute.xlu0 %2204 }
 0x33a   : > { %2574 = vst.msk [vmem:[#allocation2 + $0x70] sm:$0xff] %vm2559_vm8, %v2444_v54 }
 0x33b   : > { %2310 = vst.msk [vmem:[#allocation2 + $0x138] sm:$0xff] %vm2270_vm7, %v2205_v42  ;;  %2218 = vrot.lane.b32.xlu1 %v2076_v5, %s3788_s28  ;;  %2170 = vrot.lane.b32.xlu0 %v2052_v22, %s3788_s28 }
 0x33c   : > { %2623 = vst.msk [vmem:[#allocation2 + $0x70] sm:$0xff] %vm2608_vm9, %v3790_v3 }
 0x33d   : > { %v1629_v8 = vpop.permute.xlu1 %1628  ;;  %v2492_v36 = vpop.permute.xlu0 %2491 }
 0x33e   : > { %1733 = vst.msk [vmem:[#allocation2 + $0x140] sm:$0xff] %vm1692_vm5, %v1629_v8 }
 0x33f   : > { %2598 = vst.msk [vmem:[#allocation2 + $0x130] sm:$0xff] %vm2559_vm8, %v2492_v36  ;;  %2220 = vrot.lane.b32.xlu1 %v2077_v57, %s3788_s28  ;;  %2172 = vrot.lane.b32.xlu0 %v2053_v17, %s3788_s28 }
 0x340   : > { %2647 = vst.msk [vmem:[#allocation2 + $0x130] sm:$0xff] %vm2608_vm9, %v3790_v3 }
 0x341   : > { %v2494_v34 = vpop.permute.xlu1 %2493  ;;  %v2446_v41 = vpop.permute.xlu0 %2445 }
 0x342   : > { %2599 = vst.msk [vmem:[#allocation2 + $0x138] sm:$0xff] %vm2559_vm8, %v2494_v34  ;;  %2575 = vst.msk [vmem:[#allocation2 + $0x78] sm:$0xff] %vm2559_vm8, %v2446_v41 }
 0x343   : > { %v2671_v40 = vld [vmem:[#allocation2 + $0x70] sm:$0xff]  ;;  %2648 = vst.msk [vmem:[#allocation2 + $0x138] sm:$0xff] %vm2608_vm9, %v3790_v3  ;;  %2624 = vst.msk [vmem:[#allocation2 + $0x78] sm:$0xff] %vm2608_vm9, %v3790_v3  ;;  %2507 = vrot.lane.b32.xlu1 %v2365_v62, %s3789_s29  ;;  %2459 = vrot.lane.b32.xlu0 %v2341_v12, %s3789_s29 }
 0x344   : > { %3602 = vmatprep.mubr.msk.f32.mxu0 %vm2716_vm10, %v2671_v40 }
 0x345   : > { %v1870_v25 = vpop.permute.xlu1 %1869  ;;  %v1631_v47 = vpop.permute.xlu0 %1630 }
 0x346   : > { %1998 = vst.msk [vmem:[#allocation2 + $0x80] sm:$0xff] %vm1981_vm6, %v1870_v25 }
 0x347   : > { %1734 = vst.msk [vmem:[#allocation2 + $0x148] sm:$0xff] %vm1692_vm5, %v1631_v47  ;;  %v2695_v23 = vld [vmem:[#allocation2 + $0x130] sm:$0xff]  ;;  %2509 = vrot.lane.b32.xlu1 %v2366_v43, %s3789_s29  ;;  %2461 = vrot.lane.b32.xlu0 %v2342_v15, %s3789_s29 }
 0x348   : > { %3638 = vmatprep.mubr.msk.f32.mxu1 %vm2716_vm10, %v2695_v23 }
 0x349   : > { %v1872_v63 = vpop.permute.xlu1 %1871  ;;  %v1918_v46 = vpop.permute.xlu0 %1917 }
 0x34a   : > { %1999 = vst.msk [vmem:[#allocation2 + $0x88] sm:$0xff] %vm1981_vm6, %v1872_v63  ;;  %2022 = vst.msk [vmem:[#allocation2 + $0x140] sm:$0xff] %vm1981_vm6, %v1918_v46  ;;  %v2672_v32 = vld [vmem:[#allocation2 + $0x78] sm:$0xff] }
 0x34b   : > { %v2696_v0 = vld [vmem:[#allocation2 + $0x138] sm:$0xff]  ;;  %3603 = vmatmul.mubr.msk.f32.gmra.mrb[14].mxu0 %vm2716_vm10, %v2672_v32 }
 0x34c   : > { %3639 = vmatmul.mubr.msk.f32.gmra.mrb[14].mxu1 %vm2716_vm10, %v2696_v0 }
 0x34d   : > { %v2159_v49 = vpop.permute.xlu1 %2158  ;;  %v1920_v48 = vpop.permute.xlu0 %1919 }
 0x34e   : > { %2287 = vst.msk [vmem:[#allocation2 + $0x80] sm:$0xff] %vm2270_vm7, %v2159_v49 }
 0x34f   : > { %2023 = vst.msk [vmem:[#allocation2 + $0x148] sm:$0xff] %vm1981_vm6, %v1920_v48 }
 0x351   : > { %v2161_v53 = vpop.permute.xlu1 %2160  ;;  %v2207_v52 = vpop.permute.xlu0 %2206 }
 0x352   : > { %2288 = vst.msk [vmem:[#allocation2 + $0x88] sm:$0xff] %vm2270_vm7, %v2161_v53  ;;  %2311 = vst.msk [vmem:[#allocation2 + $0x140] sm:$0xff] %vm2270_vm7, %v2207_v52 }
 0x355   : > { %v2448_v51 = vpop.permute.xlu1 %2447  ;;  %v2209_v56 = vpop.permute.xlu0 %2208 }
 0x356   : > { %2576 = vst.msk [vmem:[#allocation2 + $0x80] sm:$0xff] %vm2559_vm8, %v2448_v51 }
 0x357   : > { %2312 = vst.msk [vmem:[#allocation2 + $0x148] sm:$0xff] %vm2270_vm7, %v2209_v56 }
 0x358   : > { %2625 = vst.msk [vmem:[#allocation2 + $0x80] sm:$0xff] %vm2608_vm9, %v3790_v3 }
 0x359   : > { %v1633_v61 = vpop.permute.xlu1 %1632  ;;  %v2496_v18 = vpop.permute.xlu0 %2495 }
 0x35a   : > { %1735 = vst.msk [vmem:[#allocation2 + $0x150] sm:$0xff] %vm1692_vm5, %v1633_v61 }
 0x35b   : > { %2600 = vst.msk [vmem:[#allocation2 + $0x140] sm:$0xff] %vm2559_vm8, %v2496_v18 }
 0x35c   : > { %2649 = vst.msk [vmem:[#allocation2 + $0x140] sm:$0xff] %vm2608_vm9, %v3790_v3 }
 0x35d   : > { %v2498_v59 = vpop.permute.xlu1 %2497  ;;  %v2450_v29 = vpop.permute.xlu0 %2449 }
 0x35e   : > { %2601 = vst.msk [vmem:[#allocation2 + $0x148] sm:$0xff] %vm2559_vm8, %v2498_v59  ;;  %2577 = vst.msk [vmem:[#allocation2 + $0x88] sm:$0xff] %vm2559_vm8, %v2450_v29  ;;  %v5545_v29 = vld [vmem:[#allocation6] ss:$0 sm:$0xff] }
 0x35f   : > { %v2673_v6 = vld [vmem:[#allocation2 + $0x80] sm:$0xff]  ;;  %2650 = vst.msk [vmem:[#allocation2 + $0x148] sm:$0xff] %vm2608_vm9, %v3790_v3  ;;  %2626 = vst.msk [vmem:[#allocation2 + $0x88] sm:$0xff] %vm2608_vm9, %v3790_v3 }
 0x360   : > { %3605 = vmatprep.mubr.msk.f32.mxu0 %vm2716_vm10, %v2673_v6 }
 0x361   : > { %v1635_v10 = vpop.permute.xlu1 %1634  ;;  %v1587_v60 = vpop.permute.xlu0 %1586 }
 0x362   : > { %1736 = vst.msk [vmem:[#allocation2 + $0x158] sm:$0xff] %vm1692_vm5, %v1635_v10  ;;  %1712 = vst.msk [vmem:[#allocation2 + $0x98] sm:$0xff] %vm1692_vm5, %v1587_v60 }
 0x363   : > { %v2697_v4 = vld [vmem:[#allocation2 + $0x140] sm:$0xff] }
 0x364   : > { %3641 = vmatprep.mubr.msk.f32.mxu1 %vm2716_vm10, %v2697_v4 }
 0x365   : > { %v1922_v16 = vpop.permute.xlu1 %1921  ;;  %v1874_v33 = vpop.permute.xlu0 %1873 }
 0x366   : > { %2024 = vst.msk [vmem:[#allocation2 + $0x150] sm:$0xff] %vm1981_vm6, %v1922_v16  ;;  %2000 = vst.msk [vmem:[#allocation2 + $0x90] sm:$0xff] %vm1981_vm6, %v1874_v33  ;;  %v2674_v28 = vld [vmem:[#allocation2 + $0x88] sm:$0xff] }
 0x367   : > { %v2698_v26 = vld [vmem:[#allocation2 + $0x148] sm:$0xff]  ;;  %3606 = vmatmul.mubr.msk.f32.gmra.mrb[16].mxu0 %vm2716_vm10, %v2674_v28 }
 0x368   : > { %3642 = vmatmul.mubr.msk.f32.gmra.mrb[16].mxu1 %vm2716_vm10, %v2698_v26 }
 0x369   : > { %v1924_v13 = vpop.permute.xlu1 %1923  ;;  %v1876_v1 = vpop.permute.xlu0 %1875 }
 0x36a   : > { %2025 = vst.msk [vmem:[#allocation2 + $0x158] sm:$0xff] %vm1981_vm6, %v1924_v13  ;;  %2001 = vst.msk [vmem:[#allocation2 + $0x98] sm:$0xff] %vm1981_vm6, %v1876_v1 }
 0x36d   : > { %v2211_v38 = vpop.permute.xlu1 %2210  ;;  %v2163_v44 = vpop.permute.xlu0 %2162 }
 0x36e   : > { %2313 = vst.msk [vmem:[#allocation2 + $0x150] sm:$0xff] %vm2270_vm7, %v2211_v38  ;;  %2289 = vst.msk [vmem:[#allocation2 + $0x90] sm:$0xff] %vm2270_vm7, %v2163_v44 }
 0x371   : > { %v2213_v58 = vpop.permute.xlu1 %2212  ;;  %v2165_v9 = vpop.permute.xlu0 %2164 }
 0x372   : > { %2314 = vst.msk [vmem:[#allocation2 + $0x158] sm:$0xff] %vm2270_vm7, %v2213_v58  ;;  %2290 = vst.msk [vmem:[#allocation2 + $0x98] sm:$0xff] %vm2270_vm7, %v2165_v9 }
 0x375   : > { %v2500_v35 = vpop.permute.xlu1 %2499  ;;  %v2452_v50 = vpop.permute.xlu0 %2451 }
 0x376   : > { %2602 = vst.msk [vmem:[#allocation2 + $0x150] sm:$0xff] %vm2559_vm8, %v2500_v35  ;;  %2578 = vst.msk [vmem:[#allocation2 + $0x90] sm:$0xff] %vm2559_vm8, %v2452_v50 }
 0x377   : > { %2651 = vst.msk [vmem:[#allocation2 + $0x150] sm:$0xff] %vm2608_vm9, %v3790_v3  ;;  %2627 = vst.msk [vmem:[#allocation2 + $0x90] sm:$0xff] %vm2608_vm9, %v3790_v3 }
 0x379   : > { %v1637_v45 = vpop.permute.xlu1 %1636  ;;  %v1589_v7 = vpop.permute.xlu0 %1588 }
 0x37a   : > { %1737 = vst.msk [vmem:[#allocation2 + $0x160] sm:$0xff] %vm1692_vm5, %v1637_v45  ;;  %1713 = vst.msk [vmem:[#allocation2 + $0xa0] sm:$0xff] %vm1692_vm5, %v1589_v7 }
 0x37d   : > { %v2502_v19 = vpop.permute.xlu1 %2501  ;;  %v2454_v24 = vpop.permute.xlu0 %2453 }
 0x37e   : > { %2603 = vst.msk [vmem:[#allocation2 + $0x158] sm:$0xff] %vm2559_vm8, %v2502_v19  ;;  %2579 = vst.msk [vmem:[#allocation2 + $0x98] sm:$0xff] %vm2559_vm8, %v2454_v24  ;;  %v2675_v55 = vld [vmem:[#allocation2 + $0x90] sm:$0xff] }
 0x37f   : > { %v2699_v14 = vld [vmem:[#allocation2 + $0x150] sm:$0xff]  ;;  %2652 = vst.msk [vmem:[#allocation2 + $0x158] sm:$0xff] %vm2608_vm9, %v3790_v3  ;;  %2628 = vst.msk [vmem:[#allocation2 + $0x98] sm:$0xff] %vm2608_vm9, %v3790_v3  ;;  %3608 = vmatprep.mubr.msk.f32.mxu0 %vm2716_vm10, %v2675_v55 }
 0x380   : > { %3644 = vmatprep.mubr.msk.f32.mxu1 %vm2716_vm10, %v2699_v14 }
 0x381   : > { %v1639_v37 = vpop.permute.xlu1 %1638  ;;  %v1591_v21 = vpop.permute.xlu0 %1590 }
 0x382   : > { %1738 = vst.msk [vmem:[#allocation2 + $0x168] sm:$0xff] %vm1692_vm5, %v1639_v37  ;;  %1714 = vst.msk [vmem:[#allocation2 + $0xa8] sm:$0xff] %vm1692_vm5, %v1591_v21 }
 0x385   : > { %v1926_v20 = vpop.permute.xlu1 %1925  ;;  %v1878_v2 = vpop.permute.xlu0 %1877 }
 0x386   : > { %2026 = vst.msk [vmem:[#allocation2 + $0x160] sm:$0xff] %vm1981_vm6, %v1926_v20  ;;  %2002 = vst.msk [vmem:[#allocation2 + $0xa0] sm:$0xff] %vm1981_vm6, %v1878_v2  ;;  %v2676_v11 = vld [vmem:[#allocation2 + $0x98] sm:$0xff] }
 0x387   : > { %v2700_v27 = vld [vmem:[#allocation2 + $0x158] sm:$0xff]  ;;  %3609 = vmatmul.mubr.msk.f32.gmra.mrb[18].mxu0 %vm2716_vm10, %v2676_v11 }
 0x388   : > { %3645 = vmatmul.mubr.msk.f32.gmra.mrb[18].mxu1 %vm2716_vm10, %v2700_v27 }
 0x389   : > { %v1928_v31 = vpop.permute.xlu1 %1927  ;;  %v1880_v30 = vpop.permute.xlu0 %1879 }
 0x38a   : > { %2027 = vst.msk [vmem:[#allocation2 + $0x168] sm:$0xff] %vm1981_vm6, %v1928_v31  ;;  %2003 = vst.msk [vmem:[#allocation2 + $0xa8] sm:$0xff] %vm1981_vm6, %v1880_v30 }
 0x38d   : > { %v2215_v39 = vpop.permute.xlu1 %2214  ;;  %v2167_v5 = vpop.permute.xlu0 %2166 }
 0x38e   : > { %2315 = vst.msk [vmem:[#allocation2 + $0x160] sm:$0xff] %vm2270_vm7, %v2215_v39  ;;  %2291 = vst.msk [vmem:[#allocation2 + $0xa0] sm:$0xff] %vm2270_vm7, %v2167_v5 }
 0x391   : > { %v2217_v22 = vpop.permute.xlu1 %2216  ;;  %v2169_v54 = vpop.permute.xlu0 %2168 }
 0x392   : > { %2316 = vst.msk [vmem:[#allocation2 + $0x168] sm:$0xff] %vm2270_vm7, %v2217_v22  ;;  %2292 = vst.msk [vmem:[#allocation2 + $0xa8] sm:$0xff] %vm2270_vm7, %v2169_v54 }
 0x395   : > { %v2504_v42 = vpop.permute.xlu1 %2503  ;;  %v2456_v57 = vpop.permute.xlu0 %2455 }
 0x396   : > { %2604 = vst.msk [vmem:[#allocation2 + $0x160] sm:$0xff] %vm2559_vm8, %v2504_v42  ;;  %2580 = vst.msk [vmem:[#allocation2 + $0xa0] sm:$0xff] %vm2559_vm8, %v2456_v57 }
 0x397   : > { %2653 = vst.msk [vmem:[#allocation2 + $0x160] sm:$0xff] %vm2608_vm9, %v3790_v3  ;;  %2629 = vst.msk [vmem:[#allocation2 + $0xa0] sm:$0xff] %vm2608_vm9, %v3790_v3 }
 0x399   : > { %v1641_v17 = vpop.permute.xlu1 %1640  ;;  %v1593_v8 = vpop.permute.xlu0 %1592 }
 0x39a   : > { %1739 = vst.msk [vmem:[#allocation2 + $0x170] sm:$0xff] %vm1692_vm5, %v1641_v17  ;;  %1715 = vst.msk [vmem:[#allocation2 + $0xb0] sm:$0xff] %vm1692_vm5, %v1593_v8 }
 0x39d   : > { %v2506_v36 = vpop.permute.xlu1 %2505  ;;  %v2458_v62 = vpop.permute.xlu0 %2457 }
 0x39e   : > { %2605 = vst.msk [vmem:[#allocation2 + $0x168] sm:$0xff] %vm2559_vm8, %v2506_v36  ;;  %2581 = vst.msk [vmem:[#allocation2 + $0xa8] sm:$0xff] %vm2559_vm8, %v2458_v62  ;;  %v2677_v12 = vld [vmem:[#allocation2 + $0xa0] sm:$0xff] }
 0x39f   : > { %v2701_v34 = vld [vmem:[#allocation2 + $0x160] sm:$0xff]  ;;  %2654 = vst.msk [vmem:[#allocation2 + $0x168] sm:$0xff] %vm2608_vm9, %v3790_v3  ;;  %2630 = vst.msk [vmem:[#allocation2 + $0xa8] sm:$0xff] %vm2608_vm9, %v3790_v3  ;;  %3611 = vmatprep.mubr.msk.f32.mxu0 %vm2716_vm10, %v2677_v12 }
 0x3a0   : > { %3647 = vmatprep.mubr.msk.f32.mxu1 %vm2716_vm10, %v2701_v34 }
 0x3a1   : > { %v1643_v41 = vpop.permute.xlu1 %1642  ;;  %v1595_v40 = vpop.permute.xlu0 %1594 }
 0x3a2   : > { %1740 = vst.msk [vmem:[#allocation2 + $0x178] sm:$0xff] %vm1692_vm5, %v1643_v41  ;;  %1716 = vst.msk [vmem:[#allocation2 + $0xb8] sm:$0xff] %vm1692_vm5, %v1595_v40 }
 0x3a5   : > { %v1930_v43 = vpop.permute.xlu1 %1929  ;;  %v1882_v15 = vpop.permute.xlu0 %1881 }
 0x3a6   : > { %2028 = vst.msk [vmem:[#allocation2 + $0x170] sm:$0xff] %vm1981_vm6, %v1930_v43  ;;  %2004 = vst.msk [vmem:[#allocation2 + $0xb0] sm:$0xff] %vm1981_vm6, %v1882_v15  ;;  %v2678_v25 = vld [vmem:[#allocation2 + $0xa8] sm:$0xff] }
 0x3a7   : > { %v2702_v47 = vld [vmem:[#allocation2 + $0x168] sm:$0xff]  ;;  %3612 = vmatmul.mubr.msk.f32.gmra.mrb[20].mxu0 %vm2716_vm10, %v2678_v25 }
 0x3a8   : > { %3648 = vmatmul.mubr.msk.f32.gmra.mrb[20].mxu1 %vm2716_vm10, %v2702_v47 }
 0x3a9   : > { %v1932_v23 = vpop.permute.xlu1 %1931  ;;  %v1884_v63 = vpop.permute.xlu0 %1883 }
 0x3aa   : > { %2029 = vst.msk [vmem:[#allocation2 + $0x178] sm:$0xff] %vm1981_vm6, %v1932_v23  ;;  %2005 = vst.msk [vmem:[#allocation2 + $0xb8] sm:$0xff] %vm1981_vm6, %v1884_v63 }
 0x3ab   : > { %v3583_v6 = vpop.f32.mrb[0].mxu0  ;;  %v3619_v10 = vpop.f32.mrb[0].mxu1 }
 0x3ac   : > { %v2933_v60 = vadd.f32 %v3583_v6, %v5545_v29  ;;  %v2927_v4 = vpop.f32.mrb[1].mxu0  ;;  %v3039_v16 = vpop.f32.mrb[1].mxu1 }
 0x3ad   : > { %v2219_v46 = vpop.permute.xlu1 %2218  ;;  %v2171_v32 = vpop.permute.xlu0 %2170  ;;  %v2928_v33 = vadd.f32 %v5545_v29, %v2927_v4  ;;  %v3040_v28 = vadd.f32 %v5545_v29, %v3039_v16 }
 0x3ae   : > { %2317 = vst.msk [vmem:[#allocation2 + $0x170] sm:$0xff] %vm2270_vm7, %v2219_v46  ;;  %2293 = vst.msk [vmem:[#allocation2 + $0xb0] sm:$0xff] %vm2270_vm7, %v2171_v32  ;;  %v3151_v26 = vmax.f32 %v2933_v60, 0.0 }
 0x3af   : > { %v3150_v1 = vmax.f32 %v2928_v33, 0.0  ;;  %v3166_v38 = vmax.f32 %v3040_v28, 0.0  ;;  %v3586_v44 = vpop.f32.mrb[2].mxu0  ;;  %v3622_v58 = vpop.f32.mrb[2].mxu1 }
 0x3b0   : > { %3183 = vst [vmem:[#allocation3 + $0x8] sm:$0xff] %v3151_v26  ;;  %v2942_v9 = vadd.f32 %v3586_v44, %v5545_v29  ;;  %v3054_v35 = vadd.f32 %v3622_v58, %v5545_v29  ;;  %v2937_v50 = vpop.f32.mrb[3].mxu0  ;;  %v3049_v45 = vpop.f32.mrb[3].mxu1 }
 0x3b1   : > { %v2221_v0 = vpop.permute.xlu1 %2220  ;;  %v2173_v49 = vpop.permute.xlu0 %2172  ;;  %3182 = vst [vmem:[#allocation3] sm:$0xff] %v3150_v1  ;;  %3198 = vst [vmem:[#allocation3 + $0x80] sm:$0xff] %v3166_v38 }
 0x3b2   : > { %2318 = vst.msk [vmem:[#allocation2 + $0x178] sm:$0xff] %vm2270_vm7, %v2221_v0  ;;  %2294 = vst.msk [vmem:[#allocation2 + $0xb8] sm:$0xff] %vm2270_vm7, %v2173_v49  ;;  %v3152_v7 = vmax.f32 %v2942_v9, 0.0  ;;  %v3168_v19 = vmax.f32 %v3054_v35, 0.0 }
 0x3b3   : > { %v3589_v24 = vpop.f32.mrb[4].mxu0  ;;  %v3625_v55 = vpop.f32.mrb[4].mxu1 }
 0x3b4   : > { %3184 = vst [vmem:[#allocation3 + $0x10] sm:$0xff] %v3152_v7  ;;  %3200 = vst [vmem:[#allocation3 + $0x90] sm:$0xff] %v3168_v19  ;;  %v2946_v14 = vpop.f32.mrb[5].mxu0  ;;  %v3058_v37 = vpop.f32.mrb[5].mxu1 }
 0x3b5   : > { %v2508_v48 = vpop.permute.xlu1 %2507  ;;  %v2460_v53 = vpop.permute.xlu0 %2459  ;;  %v2947_v21 = vadd.f32 %v5545_v29, %v2946_v14  ;;  %v3059_v20 = vadd.f32 %v5545_v29, %v3058_v37 }
 0x3b6   : > { %2606 = vst.msk [vmem:[#allocation2 + $0x170] sm:$0xff] %vm2559_vm8, %v2508_v48  ;;  %2582 = vst.msk [vmem:[#allocation2 + $0xb0] sm:$0xff] %vm2559_vm8, %v2460_v53 }
 0x3b7   : > { %2655 = vst.msk [vmem:[#allocation2 + $0x170] sm:$0xff] %vm2608_vm9, %v3790_v3  ;;  %2631 = vst.msk [vmem:[#allocation2 + $0xb0] sm:$0xff] %vm2608_vm9, %v3790_v3  ;;  %v3153_v2 = vmax.f32 %v2947_v21, 0.0  ;;  %v3169_v11 = vmax.f32 %v3059_v20, 0.0  ;;  %v3592_v27 = vpop.f32.mrb[6].mxu0  ;;  %v3628_v31 = vpop.f32.mrb[6].mxu1 }
 0x3b8   : > { %v2961_v30 = vadd.f32 %v3592_v27, %v5545_v29  ;;  %v3073_v39 = vadd.f32 %v3628_v31, %v5545_v29  ;;  %v2955_v5 = vpop.f32.mrb[7].mxu0  ;;  %v3067_v22 = vpop.f32.mrb[7].mxu1  ;;  %v3214_v53 = vld [vmem:[#allocation3] ss:$2 sm:$0xff] }
 0x3b9   : > { %v2510_v52 = vpop.permute.xlu1 %2509  ;;  %v2462_v51 = vpop.permute.xlu0 %2461  ;;  %3185 = vst [vmem:[#allocation3 + $0x18] sm:$0xff] %v3153_v2  ;;  %3201 = vst [vmem:[#allocation3 + $0x98] sm:$0xff] %v3169_v11  ;;  %v2956_v57 = vadd.f32 %v5545_v29, %v2955_v5  ;;  %v3068_v17 = vadd.f32 %v5545_v29, %v3067_v22 }
 0x3ba   : > { %2607 = vst.msk [vmem:[#allocation2 + $0x178] sm:$0xff] %vm2559_vm8, %v2510_v52  ;;  %2583 = vst.msk [vmem:[#allocation2 + $0xb8] sm:$0xff] %vm2559_vm8, %v2462_v51  ;;  %v3155_v54 = vmax.f32 %v2961_v30, 0.0  ;;  %v3171_v42 = vmax.f32 %v3073_v39, 0.0  ;;  %v3246_v52 = vld [vmem:[#allocation3 + $0x1] ss:$2 sm:$0xff] }
 0x3bb   : > { %2656 = vst.msk [vmem:[#allocation2 + $0x178] sm:$0xff] %vm2608_vm9, %v3790_v3  ;;  %2632 = vst.msk [vmem:[#allocation2 + $0xb8] sm:$0xff] %vm2608_vm9, %v3790_v3  ;;  %v3045_v3 = vadd.f32 %v3619_v10, %v5545_v29  ;;  %v3154_v62 = vmax.f32 %v2956_v57, 0.0  ;;  %v3170_v43 = vmax.f32 %v3068_v17, 0.0 }
 0x3bc   : > { %3187 = vst [vmem:[#allocation3 + $0x28] sm:$0xff] %v3155_v54  ;;  %3203 = vst [vmem:[#allocation3 + $0xa8] sm:$0xff] %v3171_v42 }
 0x3bd   : > { %v3167_v13 = vmax.f32 %v3045_v3, 0.0  ;;  %3186 = vst [vmem:[#allocation3 + $0x20] sm:$0xff] %v3154_v62  ;;  %3202 = vst [vmem:[#allocation3 + $0xa0] sm:$0xff] %v3170_v43  ;;  %v3277_v3 = vmax.f32 %v3214_v53, %v3246_v52 }
 0x3be   : > { %v2679_v56 = vld [vmem:[#allocation2 + $0xb0] sm:$0xff] }
 0x3bf   : > { %v2703_v61 = vld [vmem:[#allocation2 + $0x170] sm:$0xff]  ;;  %3614 = vmatprep.mubr.msk.f32.mxu0 %vm2716_vm10, %v2679_v56  ;;  %3199 = vst [vmem:[#allocation3 + $0x88] sm:$0xff] %v3167_v13 }
 0x3c0   : > { %3650 = vmatprep.mubr.msk.f32.mxu1 %vm2716_vm10, %v2703_v61  ;;  %v3216_v56 = vld [vmem:[#allocation3 + $0x10] ss:$2 sm:$0xff]  ;;  %v3248_v61 = vld [vmem:[#allocation3 + $0x11] ss:$2 sm:$0xff] }
 0x3c1   : > { %v3264_v6 = vld [vmem:[#allocation3 + $0x91] ss:$2 sm:$0xff]  ;;  %v3278_v4 = vmax.f32 %v3216_v56, %v3248_v61 }
 0x3c2   : > { %v2680_v18 = vld [vmem:[#allocation2 + $0xb8] sm:$0xff] }
 0x3c3   : > { %v2704_v59 = vld [vmem:[#allocation2 + $0x178] sm:$0xff]  ;;  %3615 = vmatmul.mubr.msk.f32.gmra.mrb[22].mxu0 %vm2716_vm10, %v2680_v18  ;;  %v3293_v9 = vmax.f32 %v3277_v3, %v3278_v4 }
 0x3c4   : > { %3651 = vmatmul.mubr.msk.f32.gmra.mrb[22].mxu1 %vm2716_vm10, %v2704_v59  ;;  %v3232_v59 = vld [vmem:[#allocation3 + $0x90] ss:$2 sm:$0xff]  ;;  %v3218_v10 = vld [vmem:[#allocation3 + $0x20] ss:$2 sm:$0xff]  ;;  %v3250_v60 = vld [vmem:[#allocation3 + $0x21] ss:$2 sm:$0xff] }
 0x3c5   : > { %v3234_v16 = vld [vmem:[#allocation3 + $0xa0] ss:$2 sm:$0xff]  ;;  %v3266_v33 = vld [vmem:[#allocation3 + $0xa1] ss:$2 sm:$0xff]  ;;  %v3286_v26 = vmax.f32 %v3232_v59, %v3264_v6  ;;  %v3279_v13 = vmax.f32 %v3218_v10, %v3250_v60 }
 0x3c6   : > { %v3230_v51 = vld [vmem:[#allocation3 + $0x80] ss:$2 sm:$0xff]  ;;  %v3262_v18 = vld [vmem:[#allocation3 + $0x81] ss:$2 sm:$0xff]  ;;  %v3287_v1 = vmax.f32 %v3234_v16, %v3266_v33 }
 0x3c7   : > { %v3285_v28 = vmax.f32 %v3230_v51, %v3262_v18 }
 0x3c9   : > { %v3297_v45 = vmax.f32 %v3285_v28, %v3286_v26 }
 0x3cb   : > { %v3595_v8 = vpop.f32.mrb[8].mxu0 }
 0x3cc   : > { %v2970_v12 = vadd.f32 %v3595_v8, %v5545_v29  ;;  %v2965_v41 = vpop.f32.mrb[9].mxu0 }
 0x3ce   : > { %v3156_v15 = vmax.f32 %v2970_v12, 0.0 }
 0x3d0   : > { %3188 = vst [vmem:[#allocation3 + $0x30] sm:$0xff] %v3156_v15 }
 0x3db   : > { %v3631_v36 = vpop.f32.mrb[8].mxu1 }
 0x3dc   : > { %v3082_v34 = vadd.f32 %v3631_v36, %v5545_v29  ;;  %v3077_v40 = vpop.f32.mrb[9].mxu1 }
 0x3de   : > { %v3172_v25 = vmax.f32 %v3082_v34, 0.0 }
 0x3e0   : > { %3204 = vst [vmem:[#allocation3 + $0xb0] sm:$0xff] %v3172_v25 }
 0x3e7   : > { %v3598_v47 = vpop.f32.mrb[10].mxu0  ;;  %v3634_v23 = vpop.f32.mrb[10].mxu1 }
 0x3e8   : > { %v2974_v63 = vpop.f32.mrb[11].mxu0  ;;  %v3086_v46 = vpop.f32.mrb[11].mxu1 }
 0x3e9   : > { %v2975_v32 = vadd.f32 %v5545_v29, %v2974_v63  ;;  %v3087_v0 = vadd.f32 %v5545_v29, %v3086_v46 }
 0x3eb   : > { %v3157_v49 = vmax.f32 %v2975_v32, 0.0  ;;  %v3173_v48 = vmax.f32 %v3087_v0, 0.0 }
 0x3ed   : > { %3189 = vst [vmem:[#allocation3 + $0x38] sm:$0xff] %v3157_v49  ;;  %3205 = vst [vmem:[#allocation3 + $0xb8] sm:$0xff] %v3173_v48 }
 0x3f4   : > { %v3220_v38 = vld [vmem:[#allocation3 + $0x30] ss:$2 sm:$0xff]  ;;  %v3252_v44 = vld [vmem:[#allocation3 + $0x31] ss:$2 sm:$0xff] }
 0x3f5   : > { %v3236_v58 = vld [vmem:[#allocation3 + $0xb0] ss:$2 sm:$0xff]  ;;  %v3280_v35 = vmax.f32 %v3220_v38, %v3252_v44  ;;  %v3268_v50 = vld [vmem:[#allocation3 + $0xb1] ss:$2 sm:$0xff] }
 0x3f6   : > { %v3288_v7 = vmax.f32 %v3236_v58, %v3268_v50 }
 0x3f7   : > { %v3294_v19 = vmax.f32 %v3279_v13, %v3280_v35 }
 0x3f8   : > { %v3298_v24 = vmax.f32 %v3287_v1, %v3288_v7 }
 0x3f9   : > { %v3501_v55 = vpack.c.bf16 %v3294_v19, %v3293_v9 }
 0x3fa   : > { %v3511_v14 = vpack.c.bf16 %v3298_v24, %v3297_v45 }
 0x3fb   : > { %3502 = vst [vmem:[%s5567_s6] sm:$0xff] %v3501_v55  }
 0x3fc   : > { %3519 = vst [vmem:[%s5567_s6 + $0x10] sm:$0xff] %v3511_v14  }
 0x403   : > { %v3601_v37 = vpop.f32.mrb[12].mxu0  ;;  %v3637_v21 = vpop.f32.mrb[12].mxu1 }
 0x404   : > { %v2989_v20 = vadd.f32 %v3601_v37, %v5545_v29  ;;  %v3101_v2 = vadd.f32 %v3637_v21, %v5545_v29  ;;  %v2983_v11 = vpop.f32.mrb[13].mxu0  ;;  %v3095_v27 = vpop.f32.mrb[13].mxu1 }
 0x405   : > { %v2984_v31 = vadd.f32 %v5545_v29, %v2983_v11  ;;  %v3096_v30 = vadd.f32 %v5545_v29, %v3095_v27 }
 0x406   : > { %v3159_v39 = vmax.f32 %v2989_v20, 0.0  ;;  %v3175_v5 = vmax.f32 %v3101_v2, 0.0 }
 0x407   : > { %v3158_v22 = vmax.f32 %v2984_v31, 0.0  ;;  %v3174_v54 = vmax.f32 %v3096_v30, 0.0 }
 0x408   : > { %3191 = vst [vmem:[#allocation3 + $0x48] sm:$0xff] %v3159_v39  ;;  %3207 = vst [vmem:[#allocation3 + $0xc8] sm:$0xff] %v3175_v5 }
 0x409   : > { %3190 = vst [vmem:[#allocation3 + $0x40] sm:$0xff] %v3158_v22  ;;  %3206 = vst [vmem:[#allocation3 + $0xc0] sm:$0xff] %v3174_v54 }
 0x410   : > { %v3222_v50 = vld [vmem:[#allocation3 + $0x40] ss:$2 sm:$0xff]  ;;  %v3254_v45 = vld [vmem:[#allocation3 + $0x41] ss:$2 sm:$0xff] }
 0x411   : > { %v3238_v7 = vld [vmem:[#allocation3 + $0xc0] ss:$2 sm:$0xff]  ;;  %v3270_v55 = vld [vmem:[#allocation3 + $0xc1] ss:$2 sm:$0xff]  ;;  %v3281_v2 = vmax.f32 %v3222_v50, %v3254_v45 }
 0x412   : > { %v3289_v30 = vmax.f32 %v3238_v7, %v3270_v55 }
 0x41e   : > { %v3604_v42 = vpop.f32.mrb[14].mxu0 }
 0x41f   : > { %v3640_v57 = vpop.f32.mrb[14].mxu1  ;;  %v2998_v17 = vadd.f32 %v3604_v42, %v5545_v29  ;;  %v2993_v36 = vpop.f32.mrb[15].mxu0 }
 0x420   : > { %v3110_v8 = vadd.f32 %v3640_v57, %v5545_v29  ;;  %v3105_v62 = vpop.f32.mrb[15].mxu1 }
 0x421   : > { %v3160_v12 = vmax.f32 %v2998_v17, 0.0 }
 0x422   : > { %v3176_v34 = vmax.f32 %v3110_v8, 0.0 }
 0x423   : > { %3192 = vst [vmem:[#allocation3 + $0x50] sm:$0xff] %v3160_v12 }
 0x424   : > { %3208 = vst [vmem:[#allocation3 + $0xd0] sm:$0xff] %v3176_v34 }
 0x43a   : > { %v3607_v41 = vpop.f32.mrb[16].mxu0 }
 0x43b   : > { %v3643_v40 = vpop.f32.mrb[16].mxu1  ;;  %v3002_v43 = vpop.f32.mrb[17].mxu0 }
 0x43c   : > { %v3114_v15 = vpop.f32.mrb[17].mxu1  ;;  %v3003_v25 = vadd.f32 %v5545_v29, %v3002_v43 }
 0x43d   : > { %v3115_v47 = vadd.f32 %v5545_v29, %v3114_v15 }
 0x43e   : > { %v3161_v23 = vmax.f32 %v3003_v25, 0.0 }
 0x43f   : > { %v3177_v63 = vmax.f32 %v3115_v47, 0.0 }
 0x440   : > { %3193 = vst [vmem:[#allocation3 + $0x58] sm:$0xff] %v3161_v23 }
 0x441   : > { %3209 = vst [vmem:[#allocation3 + $0xd8] sm:$0xff] %v3177_v63 }
 0x447   : > { %v3224_v19 = vld [vmem:[#allocation3 + $0x50] ss:$2 sm:$0xff]  ;;  %v3256_v24 = vld [vmem:[#allocation3 + $0x51] ss:$2 sm:$0xff] }
 0x448   : > { %v3240_v14 = vld [vmem:[#allocation3 + $0xd0] ss:$2 sm:$0xff]  ;;  %v3272_v37 = vld [vmem:[#allocation3 + $0xd1] ss:$2 sm:$0xff]  ;;  %v3282_v11 = vmax.f32 %v3224_v19, %v3256_v24 }
 0x44a   : > { %v3295_v36 = vmax.f32 %v3281_v2, %v3282_v11 }
 0x45a   : > { %v3610_v46 = vpop.f32.mrb[18].mxu0 }
 0x45b   : > { %v3646_v32 = vpop.f32.mrb[18].mxu1  ;;  %v3017_v0 = vadd.f32 %v3610_v46, %v5545_v29  ;;  %v3011_v48 = vpop.f32.mrb[19].mxu0 }
 0x45c   : > { %v3129_v49 = vadd.f32 %v3646_v32, %v5545_v29  ;;  %v3123_v53 = vpop.f32.mrb[19].mxu1  ;;  %v3012_v52 = vadd.f32 %v5545_v29, %v3011_v48 }
 0x45d   : > { %v3124_v51 = vadd.f32 %v5545_v29, %v3123_v53  ;;  %v3163_v56 = vmax.f32 %v3017_v0, 0.0 }
 0x45e   : > { %v3179_v61 = vmax.f32 %v3129_v49, 0.0  ;;  %v3162_v18 = vmax.f32 %v3012_v52, 0.0 }
 0x45f   : > { %v3178_v59 = vmax.f32 %v3124_v51, 0.0  ;;  %3195 = vst [vmem:[#allocation3 + $0x68] sm:$0xff] %v3163_v56 }
 0x460   : > { %3211 = vst [vmem:[#allocation3 + $0xe8] sm:$0xff] %v3179_v61  ;;  %3194 = vst [vmem:[#allocation3 + $0x60] sm:$0xff] %v3162_v18 }
 0x461   : > { %3210 = vst [vmem:[#allocation3 + $0xe0] sm:$0xff] %v3178_v59 }
 0x467   : > { %v3226_v21 = vld [vmem:[#allocation3 + $0x60] ss:$2 sm:$0xff]  ;;  %v3258_v20 = vld [vmem:[#allocation3 + $0x61] ss:$2 sm:$0xff] }
 0x468   : > { %v3242_v27 = vld [vmem:[#allocation3 + $0xe0] ss:$2 sm:$0xff]  ;;  %v3274_v31 = vld [vmem:[#allocation3 + $0xe1] ss:$2 sm:$0xff]  ;;  %v3283_v54 = vmax.f32 %v3226_v21, %v3258_v20 }
 0x469   : > { %v3291_v17 = vmax.f32 %v3242_v27, %v3274_v31 }
 0x47a   : > { %v3613_v6 = vpop.f32.mrb[20].mxu0 }
 0x47b   : > { %v3649_v10 = vpop.f32.mrb[20].mxu1  ;;  %v3026_v60 = vadd.f32 %v3613_v6, %v5545_v29  ;;  %v3021_v4 = vpop.f32.mrb[21].mxu0 }
 0x47c   : > { %v3138_v3 = vadd.f32 %v3649_v10, %v5545_v29  ;;  %v3133_v16 = vpop.f32.mrb[21].mxu1 }
 0x47d   : > { %v3164_v33 = vmax.f32 %v3026_v60, 0.0 }
 0x47e   : > { %v3180_v28 = vmax.f32 %v3138_v3, 0.0 }
 0x47f   : > { %3196 = vst [vmem:[#allocation3 + $0x70] sm:$0xff] %v3164_v33 }
 0x480   : > { %3212 = vst [vmem:[#allocation3 + $0xf0] sm:$0xff] %v3180_v28 }
 0x496   : > { %v3616_v26 = vpop.f32.mrb[22].mxu0 }
 0x497   : > { %v3652_v13 = vpop.f32.mrb[22].mxu1  ;;  %v3030_v1 = vpop.f32.mrb[23].mxu0 }
 0x498   : > { %v3142_v38 = vpop.f32.mrb[23].mxu1  ;;  %v3031_v44 = vadd.f32 %v5545_v29, %v3030_v1 }
 0x499   : > { %v3143_v58 = vadd.f32 %v5545_v29, %v3142_v38  ;;  %v3290_v29 = vmax.f32 %v3240_v14, %v3272_v37 }
 0x49a   : > { %v3165_v9 = vmax.f32 %v3031_v44, 0.0 }
 0x49b   : > { %v3181_v35 = vmax.f32 %v3143_v58, 0.0  ;;  %v3299_v12 = vmax.f32 %v3289_v30, %v3290_v29 }
 0x49c   : > { %3197 = vst [vmem:[#allocation3 + $0x78] sm:$0xff] %v3165_v9 }
 0x49d   : > { %3213 = vst [vmem:[#allocation3 + $0xf8] sm:$0xff] %v3181_v35 }
 0x4a3   : > { %v3228_v39 = vld [vmem:[#allocation3 + $0x70] ss:$2 sm:$0xff]  ;;  %v3260_v5 = vld [vmem:[#allocation3 + $0x71] ss:$2 sm:$0xff] }
 0x4a4   : > { %v3244_v22 = vld [vmem:[#allocation3 + $0xf0] ss:$2 sm:$0xff]  ;;  %v3284_v42 = vmax.f32 %v3228_v39, %v3260_v5  ;;  %v3276_v57 = vld [vmem:[#allocation3 + $0xf1] ss:$2 sm:$0xff] }
 0x4a5   : > { %v3292_v8 = vmax.f32 %v3244_v22, %v3276_v57 }
 0x4a6   : > { %v3296_v62 = vmax.f32 %v3283_v54, %v3284_v42 }
 0x4a7   : > { %v3300_v34 = vmax.f32 %v3291_v17, %v3292_v8 }
 0x4a8   : > { %v3506_v41 = vpack.c.bf16 %v3296_v62, %v3295_v36 }
 0x4a9   : > { %v3516_v40 = vpack.c.bf16 %v3300_v34, %v3299_v12 }
 0x4aa   : > { %3518 = vst [vmem:[%s5567_s6 + $0x8] sm:$0xff] %v3506_v41  }
 0x4ab   : > { %3520 = vst [vmem:[%s5567_s6 + $0x18] sm:$0xff] %v3516_v40  }
 0x4ac PF: > { %s15_s12 = sadd.s32 1, %s3776_s12  }
 0x4ad   : > { %p12_p5 = scmp.ge.s32.totalorder %s15_s12, 4  }
 0x4af   :  { %14 = sbr.rel (!%p12_p5) target bundleno = 2 (0x2), region = 102 }
 0x4b6   :  { %3362 = vsyncpa [#allocation5], 1 }
 0x4b7   :  { %3364 = vsyncpa [#allocation5 + $0x1], 1 }
 0x4b8   :  { %3365 = vsyncpa [#allocation7], 1 }

// kernel: model_wrapper_forward.3
= control target key start
LH: loop header
LB: loop body
LE: loop exit
PB: predicated region body
PF: predicated region fallthrough
CT: control target
= control target key end

     0   :  { %8 = vsyncpa [#allocation4], 0  ;;  %s7780_s0 = inlined_call_operand.vmem [shape: bf16[8,8192], index: 0, kind: input, shape index: {}]   ;;  %s7781_s1 = inlined_call_operand.hbm [shape: bf16[8192,128], index: 1, kind: input, shape index: {}]   ;;  %s7782_s2 = inlined_call_operand.hbm [shape: f32[1,128], index: 2, kind: input, shape index: {}]   ;;  %s7783_s3 = inlined_call_operand.vmem [shape: f32[8,128], index: 3, kind: output, shape index: {}]  }
   0x1   :  { %9 = vsyncpa [#allocation6], 0  ;;  %s7609_s12 = smov [#allocation3]   ;;  %s7561_s16 = scalar_lea.hbm %s7781_s1, 65536 }
   0x2   :  { %s17_s13 = sshll.u32 %s7609_s12, 4  ;;  %p7562_p0 = scmp.ne.s32.totalorder %s7781_s1, %s7561_s16  ;;  %s18_s13 = int_to_ptr.vmem [resolvable:$true] %s17_s13 }
   0x3   :  { %p7565_p1 = scmp.lt.u32.totalorder %s7561_s16, %s7781_s1 }
   0x5   :  { %p7567_p2 = pnand %p7565_p1, %p7562_p0 }
   0x7   :  { %7570 = shalt.err (!%p7567_p2)
}
   0x8   :  { %s7571_s21 = scalar_lea.vmem %s18_s13, 65536  ;;  %p7576_p4 = scmp.lt.s32.totalorder %s18_s13, %s18_s13 }
   0x9   :  { %p7572_p3 = scmp.ne.s32.totalorder %s18_s13, %s7571_s21  ;;  %p7577_p5 = scmp.lt.s32.totalorder %s7571_s21, %s7571_s21 }
   0xb   :  { %p7578_p6 = por %p7577_p5, %p7576_p4 }
   0xd   :  { %p7579_p7 = pnand %p7578_p6, %p7572_p3 }
   0xf   :  { %7582 = shalt.err (!%p7579_p7)
}
  0x10   :  { %s7610_s22 = smov 64   ;;  %s7611_s23 = smov 4  }
  0x11   :  { %23 = dma.hbm_to_vmem [thread:$0]  %s7781_s1, 65536, %s18_s13, [#allocation4], %s7610_s22, %s7610_s22, %s7611_s23  }
  0x12   :  { %s7612_s26 = smov [#allocation5]   ;;  %s7583_s30 = scalar_lea.hbm %s7782_s2, 16 }
  0x13   :  { %s30_s27 = sshll.u32 %s7612_s26, 4  ;;  %p7584_p8 = scmp.ne.s32.totalorder %s7782_s2, %s7583_s30  ;;  %s31_s27 = int_to_ptr.vmem [resolvable:$true] %s30_s27 }
  0x14   :  { %p7587_p9 = scmp.lt.u32.totalorder %s7583_s30, %s7782_s2 }
  0x16   :  { %p7589_p10 = pnand %p7587_p9, %p7584_p8 }
  0x18   :  { %7592 = shalt.err (!%p7589_p10)
}
  0x19   :  { %s7593_s8 = scalar_lea.vmem %s31_s27, 16  ;;  %s7597_s1 = scalar_lea.vmem %s31_s27, 32 }
  0x1a   :  { %p7594_p11 = scmp.ne.s32.totalorder %s31_s27, %s7593_s8  ;;  %p7598_p12 = scmp.lt.s32.totalorder %s31_s27, %s31_s27 }
  0x1b   :  { %p7599_p13 = scmp.lt.s32.totalorder %s7597_s1, %s7593_s8 }
  0x1d   :  { %p7600_p0 = por %p7599_p13, %p7598_p12 }
  0x1f   :  { %p7601_p1 = pnand %p7600_p0, %p7594_p11 }
  0x21   :  { %7604 = shalt.err (!%p7601_p1)
}
  0x22   :  { %33 = dma.hbm_to_vmem [thread:$0]  %s7782_s2, 16, %s31_s27, [#allocation6]  }
  0x23   :  { %7605 = dma.done.wait [#allocation4], 65536  }
  0x24   :  { %7606 = vsyncadd [#allocation4], 4294901760 }
  0x25   :  { %7607 = dma.done.wait [#allocation6], 16  }
  0x26   :  { %7608 = vsyncadd [#allocation6], 4294967280  ;;  %v6985_v0 = vld [vmem:[#allocation3 + $0x40] sm:$0xff]   ;;  %v6989_v4 = vld [vmem:[#allocation3 + $0x48] sm:$0xff]  }
  0x27   :  { %v6986_v1 = vld [vmem:[#allocation3 + $0xc0] sm:$0xff]   ;;  %6277 = vmatprep.subr.bf16.mxu0 %v6985_v0  ;;  %v6990_v5 = vld [vmem:[#allocation3 + $0xc8] sm:$0xff]   ;;  %v6993_v8 = vld [vmem:[#allocation3 + $0x50] sm:$0xff]  }
  0x28   :  { %v6987_v2 = vld [vmem:[#allocation3] sm:$0xff]   ;;  %6299 = vmatprep.subr.bf16.mxu1 %v6986_v1  ;;  %v6991_v6 = vld [vmem:[#allocation3 + $0x8] sm:$0xff]   ;;  %v6994_v9 = vld [vmem:[#allocation3 + $0xd0] sm:$0xff]  }
  0x29   :  { %v6988_v3 = vld [vmem:[#allocation3 + $0x80] sm:$0xff]   ;;  %6278 = vmatpush3.bf16.msra.mxu0 %v6987_v2  ;;  %v6992_v7 = vld [vmem:[#allocation3 + $0x88] sm:$0xff]   ;;  %v6995_v10 = vld [vmem:[#allocation3 + $0x10] sm:$0xff]  }
  0x2a   :  { %6300 = vmatpush3.bf16.msra.mxu1 %v6988_v3  ;;  %6279 = vmatprep.subr.bf16.mxu0 %v6989_v4  ;;  %v6996_v11 = vld [vmem:[#allocation3 + $0x90] sm:$0xff]   ;;  %v6997_v12 = vld [vmem:[#allocation3 + $0x58] sm:$0xff]   ;;  %v7001_v16 = vld [vmem:[#allocation3 + $0x60] sm:$0xff]  }
  0x2b   :  { %6301 = vmatprep.subr.bf16.mxu1 %v6990_v5  ;;  %v6998_v13 = vld [vmem:[#allocation3 + $0xd8] sm:$0xff]   ;;  %v7002_v17 = vld [vmem:[#allocation3 + $0xe0] sm:$0xff]   ;;  %v7005_v20 = vld [vmem:[#allocation3 + $0x68] sm:$0xff]  }
  0x2c   :  { %v6999_v14 = vld [vmem:[#allocation3 + $0x18] sm:$0xff]   ;;  %v7003_v18 = vld [vmem:[#allocation3 + $0x20] sm:$0xff]   ;;  %v7006_v21 = vld [vmem:[#allocation3 + $0xe8] sm:$0xff]  }
  0x2d   :  { %6280 = vmatpush3.bf16.msra.mxu0 %v6991_v6  ;;  %v7000_v15 = vld [vmem:[#allocation3 + $0x98] sm:$0xff]   ;;  %v7004_v19 = vld [vmem:[#allocation3 + $0xa0] sm:$0xff]   ;;  %v7007_v22 = vld [vmem:[#allocation3 + $0x28] sm:$0xff]  }
  0x2e   :  { %6302 = vmatpush3.bf16.msra.mxu1 %v6992_v7  ;;  %6281 = vmatprep.subr.bf16.mxu0 %v6993_v8  ;;  %v7008_v23 = vld [vmem:[#allocation3 + $0xa8] sm:$0xff]   ;;  %v7009_v24 = vld [vmem:[#allocation3 + $0x70] sm:$0xff]   ;;  %v7013_v28 = vld [vmem:[#allocation3 + $0x78] sm:$0xff]  }
  0x2f   :  { %6303 = vmatprep.subr.bf16.mxu1 %v6994_v9  ;;  %v7010_v25 = vld [vmem:[#allocation3 + $0xf0] sm:$0xff]   ;;  %v7014_v29 = vld [vmem:[#allocation3 + $0xf8] sm:$0xff]   ;;  %v47_v32 = vld [vmem:[%s7780_s0] sm:$0xff] }
  0x30   :  { %v7011_v26 = vld [vmem:[#allocation3 + $0x30] sm:$0xff]   ;;  %v7015_v30 = vld [vmem:[#allocation3 + $0x38] sm:$0xff]   ;;  %v48_v33 = vld [vmem:[%s7780_s0 + $0x8] sm:$0xff]  ;;  %v5700_v34 = vcombine.low %v47_v32, %v47_v32  ;;  %v5701_v35 = vcombine.high %v47_v32, %v47_v32 }
  0x31   :  { %6282 = vmatpush3.bf16.msra.mxu0 %v6995_v10  ;;  %v7012_v27 = vld [vmem:[#allocation3 + $0xb0] sm:$0xff]   ;;  %v7016_v31 = vld [vmem:[#allocation3 + $0xb8] sm:$0xff]   ;;  %v5702_v36 = vcombine.low %v48_v33, %v48_v33  ;;  %v5703_v37 = vcombine.high %v48_v33, %v48_v33  ;;  %v7021_v38 = vld [vmem:[#allocation3 + $0x140] sm:$0xff]  }
  0x32   :  { %6304 = vmatpush3.bf16.msra.mxu1 %v6996_v11  ;;  %6283 = vmatprep.subr.bf16.mxu0 %v6997_v12  ;;  %v7022_v39 = vld [vmem:[#allocation3 + $0x1c0] sm:$0xff]   ;;  %v7025_v42 = vld [vmem:[#allocation3 + $0x148] sm:$0xff]   ;;  %v7029_v46 = vld [vmem:[#allocation3 + $0x150] sm:$0xff]  }
  0x33   :  { %6305 = vmatprep.subr.bf16.mxu1 %v6998_v13  ;;  %4431 = vmatprep.mubr.bf16.mxu0 %v5701_v35  ;;  %v7023_v40 = vld [vmem:[#allocation3 + $0x100] sm:$0xff]   ;;  %v7026_v43 = vld [vmem:[#allocation3 + $0x1c8] sm:$0xff]   ;;  %v7030_v47 = vld [vmem:[#allocation3 + $0x1d0] sm:$0xff]  }
  0x34   :  { %4471 = vmatprep.mubr.bf16.mxu1 %v5703_v37  ;;  %v7024_v41 = vld [vmem:[#allocation3 + $0x180] sm:$0xff]   ;;  %v7027_v44 = vld [vmem:[#allocation3 + $0x108] sm:$0xff]   ;;  %v7031_v48 = vld [vmem:[#allocation3 + $0x110] sm:$0xff]  }
  0x35   :  { %6284 = vmatpush3.bf16.msra.mxu0 %v6999_v14  ;;  %v7028_v45 = vld [vmem:[#allocation3 + $0x188] sm:$0xff]   ;;  %v7032_v49 = vld [vmem:[#allocation3 + $0x190] sm:$0xff]   ;;  %v7033_v50 = vld [vmem:[#allocation3 + $0x158] sm:$0xff]  }
  0x36   :  { %6306 = vmatpush3.bf16.msra.mxu1 %v7000_v15  ;;  %6285 = vmatprep.subr.bf16.mxu0 %v7001_v16  ;;  %v7034_v51 = vld [vmem:[#allocation3 + $0x1d8] sm:$0xff]   ;;  %v7037_v54 = vld [vmem:[#allocation3 + $0x160] sm:$0xff]   ;;  %v7041_v58 = vld [vmem:[#allocation3 + $0x168] sm:$0xff]  }
  0x37   :  { %6307 = vmatprep.subr.bf16.mxu1 %v7002_v17  ;;  %v7035_v52 = vld [vmem:[#allocation3 + $0x118] sm:$0xff]   ;;  %v7038_v55 = vld [vmem:[#allocation3 + $0x1e0] sm:$0xff]   ;;  %v7042_v59 = vld [vmem:[#allocation3 + $0x1e8] sm:$0xff]  }
  0x38   :  { %v7036_v53 = vld [vmem:[#allocation3 + $0x198] sm:$0xff]   ;;  %v7039_v56 = vld [vmem:[#allocation3 + $0x120] sm:$0xff]   ;;  %v7043_v60 = vld [vmem:[#allocation3 + $0x128] sm:$0xff]  }
  0x39   :  { %6286 = vmatpush3.bf16.msra.mxu0 %v7003_v18  ;;  %v7040_v57 = vld [vmem:[#allocation3 + $0x1a0] sm:$0xff]   ;;  %v7044_v61 = vld [vmem:[#allocation3 + $0x1a8] sm:$0xff]   ;;  %v7045_v62 = vld [vmem:[#allocation3 + $0x170] sm:$0xff]  }
  0x3a   :  { %6308 = vmatpush3.bf16.msra.mxu1 %v7004_v19  ;;  %6287 = vmatprep.subr.bf16.mxu0 %v7005_v20  ;;  %v7046_v63 = vld [vmem:[#allocation3 + $0x1f0] sm:$0xff]   ;;  %v7049_v2 = vld [vmem:[#allocation3 + $0x178] sm:$0xff]   ;;  %v7057_v12 = vld [vmem:[#allocation3 + $0x240] sm:$0xff]  }
  0x3b   :  { %6309 = vmatprep.subr.bf16.mxu1 %v7006_v21  ;;  %v7047_v0 = vld [vmem:[#allocation3 + $0x130] sm:$0xff]   ;;  %v7050_v3 = vld [vmem:[#allocation3 + $0x1f8] sm:$0xff]   ;;  %v7058_v13 = vld [vmem:[#allocation3 + $0x2c0] sm:$0xff]  }
  0x3c   :  { %v7048_v1 = vld [vmem:[#allocation3 + $0x1b0] sm:$0xff]   ;;  %v7051_v4 = vld [vmem:[#allocation3 + $0x138] sm:$0xff]   ;;  %v7059_v14 = vld [vmem:[#allocation3 + $0x200] sm:$0xff]  }
  0x3d   :  { %6288 = vmatpush3.bf16.msra.mxu0 %v7007_v22  ;;  %v7052_v5 = vld [vmem:[#allocation3 + $0x1b8] sm:$0xff]   ;;  %v49_v6 = vld [vmem:[%s7780_s0 + $0x10] sm:$0xff]  ;;  %v7060_v15 = vld [vmem:[#allocation3 + $0x280] sm:$0xff]  }
  0x3e   :  { %6310 = vmatpush3.bf16.msra.mxu1 %v7008_v23  ;;  %6289 = vmatprep.subr.bf16.mxu0 %v7009_v24  ;;  %v5704_v7 = vcombine.low %v49_v6, %v49_v6  ;;  %v5705_v8 = vcombine.high %v49_v6, %v49_v6  ;;  %v50_v9 = vld [vmem:[%s7780_s0 + $0x18] sm:$0xff]  ;;  %v7061_v16 = vld [vmem:[#allocation3 + $0x248] sm:$0xff]   ;;  %v7065_v20 = vld [vmem:[#allocation3 + $0x250] sm:$0xff]  }
  0x3f   :  { %6311 = vmatprep.subr.bf16.mxu1 %v7010_v25  ;;  %v5706_v10 = vcombine.low %v50_v9, %v50_v9  ;;  %v5707_v11 = vcombine.high %v50_v9, %v50_v9  ;;  %v7062_v17 = vld [vmem:[#allocation3 + $0x2c8] sm:$0xff]   ;;  %v7066_v21 = vld [vmem:[#allocation3 + $0x2d0] sm:$0xff]   ;;  %v7069_v24 = vld [vmem:[#allocation3 + $0x258] sm:$0xff]  }
  0x40   :  { %v7063_v18 = vld [vmem:[#allocation3 + $0x208] sm:$0xff]   ;;  %v7067_v22 = vld [vmem:[#allocation3 + $0x210] sm:$0xff]   ;;  %v7070_v25 = vld [vmem:[#allocation3 + $0x2d8] sm:$0xff]  }
  0x41   :  { %6290 = vmatpush3.bf16.msra.mxu0 %v7011_v26  ;;  %v7064_v19 = vld [vmem:[#allocation3 + $0x288] sm:$0xff]   ;;  %v7068_v23 = vld [vmem:[#allocation3 + $0x290] sm:$0xff]   ;;  %v7071_v26 = vld [vmem:[#allocation3 + $0x218] sm:$0xff]  }
  0x42   :  { %6312 = vmatpush3.bf16.msra.mxu1 %v7012_v27  ;;  %6291 = vmatprep.subr.bf16.mxu0 %v7013_v28  ;;  %v7072_v27 = vld [vmem:[#allocation3 + $0x298] sm:$0xff]   ;;  %v7073_v28 = vld [vmem:[#allocation3 + $0x260] sm:$0xff]   ;;  %v7077_v32 = vld [vmem:[#allocation3 + $0x268] sm:$0xff]  }
  0x43   :  { %6313 = vmatprep.subr.bf16.mxu1 %v7014_v29  ;;  %v7074_v29 = vld [vmem:[#allocation3 + $0x2e0] sm:$0xff]   ;;  %v7078_v33 = vld [vmem:[#allocation3 + $0x2e8] sm:$0xff]   ;;  %v7082_v37 = vld [vmem:[#allocation3 + $0x2f0] sm:$0xff]  }
  0x44   :  { %v7080_v35 = vld [vmem:[#allocation3 + $0x2a8] sm:$0xff]  }
  0x45   :  { %6292 = vmatpush3.bf16.msra.mxu0 %v7015_v30  ;;  %v7075_v30 = vld [vmem:[#allocation3 + $0x220] sm:$0xff]   ;;  %v7113_v6 = vld [vmem:[#allocation3 + $0x368] sm:$0xff]  }
  0x46   :  { %6314 = vmatpush3.bf16.msra.mxu1 %v7016_v31  ;;  %6321 = vmatprep.subr.bf16.mxu0 %v7021_v38  ;;  %v7076_v31 = vld [vmem:[#allocation3 + $0x2a0] sm:$0xff]   ;;  %v7083_v38 = vld [vmem:[#allocation3 + $0x230] sm:$0xff]   ;;  %v7116_v9 = vld [vmem:[#allocation3 + $0x3a8] sm:$0xff]  }
  0x47   :  { %6343 = vmatprep.subr.bf16.mxu1 %v7022_v39  ;;  %v7084_v39 = vld [vmem:[#allocation3 + $0x2b0] sm:$0xff]  }
  0x48   :  { %4432 = vmatmul.mubr.bf16.vlgmr.msra.gmra.mrb[0].mxu0 %v5700_v34  ;;  %v7079_v34 = vld [vmem:[#allocation3 + $0x228] sm:$0xff]  }
  0x49   :  { %4472 = vmatmul.mubr.bf16.vlgmr.msra.gmra.mrb[0].mxu1 %v5702_v36  ;;  %6322 = vmatpush3.bf16.msra.mxu0 %v7023_v40  ;;  %v7081_v36 = vld [vmem:[#allocation3 + $0x270] sm:$0xff]   ;;  %v7085_v40 = vld [vmem:[#allocation3 + $0x278] sm:$0xff]  }
  0x4a   :  { %6344 = vmatpush3.bf16.msra.mxu1 %v7024_v41  ;;  %6323 = vmatprep.subr.bf16.mxu0 %v7025_v42  ;;  %v7086_v41 = vld [vmem:[#allocation3 + $0x2f8] sm:$0xff]  }
  0x4b   :  { %6345 = vmatprep.subr.bf16.mxu1 %v7026_v43  ;;  %4511 = vmatprep.mubr.bf16.mxu0 %v5705_v8  ;;  %v7087_v42 = vld [vmem:[#allocation3 + $0x238] sm:$0xff]   ;;  %v7115_v8 = vld [vmem:[#allocation3 + $0x328] sm:$0xff]  }
  0x4c   :  { %4551 = vmatprep.mubr.bf16.mxu1 %v5707_v11  ;;  %v7088_v43 = vld [vmem:[#allocation3 + $0x2b8] sm:$0xff]   ;;  %v7118_v11 = vld [vmem:[#allocation3 + $0x3f0] sm:$0xff]  }
  0x4d   :  { %6324 = vmatpush3.bf16.msra.mxu0 %v7027_v44  ;;  %v51_v44 = vld [vmem:[%s7780_s0 + $0x20] sm:$0xff] }
  0x4e   :  { %6346 = vmatpush3.bf16.msra.mxu1 %v7028_v45  ;;  %6325 = vmatprep.subr.bf16.mxu0 %v7029_v46  ;;  %v52_v45 = vld [vmem:[%s7780_s0 + $0x28] sm:$0xff]  ;;  %v5708_v46 = vcombine.low %v51_v44, %v51_v44 }
  0x4f   :  { %6347 = vmatprep.subr.bf16.mxu1 %v7030_v47  ;;  %v5709_v47 = vcombine.high %v51_v44, %v51_v44  ;;  %v7149_v44 = vld [vmem:[#allocation3 + $0x468] sm:$0xff]  }
  0x51   :  { %6326 = vmatpush3.bf16.msra.mxu0 %v7031_v48  ;;  %v5710_v48 = vcombine.low %v52_v45, %v52_v45 }
  0x52   :  { %6348 = vmatpush3.bf16.msra.mxu1 %v7032_v49  ;;  %6327 = vmatprep.subr.bf16.mxu0 %v7033_v50  ;;  %v5711_v49 = vcombine.high %v52_v45, %v52_v45  ;;  %v7093_v50 = vld [vmem:[#allocation3 + $0x340] sm:$0xff]   ;;  %v7150_v45 = vld [vmem:[#allocation3 + $0x4e8] sm:$0xff]  }
  0x53   :  { %6349 = vmatprep.subr.bf16.mxu1 %v7034_v51  ;;  %v7094_v51 = vld [vmem:[#allocation3 + $0x3c0] sm:$0xff]  }
  0x55   :  { %6328 = vmatpush3.bf16.msra.mxu0 %v7035_v52  ;;  %v7095_v52 = vld [vmem:[#allocation3 + $0x300] sm:$0xff]  }
  0x56   :  { %6350 = vmatpush3.bf16.msra.mxu1 %v7036_v53  ;;  %6329 = vmatprep.subr.bf16.mxu0 %v7037_v54  ;;  %v7096_v53 = vld [vmem:[#allocation3 + $0x380] sm:$0xff]   ;;  %v7097_v54 = vld [vmem:[#allocation3 + $0x348] sm:$0xff]  }
  0x57   :  { %6351 = vmatprep.subr.bf16.mxu1 %v7038_v55  ;;  %v7098_v55 = vld [vmem:[#allocation3 + $0x3c8] sm:$0xff]  }
  0x59   :  { %6330 = vmatpush3.bf16.msra.mxu0 %v7039_v56  ;;  %v7099_v56 = vld [vmem:[#allocation3 + $0x308] sm:$0xff]  }
  0x5a   :  { %6352 = vmatpush3.bf16.msra.mxu1 %v7040_v57  ;;  %6331 = vmatprep.subr.bf16.mxu0 %v7041_v58  ;;  %v7100_v57 = vld [vmem:[#allocation3 + $0x388] sm:$0xff]   ;;  %v7101_v58 = vld [vmem:[#allocation3 + $0x350] sm:$0xff]  }
  0x5b   :  { %6353 = vmatprep.subr.bf16.mxu1 %v7042_v59  ;;  %v7102_v59 = vld [vmem:[#allocation3 + $0x3d0] sm:$0xff]  }
  0x5d   :  { %6332 = vmatpush3.bf16.msra.mxu0 %v7043_v60  ;;  %v7103_v60 = vld [vmem:[#allocation3 + $0x310] sm:$0xff]  }
  0x5e   :  { %6354 = vmatpush3.bf16.msra.mxu1 %v7044_v61  ;;  %6333 = vmatprep.subr.bf16.mxu0 %v7045_v62  ;;  %v7104_v61 = vld [vmem:[#allocation3 + $0x390] sm:$0xff]   ;;  %v7105_v62 = vld [vmem:[#allocation3 + $0x358] sm:$0xff]  }
  0x5f   :  { %6355 = vmatprep.subr.bf16.mxu1 %v7046_v63  ;;  %v7106_v63 = vld [vmem:[#allocation3 + $0x3d8] sm:$0xff]  }
  0x61   :  { %6334 = vmatpush3.bf16.msra.mxu0 %v7047_v0  ;;  %v7107_v0 = vld [vmem:[#allocation3 + $0x318] sm:$0xff]  }
  0x62   :  { %6356 = vmatpush3.bf16.msra.mxu1 %v7048_v1  ;;  %6335 = vmatprep.subr.bf16.mxu0 %v7049_v2  ;;  %v7108_v1 = vld [vmem:[#allocation3 + $0x398] sm:$0xff]   ;;  %v7109_v2 = vld [vmem:[#allocation3 + $0x360] sm:$0xff]  }
  0x63   :  { %6357 = vmatprep.subr.bf16.mxu1 %v7050_v3  ;;  %v7110_v3 = vld [vmem:[#allocation3 + $0x3e0] sm:$0xff]  }
  0x65   :  { %6336 = vmatpush3.bf16.msra.mxu0 %v7051_v4  ;;  %v7111_v4 = vld [vmem:[#allocation3 + $0x320] sm:$0xff]  }
  0x66   :  { %6358 = vmatpush3.bf16.msra.mxu1 %v7052_v5  ;;  %6365 = vmatprep.subr.bf16.mxu0 %v7057_v12  ;;  %v7112_v5 = vld [vmem:[#allocation3 + $0x3a0] sm:$0xff]   ;;  %v7119_v12 = vld [vmem:[#allocation3 + $0x330] sm:$0xff]  }
  0x67   :  { %6387 = vmatprep.subr.bf16.mxu1 %v7058_v13  ;;  %v7120_v13 = vld [vmem:[#allocation3 + $0x3b0] sm:$0xff]  }
  0x68   :  { %4512 = vmatmul.mubr.bf16.vlgmr.msra.gmra.mrb[4].mxu0 %v5704_v7  ;;  %v7114_v7 = vld [vmem:[#allocation3 + $0x3e8] sm:$0xff]  }
  0x69   :  { %4552 = vmatmul.mubr.bf16.vlgmr.msra.gmra.mrb[4].mxu1 %v5706_v10  ;;  %6366 = vmatpush3.bf16.msra.mxu0 %v7059_v14  ;;  %v7117_v10 = vld [vmem:[#allocation3 + $0x370] sm:$0xff]   ;;  %v7121_v14 = vld [vmem:[#allocation3 + $0x378] sm:$0xff]  }
  0x6a   :  { %6388 = vmatpush3.bf16.msra.mxu1 %v7060_v15  ;;  %6367 = vmatprep.subr.bf16.mxu0 %v7061_v16  ;;  %v7122_v15 = vld [vmem:[#allocation3 + $0x3f8] sm:$0xff]  }
  0x6b   :  { %6389 = vmatprep.subr.bf16.mxu1 %v7062_v17  ;;  %4591 = vmatprep.mubr.bf16.mxu0 %v5709_v47  ;;  %v7123_v16 = vld [vmem:[#allocation3 + $0x338] sm:$0xff]   ;;  %v7152_v47 = vld [vmem:[#allocation3 + $0x4a8] sm:$0xff]  }
  0x6c   :  { %4631 = vmatprep.mubr.bf16.mxu1 %v5711_v49  ;;  %v7124_v17 = vld [vmem:[#allocation3 + $0x3b8] sm:$0xff]   ;;  %v7154_v49 = vld [vmem:[#allocation3 + $0x4f0] sm:$0xff]  }
  0x6d   :  { %6368 = vmatpush3.bf16.msra.mxu0 %v7063_v18  ;;  %v53_v18 = vld [vmem:[%s7780_s0 + $0x30] sm:$0xff] }
  0x6e   :  { %6390 = vmatpush3.bf16.msra.mxu1 %v7064_v19  ;;  %6369 = vmatprep.subr.bf16.mxu0 %v7065_v20  ;;  %v54_v19 = vld [vmem:[%s7780_s0 + $0x38] sm:$0xff]  ;;  %v5712_v20 = vcombine.low %v53_v18, %v53_v18 }
  0x6f   :  { %6391 = vmatprep.subr.bf16.mxu1 %v7066_v21  ;;  %v5713_v21 = vcombine.high %v53_v18, %v53_v18  ;;  %v7185_v18 = vld [vmem:[#allocation3 + $0x568] sm:$0xff]  }
  0x71   :  { %6370 = vmatpush3.bf16.msra.mxu0 %v7067_v22  ;;  %v5714_v22 = vcombine.low %v54_v19, %v54_v19 }
  0x72   :  { %6392 = vmatpush3.bf16.msra.mxu1 %v7068_v23  ;;  %6371 = vmatprep.subr.bf16.mxu0 %v7069_v24  ;;  %v7129_v23 = vld [vmem:[#allocation3 + $0x440] sm:$0xff]   ;;  %v5715_v24 = vcombine.high %v54_v19, %v54_v19  ;;  %v7186_v19 = vld [vmem:[#allocation3 + $0x5e8] sm:$0xff]  }
  0x73   :  { %6393 = vmatprep.subr.bf16.mxu1 %v7070_v25  ;;  %v7130_v25 = vld [vmem:[#allocation3 + $0x4c0] sm:$0xff]  }
  0x75   :  { %6372 = vmatpush3.bf16.msra.mxu0 %v7071_v26  ;;  %v7131_v26 = vld [vmem:[#allocation3 + $0x400] sm:$0xff]  }
  0x76   :  { %6394 = vmatpush3.bf16.msra.mxu1 %v7072_v27  ;;  %6373 = vmatprep.subr.bf16.mxu0 %v7073_v28  ;;  %v7132_v27 = vld [vmem:[#allocation3 + $0x480] sm:$0xff]   ;;  %v7133_v28 = vld [vmem:[#allocation3 + $0x448] sm:$0xff]  }
  0x77   :  { %6395 = vmatprep.subr.bf16.mxu1 %v7074_v29  ;;  %v7134_v29 = vld [vmem:[#allocation3 + $0x4c8] sm:$0xff]  }
  0x79   :  { %6374 = vmatpush3.bf16.msra.mxu0 %v7075_v30  ;;  %v7135_v30 = vld [vmem:[#allocation3 + $0x408] sm:$0xff]  }
  0x7a   :  { %6396 = vmatpush3.bf16.msra.mxu1 %v7076_v31  ;;  %6375 = vmatprep.subr.bf16.mxu0 %v7077_v32  ;;  %v7136_v31 = vld [vmem:[#allocation3 + $0x488] sm:$0xff]   ;;  %v7137_v32 = vld [vmem:[#allocation3 + $0x450] sm:$0xff]  }
  0x7b   :  { %6397 = vmatprep.subr.bf16.mxu1 %v7078_v33  ;;  %v7138_v33 = vld [vmem:[#allocation3 + $0x4d0] sm:$0xff]  }
  0x7d   :  { %6376 = vmatpush3.bf16.msra.mxu0 %v7079_v34  ;;  %v7139_v34 = vld [vmem:[#allocation3 + $0x410] sm:$0xff]  }
  0x7e   :  { %6398 = vmatpush3.bf16.msra.mxu1 %v7080_v35  ;;  %6377 = vmatprep.subr.bf16.mxu0 %v7081_v36  ;;  %v7140_v35 = vld [vmem:[#allocation3 + $0x490] sm:$0xff]   ;;  %v7141_v36 = vld [vmem:[#allocation3 + $0x458] sm:$0xff]  }
  0x7f   :  { %6399 = vmatprep.subr.bf16.mxu1 %v7082_v37  ;;  %v7142_v37 = vld [vmem:[#allocation3 + $0x4d8] sm:$0xff]  }
  0x81   :  { %6378 = vmatpush3.bf16.msra.mxu0 %v7083_v38  ;;  %v7143_v38 = vld [vmem:[#allocation3 + $0x418] sm:$0xff]  }
  0x82   :  { %6400 = vmatpush3.bf16.msra.mxu1 %v7084_v39  ;;  %6379 = vmatprep.subr.bf16.mxu0 %v7085_v40  ;;  %v7144_v39 = vld [vmem:[#allocation3 + $0x498] sm:$0xff]   ;;  %v7145_v40 = vld [vmem:[#allocation3 + $0x460] sm:$0xff]  }
  0x83   :  { %6401 = vmatprep.subr.bf16.mxu1 %v7086_v41  ;;  %v7146_v41 = vld [vmem:[#allocation3 + $0x4e0] sm:$0xff]  }
  0x85   :  { %6380 = vmatpush3.bf16.msra.mxu0 %v7087_v42  ;;  %v7147_v42 = vld [vmem:[#allocation3 + $0x420] sm:$0xff]  }
  0x86   :  { %6402 = vmatpush3.bf16.msra.mxu1 %v7088_v43  ;;  %6409 = vmatprep.subr.bf16.mxu0 %v7093_v50  ;;  %v7148_v43 = vld [vmem:[#allocation3 + $0x4a0] sm:$0xff]   ;;  %v7155_v50 = vld [vmem:[#allocation3 + $0x430] sm:$0xff]  }
  0x87   :  { %6431 = vmatprep.subr.bf16.mxu1 %v7094_v51  ;;  %v7156_v51 = vld [vmem:[#allocation3 + $0x4b0] sm:$0xff]  }
  0x88   :  { %4592 = vmatmul.mubr.bf16.vlgmr.msra.gmra.mrb[8].mxu0 %v5708_v46  ;;  %v7151_v46 = vld [vmem:[#allocation3 + $0x428] sm:$0xff]  }
  0x89   :  { %4632 = vmatmul.mubr.bf16.vlgmr.msra.gmra.mrb[8].mxu1 %v5710_v48  ;;  %6410 = vmatpush3.bf16.msra.mxu0 %v7095_v52  ;;  %v7153_v48 = vld [vmem:[#allocation3 + $0x470] sm:$0xff]   ;;  %v7157_v52 = vld [vmem:[#allocation3 + $0x478] sm:$0xff]  }
  0x8a   :  { %6432 = vmatpush3.bf16.msra.mxu1 %v7096_v53  ;;  %6411 = vmatprep.subr.bf16.mxu0 %v7097_v54  ;;  %v7158_v53 = vld [vmem:[#allocation3 + $0x4f8] sm:$0xff]  }
  0x8b   :  { %6433 = vmatprep.subr.bf16.mxu1 %v7098_v55  ;;  %4671 = vmatprep.mubr.bf16.mxu0 %v5713_v21  ;;  %v7159_v54 = vld [vmem:[#allocation3 + $0x438] sm:$0xff]   ;;  %v7188_v21 = vld [vmem:[#allocation3 + $0x5a8] sm:$0xff]  }
  0x8c   :  { %4711 = vmatprep.mubr.bf16.mxu1 %v5715_v24  ;;  %v7160_v55 = vld [vmem:[#allocation3 + $0x4b8] sm:$0xff]   ;;  %v7191_v24 = vld [vmem:[#allocation3 + $0x530] sm:$0xff]  }
  0x8d   :  { %6412 = vmatpush3.bf16.msra.mxu0 %v7099_v56  ;;  %v55_v56 = vld [vmem:[%s7780_s0 + $0x40] sm:$0xff] }
  0x8e   :  { %6434 = vmatpush3.bf16.msra.mxu1 %v7100_v57  ;;  %6413 = vmatprep.subr.bf16.mxu0 %v7101_v58  ;;  %v5716_v57 = vcombine.low %v55_v56, %v55_v56  ;;  %v5717_v58 = vcombine.high %v55_v56, %v55_v56  ;;  %v7221_v56 = vld [vmem:[#allocation3 + $0x668] sm:$0xff]  }
  0x8f   :  { %6435 = vmatprep.subr.bf16.mxu1 %v7102_v59  ;;  %v56_v59 = vld [vmem:[%s7780_s0 + $0x48] sm:$0xff] }
  0x91   :  { %6414 = vmatpush3.bf16.msra.mxu0 %v7103_v60  ;;  %v5718_v60 = vcombine.low %v56_v59, %v56_v59 }
  0x92   :  { %6436 = vmatpush3.bf16.msra.mxu1 %v7104_v61  ;;  %6415 = vmatprep.subr.bf16.mxu0 %v7105_v62  ;;  %v5719_v61 = vcombine.high %v56_v59, %v56_v59  ;;  %v7165_v62 = vld [vmem:[#allocation3 + $0x540] sm:$0xff]   ;;  %v7224_v59 = vld [vmem:[#allocation3 + $0x6a8] sm:$0xff]  }
  0x93   :  { %6437 = vmatprep.subr.bf16.mxu1 %v7106_v63  ;;  %v7166_v63 = vld [vmem:[#allocation3 + $0x5c0] sm:$0xff]  }
  0x95   :  { %6416 = vmatpush3.bf16.msra.mxu0 %v7107_v0  ;;  %v7167_v0 = vld [vmem:[#allocation3 + $0x500] sm:$0xff]  }
  0x96   :  { %6438 = vmatpush3.bf16.msra.mxu1 %v7108_v1  ;;  %6417 = vmatprep.subr.bf16.mxu0 %v7109_v2  ;;  %v7168_v1 = vld [vmem:[#allocation3 + $0x580] sm:$0xff]   ;;  %v7169_v2 = vld [vmem:[#allocation3 + $0x548] sm:$0xff]  }
  0x97   :  { %6439 = vmatprep.subr.bf16.mxu1 %v7110_v3  ;;  %v7170_v3 = vld [vmem:[#allocation3 + $0x5c8] sm:$0xff]  }
  0x99   :  { %6418 = vmatpush3.bf16.msra.mxu0 %v7111_v4  ;;  %v7171_v4 = vld [vmem:[#allocation3 + $0x508] sm:$0xff]  }
  0x9a   :  { %6440 = vmatpush3.bf16.msra.mxu1 %v7112_v5  ;;  %6419 = vmatprep.subr.bf16.mxu0 %v7113_v6  ;;  %v7172_v5 = vld [vmem:[#allocation3 + $0x588] sm:$0xff]   ;;  %v7173_v6 = vld [vmem:[#allocation3 + $0x550] sm:$0xff]  }
  0x9b   :  { %6441 = vmatprep.subr.bf16.mxu1 %v7114_v7  ;;  %v7174_v7 = vld [vmem:[#allocation3 + $0x5d0] sm:$0xff]  }
  0x9d   :  { %6420 = vmatpush3.bf16.msra.mxu0 %v7115_v8  ;;  %v7175_v8 = vld [vmem:[#allocation3 + $0x510] sm:$0xff]  }
  0x9e   :  { %6442 = vmatpush3.bf16.msra.mxu1 %v7116_v9  ;;  %6421 = vmatprep.subr.bf16.mxu0 %v7117_v10  ;;  %v7176_v9 = vld [vmem:[#allocation3 + $0x590] sm:$0xff]   ;;  %v7177_v10 = vld [vmem:[#allocation3 + $0x558] sm:$0xff]  }
  0x9f   :  { %6443 = vmatprep.subr.bf16.mxu1 %v7118_v11  ;;  %v7178_v11 = vld [vmem:[#allocation3 + $0x5d8] sm:$0xff]  }
  0xa1   :  { %6422 = vmatpush3.bf16.msra.mxu0 %v7119_v12  ;;  %v7179_v12 = vld [vmem:[#allocation3 + $0x518] sm:$0xff]  }
  0xa2   :  { %6444 = vmatpush3.bf16.msra.mxu1 %v7120_v13  ;;  %6423 = vmatprep.subr.bf16.mxu0 %v7121_v14  ;;  %v7180_v13 = vld [vmem:[#allocation3 + $0x598] sm:$0xff]   ;;  %v7181_v14 = vld [vmem:[#allocation3 + $0x560] sm:$0xff]  }
  0xa3   :  { %6445 = vmatprep.subr.bf16.mxu1 %v7122_v15  ;;  %v7182_v15 = vld [vmem:[#allocation3 + $0x5e0] sm:$0xff]  }
  0xa5   :  { %6424 = vmatpush3.bf16.msra.mxu0 %v7123_v16  ;;  %v7183_v16 = vld [vmem:[#allocation3 + $0x520] sm:$0xff]  }
  0xa6   :  { %6446 = vmatpush3.bf16.msra.mxu1 %v7124_v17  ;;  %6453 = vmatprep.subr.bf16.mxu0 %v7129_v23  ;;  %v7184_v17 = vld [vmem:[#allocation3 + $0x5a0] sm:$0xff]   ;;  %v7190_v23 = vld [vmem:[#allocation3 + $0x5f0] sm:$0xff]  }
  0xa7   :  { %6475 = vmatprep.subr.bf16.mxu1 %v7130_v25  ;;  %v7192_v25 = vld [vmem:[#allocation3 + $0x5b0] sm:$0xff]  }
  0xa8   :  { %4672 = vmatmul.mubr.bf16.vlgmr.msra.gmra.mrb[12].mxu0 %v5712_v20  ;;  %v7187_v20 = vld [vmem:[#allocation3 + $0x528] sm:$0xff]  }
  0xa9   :  { %4712 = vmatmul.mubr.bf16.vlgmr.msra.gmra.mrb[12].mxu1 %v5714_v22  ;;  %6454 = vmatpush3.bf16.msra.mxu0 %v7131_v26  ;;  %v7189_v22 = vld [vmem:[#allocation3 + $0x570] sm:$0xff]   ;;  %v7193_v26 = vld [vmem:[#allocation3 + $0x578] sm:$0xff]  }
  0xaa   :  { %6476 = vmatpush3.bf16.msra.mxu1 %v7132_v27  ;;  %6455 = vmatprep.subr.bf16.mxu0 %v7133_v28  ;;  %v7194_v27 = vld [vmem:[#allocation3 + $0x5f8] sm:$0xff]  }
  0xab   :  { %6477 = vmatprep.subr.bf16.mxu1 %v7134_v29  ;;  %4751 = vmatprep.mubr.bf16.mxu0 %v5717_v58  ;;  %v7195_v28 = vld [vmem:[#allocation3 + $0x538] sm:$0xff]   ;;  %v7223_v58 = vld [vmem:[#allocation3 + $0x628] sm:$0xff]  }
  0xac   :  { %4791 = vmatprep.mubr.bf16.mxu1 %v5719_v61  ;;  %v7196_v29 = vld [vmem:[#allocation3 + $0x5b8] sm:$0xff]   ;;  %v7226_v61 = vld [vmem:[#allocation3 + $0x6f0] sm:$0xff]  }
  0xad   :  { %6456 = vmatpush3.bf16.msra.mxu0 %v7135_v30  ;;  %v57_v30 = vld [vmem:[%s7780_s0 + $0x50] sm:$0xff] }
  0xae   :  { %6478 = vmatpush3.bf16.msra.mxu1 %v7136_v31  ;;  %6457 = vmatprep.subr.bf16.mxu0 %v7137_v32  ;;  %v58_v31 = vld [vmem:[%s7780_s0 + $0x58] sm:$0xff]  ;;  %v5720_v32 = vcombine.low %v57_v30, %v57_v30 }
  0xaf   :  { %6479 = vmatprep.subr.bf16.mxu1 %v7138_v33  ;;  %v5721_v33 = vcombine.high %v57_v30, %v57_v30  ;;  %v7256_v30 = vld [vmem:[#allocation3 + $0x7a0] sm:$0xff]  }
  0xb1   :  { %6458 = vmatpush3.bf16.msra.mxu0 %v7139_v34  ;;  %v5722_v34 = vcombine.low %v58_v31, %v58_v31 }
  0xb2   :  { %6480 = vmatpush3.bf16.msra.mxu1 %v7140_v35  ;;  %6459 = vmatprep.subr.bf16.mxu0 %v7141_v36  ;;  %v5723_v35 = vcombine.high %v58_v31, %v58_v31  ;;  %v7201_v36 = vld [vmem:[#allocation3 + $0x640] sm:$0xff]  }
  0xb3   :  { %6481 = vmatprep.subr.bf16.mxu1 %v7142_v37  ;;  %v7202_v37 = vld [vmem:[#allocation3 + $0x6c0] sm:$0xff]  }
  0xb5   :  { %6460 = vmatpush3.bf16.msra.mxu0 %v7143_v38  ;;  %v7203_v38 = vld [vmem:[#allocation3 + $0x600] sm:$0xff]  }
  0xb6   :  { %6482 = vmatpush3.bf16.msra.mxu1 %v7144_v39  ;;  %6461 = vmatprep.subr.bf16.mxu0 %v7145_v40  ;;  %v7204_v39 = vld [vmem:[#allocation3 + $0x680] sm:$0xff]   ;;  %v7205_v40 = vld [vmem:[#allocation3 + $0x648] sm:$0xff]  }
  0xb7   :  { %6483 = vmatprep.subr.bf16.mxu1 %v7146_v41  ;;  %v7206_v41 = vld [vmem:[#allocation3 + $0x6c8] sm:$0xff]  }
  0xb9   :  { %6462 = vmatpush3.bf16.msra.mxu0 %v7147_v42  ;;  %v7207_v42 = vld [vmem:[#allocation3 + $0x608] sm:$0xff]  }
  0xba   :  { %6484 = vmatpush3.bf16.msra.mxu1 %v7148_v43  ;;  %6463 = vmatprep.subr.bf16.mxu0 %v7149_v44  ;;  %v7208_v43 = vld [vmem:[#allocation3 + $0x688] sm:$0xff]   ;;  %v7209_v44 = vld [vmem:[#allocation3 + $0x650] sm:$0xff]  }
  0xbb   :  { %6485 = vmatprep.subr.bf16.mxu1 %v7150_v45  ;;  %v7210_v45 = vld [vmem:[#allocation3 + $0x6d0] sm:$0xff]  }
  0xbd   :  { %6464 = vmatpush3.bf16.msra.mxu0 %v7151_v46  ;;  %v7211_v46 = vld [vmem:[#allocation3 + $0x610] sm:$0xff]  }
  0xbe   :  { %6486 = vmatpush3.bf16.msra.mxu1 %v7152_v47  ;;  %6465 = vmatprep.subr.bf16.mxu0 %v7153_v48  ;;  %v7212_v47 = vld [vmem:[#allocation3 + $0x690] sm:$0xff]   ;;  %v7213_v48 = vld [vmem:[#allocation3 + $0x658] sm:$0xff]  }
  0xbf   :  { %6487 = vmatprep.subr.bf16.mxu1 %v7154_v49  ;;  %v7214_v49 = vld [vmem:[#allocation3 + $0x6d8] sm:$0xff]  }
  0xc1   :  { %6466 = vmatpush3.bf16.msra.mxu0 %v7155_v50  ;;  %v7215_v50 = vld [vmem:[#allocation3 + $0x618] sm:$0xff]  }
  0xc2   :  { %6488 = vmatpush3.bf16.msra.mxu1 %v7156_v51  ;;  %6467 = vmatprep.subr.bf16.mxu0 %v7157_v52  ;;  %v7216_v51 = vld [vmem:[#allocation3 + $0x698] sm:$0xff]   ;;  %v7217_v52 = vld [vmem:[#allocation3 + $0x660] sm:$0xff]  }
  0xc3   :  { %6489 = vmatprep.subr.bf16.mxu1 %v7158_v53  ;;  %v7218_v53 = vld [vmem:[#allocation3 + $0x6e0] sm:$0xff]  }
  0xc5   :  { %6468 = vmatpush3.bf16.msra.mxu0 %v7159_v54  ;;  %v7219_v54 = vld [vmem:[#allocation3 + $0x620] sm:$0xff]  }
  0xc6   :  { %6490 = vmatpush3.bf16.msra.mxu1 %v7160_v55  ;;  %6497 = vmatprep.subr.bf16.mxu0 %v7165_v62  ;;  %v7220_v55 = vld [vmem:[#allocation3 + $0x6a0] sm:$0xff]   ;;  %v7227_v62 = vld [vmem:[#allocation3 + $0x630] sm:$0xff]  }
  0xc7   :  { %6519 = vmatprep.subr.bf16.mxu1 %v7166_v63  ;;  %v7228_v63 = vld [vmem:[#allocation3 + $0x6b0] sm:$0xff]  }
  0xc8   :  { %4752 = vmatmul.mubr.bf16.vlgmr.msra.gmra.mrb[16].mxu0 %v5716_v57  ;;  %v7222_v57 = vld [vmem:[#allocation3 + $0x6e8] sm:$0xff]  }
  0xc9   :  { %4792 = vmatmul.mubr.bf16.vlgmr.msra.gmra.mrb[16].mxu1 %v5718_v60  ;;  %6498 = vmatpush3.bf16.msra.mxu0 %v7167_v0  ;;  %v7225_v60 = vld [vmem:[#allocation3 + $0x670] sm:$0xff]   ;;  %v7229_v0 = vld [vmem:[#allocation3 + $0x678] sm:$0xff]  }
  0xca   :  { %6520 = vmatpush3.bf16.msra.mxu1 %v7168_v1  ;;  %6499 = vmatprep.subr.bf16.mxu0 %v7169_v2  ;;  %v7230_v1 = vld [vmem:[#allocation3 + $0x6f8] sm:$0xff]  }
  0xcb   :  { %6521 = vmatprep.subr.bf16.mxu1 %v7170_v3  ;;  %4831 = vmatprep.mubr.bf16.mxu0 %v5721_v33  ;;  %v7231_v2 = vld [vmem:[#allocation3 + $0x638] sm:$0xff]   ;;  %v7257_v33 = vld [vmem:[#allocation3 + $0x768] sm:$0xff]  }
  0xcc   :  { %4871 = vmatprep.mubr.bf16.mxu1 %v5723_v35  ;;  %v7232_v3 = vld [vmem:[#allocation3 + $0x6b8] sm:$0xff]  }
  0xcd   :  { %6500 = vmatpush3.bf16.msra.mxu0 %v7171_v4  ;;  %v59_v4 = vld [vmem:[%s7780_s0 + $0x60] sm:$0xff] }
  0xce   :  { %6522 = vmatpush3.bf16.msra.mxu1 %v7172_v5  ;;  %6501 = vmatprep.subr.bf16.mxu0 %v7173_v6  ;;  %v60_v5 = vld [vmem:[%s7780_s0 + $0x68] sm:$0xff]  ;;  %v5724_v6 = vcombine.low %v59_v4, %v59_v4 }
  0xcf   :  { %6523 = vmatprep.subr.bf16.mxu1 %v7174_v7  ;;  %v5725_v7 = vcombine.high %v59_v4, %v59_v4  ;;  %v7282_v4 = vld [vmem:[#allocation3 + $0x8d0] sm:$0xff]  }
  0xd1   :  { %6502 = vmatpush3.bf16.msra.mxu0 %v7175_v8  ;;  %v5726_v8 = vcombine.low %v60_v5, %v60_v5 }
  0xd2   :  { %6524 = vmatpush3.bf16.msra.mxu1 %v7176_v9  ;;  %6503 = vmatprep.subr.bf16.mxu0 %v7177_v10  ;;  %v7237_v9 = vld [vmem:[#allocation3 + $0x740] sm:$0xff]   ;;  %v5727_v10 = vcombine.high %v60_v5, %v60_v5  ;;  %v7283_v5 = vld [vmem:[#allocation3 + $0x810] sm:$0xff]  }
  0xd3   :  { %6525 = vmatprep.subr.bf16.mxu1 %v7178_v11  ;;  %v7238_v11 = vld [vmem:[#allocation3 + $0x7c0] sm:$0xff]  }
  0xd5   :  { %6504 = vmatpush3.bf16.msra.mxu0 %v7179_v12  ;;  %v7239_v12 = vld [vmem:[#allocation3 + $0x700] sm:$0xff]  }
  0xd6   :  { %6526 = vmatpush3.bf16.msra.mxu1 %v7180_v13  ;;  %6505 = vmatprep.subr.bf16.mxu0 %v7181_v14  ;;  %v7240_v13 = vld [vmem:[#allocation3 + $0x780] sm:$0xff]   ;;  %v7241_v14 = vld [vmem:[#allocation3 + $0x748] sm:$0xff]  }
  0xd7   :  { %6527 = vmatprep.subr.bf16.mxu1 %v7182_v15  ;;  %v7242_v15 = vld [vmem:[#allocation3 + $0x7c8] sm:$0xff]  }
  0xd9   :  { %6506 = vmatpush3.bf16.msra.mxu0 %v7183_v16  ;;  %v7243_v16 = vld [vmem:[#allocation3 + $0x708] sm:$0xff]  }
  0xda   :  { %6528 = vmatpush3.bf16.msra.mxu1 %v7184_v17  ;;  %6507 = vmatprep.subr.bf16.mxu0 %v7185_v18  ;;  %v7244_v17 = vld [vmem:[#allocation3 + $0x788] sm:$0xff]   ;;  %v7245_v18 = vld [vmem:[#allocation3 + $0x750] sm:$0xff]  }
  0xdb   :  { %6529 = vmatprep.subr.bf16.mxu1 %v7186_v19  ;;  %v7246_v19 = vld [vmem:[#allocation3 + $0x7d0] sm:$0xff]  }
  0xdd   :  { %6508 = vmatpush3.bf16.msra.mxu0 %v7187_v20  ;;  %v7247_v20 = vld [vmem:[#allocation3 + $0x710] sm:$0xff]  }
  0xde   :  { %6530 = vmatpush3.bf16.msra.mxu1 %v7188_v21  ;;  %6509 = vmatprep.subr.bf16.mxu0 %v7189_v22  ;;  %v7248_v21 = vld [vmem:[#allocation3 + $0x790] sm:$0xff]   ;;  %v7249_v22 = vld [vmem:[#allocation3 + $0x758] sm:$0xff]  }
  0xdf   :  { %6531 = vmatprep.subr.bf16.mxu1 %v7190_v23  ;;  %v7250_v23 = vld [vmem:[#allocation3 + $0x7d8] sm:$0xff]  }
  0xe1   :  { %6510 = vmatpush3.bf16.msra.mxu0 %v7191_v24  ;;  %v7251_v24 = vld [vmem:[#allocation3 + $0x718] sm:$0xff]  }
  0xe2   :  { %6532 = vmatpush3.bf16.msra.mxu1 %v7192_v25  ;;  %6511 = vmatprep.subr.bf16.mxu0 %v7193_v26  ;;  %v7252_v25 = vld [vmem:[#allocation3 + $0x798] sm:$0xff]   ;;  %v7253_v26 = vld [vmem:[#allocation3 + $0x760] sm:$0xff]  }
  0xe3   :  { %6533 = vmatprep.subr.bf16.mxu1 %v7194_v27  ;;  %v7254_v27 = vld [vmem:[#allocation3 + $0x7e0] sm:$0xff]  }
  0xe5   :  { %6512 = vmatpush3.bf16.msra.mxu0 %v7195_v28  ;;  %v7255_v28 = vld [vmem:[#allocation3 + $0x720] sm:$0xff]  }
  0xe6   :  { %6534 = vmatpush3.bf16.msra.mxu1 %v7196_v29  ;;  %6541 = vmatprep.subr.bf16.mxu0 %v7201_v36  ;;  %v7258_v36 = vld [vmem:[#allocation3 + $0x7e8] sm:$0xff]  }
  0xe7   :  { %6563 = vmatprep.subr.bf16.mxu1 %v7202_v37 }
  0xe8   :  { %4832 = vmatmul.mubr.bf16.vlgmr.msra.gmra.mrb[20].mxu0 %v5720_v32 }
  0xe9   :  { %4872 = vmatmul.mubr.bf16.vlgmr.msra.gmra.mrb[20].mxu1 %v5722_v34  ;;  %6542 = vmatpush3.bf16.msra.mxu0 %v7203_v38 }
  0xea   :  { %6564 = vmatpush3.bf16.msra.mxu1 %v7204_v39  ;;  %6543 = vmatprep.subr.bf16.mxu0 %v7205_v40  ;;  %v7259_v40 = vld [vmem:[#allocation3 + $0x728] sm:$0xff]  }
  0xeb   :  { %6565 = vmatprep.subr.bf16.mxu1 %v7206_v41  ;;  %4911 = vmatprep.mubr.bf16.mxu0 %v5725_v7  ;;  %v7285_v7 = vld [vmem:[#allocation3 + $0x858] sm:$0xff]  }
  0xec   :  { %4951 = vmatprep.mubr.bf16.mxu1 %v5727_v10  ;;  %v7288_v10 = vld [vmem:[#allocation3 + $0x898] sm:$0xff]  }
  0xed   :  { %6544 = vmatpush3.bf16.msra.mxu0 %v7207_v42 }
  0xee   :  { %6566 = vmatpush3.bf16.msra.mxu1 %v7208_v43  ;;  %6545 = vmatprep.subr.bf16.mxu0 %v7209_v44  ;;  %v7260_v43 = vld [vmem:[#allocation3 + $0x7a8] sm:$0xff]  }
  0xef   :  { %6567 = vmatprep.subr.bf16.mxu1 %v7210_v45  ;;  %v7261_v45 = vld [vmem:[#allocation3 + $0x770] sm:$0xff]  }
  0xf1   :  { %6546 = vmatpush3.bf16.msra.mxu0 %v7211_v46  ;;  %v7262_v46 = vld [vmem:[#allocation3 + $0x7f0] sm:$0xff]  }
  0xf2   :  { %6568 = vmatpush3.bf16.msra.mxu1 %v7212_v47  ;;  %6547 = vmatprep.subr.bf16.mxu0 %v7213_v48  ;;  %v7263_v47 = vld [vmem:[#allocation3 + $0x730] sm:$0xff]  }
  0xf3   :  { %6569 = vmatprep.subr.bf16.mxu1 %v7214_v49  ;;  %v7264_v48 = vld [vmem:[#allocation3 + $0x7b0] sm:$0xff]   ;;  %v7265_v49 = vld [vmem:[#allocation3 + $0x778] sm:$0xff]  }
  0xf5   :  { %6548 = vmatpush3.bf16.msra.mxu0 %v7215_v50  ;;  %v7266_v50 = vld [vmem:[#allocation3 + $0x7f8] sm:$0xff]  }
  0xf6   :  { %6570 = vmatpush3.bf16.msra.mxu1 %v7216_v51  ;;  %6549 = vmatprep.subr.bf16.mxu0 %v7217_v52  ;;  %v7267_v51 = vld [vmem:[#allocation3 + $0x738] sm:$0xff]  }
  0xf7   :  { %6571 = vmatprep.subr.bf16.mxu1 %v7218_v53  ;;  %v7268_v52 = vld [vmem:[#allocation3 + $0x7b8] sm:$0xff]   ;;  %v61_v53 = vld [vmem:[%s7780_s0 + $0x70] sm:$0xff] }
  0xf9   :  { %6550 = vmatpush3.bf16.msra.mxu0 %v7219_v54  ;;  %v62_v54 = vld [vmem:[%s7780_s0 + $0x78] sm:$0xff] }
  0xfa   :  { %6572 = vmatpush3.bf16.msra.mxu1 %v7220_v55  ;;  %6551 = vmatprep.subr.bf16.mxu0 %v7221_v56  ;;  %v5728_v55 = vcombine.low %v61_v53, %v61_v53  ;;  %v5729_v56 = vcombine.high %v61_v53, %v61_v53  ;;  %v7317_v53 = vld [vmem:[#allocation3 + $0x950] sm:$0xff]  }
  0xfb   :  { %6573 = vmatprep.subr.bf16.mxu1 %v7222_v57  ;;  %v5730_v57 = vcombine.low %v62_v54, %v62_v54 }
  0xfd   :  { %6552 = vmatpush3.bf16.msra.mxu0 %v7223_v58  ;;  %v7273_v58 = vld [vmem:[#allocation3 + $0x840] sm:$0xff]  }
  0xfe   :  { %6574 = vmatpush3.bf16.msra.mxu1 %v7224_v59  ;;  %6553 = vmatprep.subr.bf16.mxu0 %v7225_v60  ;;  %v5731_v59 = vcombine.high %v62_v54, %v62_v54  ;;  %v7274_v60 = vld [vmem:[#allocation3 + $0x8c0] sm:$0xff]   ;;  %v7318_v54 = vld [vmem:[#allocation3 + $0x9d0] sm:$0xff]  }
  0xff   :  { %6575 = vmatprep.subr.bf16.mxu1 %v7226_v61  ;;  %v7275_v61 = vld [vmem:[#allocation3 + $0x800] sm:$0xff]  }
 0x101   :  { %6554 = vmatpush3.bf16.msra.mxu0 %v7227_v62  ;;  %v7276_v62 = vld [vmem:[#allocation3 + $0x880] sm:$0xff]  }
 0x102   :  { %6576 = vmatpush3.bf16.msra.mxu1 %v7228_v63  ;;  %6555 = vmatprep.subr.bf16.mxu0 %v7229_v0  ;;  %v7277_v63 = vld [vmem:[#allocation3 + $0x848] sm:$0xff]  }
 0x103   :  { %6577 = vmatprep.subr.bf16.mxu1 %v7230_v1  ;;  %v7278_v0 = vld [vmem:[#allocation3 + $0x8c8] sm:$0xff]  }
 0x104   :  { %v7279_v1 = vld [vmem:[#allocation3 + $0x808] sm:$0xff]  }
 0x105   :  { %6556 = vmatpush3.bf16.msra.mxu0 %v7231_v2  ;;  %v7280_v2 = vld [vmem:[#allocation3 + $0x888] sm:$0xff]  }
 0x106   :  { %6578 = vmatpush3.bf16.msra.mxu1 %v7232_v3  ;;  %6585 = vmatprep.subr.bf16.mxu0 %v7237_v9  ;;  %v7281_v3 = vld [vmem:[#allocation3 + $0x850] sm:$0xff]   ;;  %v7287_v9 = vld [vmem:[#allocation3 + $0x818] sm:$0xff]  }
 0x107   :  { %6607 = vmatprep.subr.bf16.mxu1 %v7238_v11  ;;  %v7289_v11 = vld [vmem:[#allocation3 + $0x860] sm:$0xff]  }
 0x108   :  { %4912 = vmatmul.mubr.bf16.vlgmr.msra.gmra.mrb[24].mxu0 %v5724_v6  ;;  %v7284_v6 = vld [vmem:[#allocation3 + $0x890] sm:$0xff]  }
 0x109   :  { %4952 = vmatmul.mubr.bf16.vlgmr.msra.gmra.mrb[24].mxu1 %v5726_v8  ;;  %6586 = vmatpush3.bf16.msra.mxu0 %v7239_v12  ;;  %v7286_v8 = vld [vmem:[#allocation3 + $0x8d8] sm:$0xff]   ;;  %v7290_v12 = vld [vmem:[#allocation3 + $0x8e0] sm:$0xff]  }
 0x10a   :  { %6608 = vmatpush3.bf16.msra.mxu1 %v7240_v13  ;;  %6587 = vmatprep.subr.bf16.mxu0 %v7241_v14  ;;  %v7291_v13 = vld [vmem:[#allocation3 + $0x820] sm:$0xff]  }
 0x10b   :  { %6609 = vmatprep.subr.bf16.mxu1 %v7242_v15  ;;  %4991 = vmatprep.mubr.bf16.mxu0 %v5729_v56  ;;  %v7292_v15 = vld [vmem:[#allocation3 + $0x8a0] sm:$0xff]   ;;  %v7320_v56 = vld [vmem:[#allocation3 + $0x990] sm:$0xff]  }
 0x10c   :  { %5031 = vmatprep.mubr.bf16.mxu1 %v5731_v59  ;;  %v7323_v59 = vld [vmem:[#allocation3 + $0x918] sm:$0xff]  }
 0x10d   :  { %6588 = vmatpush3.bf16.msra.mxu0 %v7243_v16 }
 0x10e   :  { %6610 = vmatpush3.bf16.msra.mxu1 %v7244_v17  ;;  %6589 = vmatprep.subr.bf16.mxu0 %v7245_v18  ;;  %v7293_v18 = vld [vmem:[#allocation3 + $0x868] sm:$0xff]  }
 0x10f   :  { %6611 = vmatprep.subr.bf16.mxu1 %v7246_v19 }
 0x111   :  { %6590 = vmatpush3.bf16.msra.mxu0 %v7247_v20 }
 0x112   :  { %6612 = vmatpush3.bf16.msra.mxu1 %v7248_v21  ;;  %6591 = vmatprep.subr.bf16.mxu0 %v7249_v22  ;;  %v7294_v21 = vld [vmem:[#allocation3 + $0x8e8] sm:$0xff]  }
 0x113   :  { %6613 = vmatprep.subr.bf16.mxu1 %v7250_v23 }
 0x115   :  { %6592 = vmatpush3.bf16.msra.mxu0 %v7251_v24 }
 0x116   :  { %6614 = vmatpush3.bf16.msra.mxu1 %v7252_v25  ;;  %6593 = vmatprep.subr.bf16.mxu0 %v7253_v26  ;;  %v7295_v26 = vld [vmem:[#allocation3 + $0x828] sm:$0xff]  }
 0x117   :  { %6615 = vmatprep.subr.bf16.mxu1 %v7254_v27 }
 0x119   :  { %6594 = vmatpush3.bf16.msra.mxu0 %v7255_v28  ;;  %v7296_v28 = vld [vmem:[#allocation3 + $0x8a8] sm:$0xff]  }
 0x11a   :  { %6616 = vmatpush3.bf16.msra.mxu1 %v7256_v30  ;;  %6595 = vmatprep.subr.bf16.mxu0 %v7257_v33  ;;  %v7299_v33 = vld [vmem:[#allocation3 + $0x830] sm:$0xff]  }
 0x11b   :  { %v6293_v29 = vpop.f32.mrb[0].mxu0  ;;  %6617 = vmatprep.subr.bf16.mxu1 %v7258_v36  ;;  %v7302_v36 = vld [vmem:[#allocation3 + $0x8f8] sm:$0xff]  }
 0x11c   :  { %v6315_v31 = vpop.f32.mrb[0].mxu1  ;;  %v6294_v32 = vpop.f32.mrb[1].mxu0 }
 0x11d   :  { %v6295_v34 = vadd.f32 %v6294_v32, %v6293_v29  ;;  %v6316_v35 = vpop.f32.mrb[1].mxu1  ;;  %v6296_v38 = vpop.f32.mrb[2].mxu0  ;;  %6596 = vmatpush3.bf16.msra.mxu0 %v7259_v40  ;;  %v7298_v32 = vld [vmem:[#allocation3 + $0x8f0] sm:$0xff]   ;;  %v64_v40 = vld [vmem:[%s7780_s0 + $0x88] sm:$0xff] }
 0x11e   :  { %v6317_v37 = vadd.f32 %v6316_v35, %v6315_v31  ;;  %v6318_v39 = vpop.f32.mrb[2].mxu1  ;;  %v6297_v41 = vpop.f32.mrb[3].mxu0  ;;  %6618 = vmatpush3.bf16.msra.mxu1 %v7260_v43  ;;  %6597 = vmatprep.subr.bf16.mxu0 %v7261_v45  ;;  %v7297_v31 = vld [vmem:[#allocation3 + $0x870] sm:$0xff]   ;;  %v7301_v35 = vld [vmem:[#allocation3 + $0x878] sm:$0xff]   ;;  %v5734_v43 = vcombine.low %v64_v40, %v64_v40  ;;  %v5735_v45 = vcombine.high %v64_v40, %v64_v40 }
 0x11f   :  { %v6319_v44 = vpop.f32.mrb[3].mxu1  ;;  %6619 = vmatprep.subr.bf16.mxu1 %v7262_v46  ;;  %v7304_v38 = vld [vmem:[#allocation3 + $0x8b8] sm:$0xff]   ;;  %v63_v39 = vld [vmem:[%s7780_s0 + $0x80] sm:$0xff]  ;;  %v7354_v40 = vld [vmem:[#allocation3 + $0xad0] sm:$0xff]  }
 0x120   :  { %v7699_v42 = vadd.f32 %v6317_v37, %v6295_v34  ;;  %v7300_v34 = vld [vmem:[#allocation3 + $0x8b0] sm:$0xff]   ;;  %v7303_v37 = vld [vmem:[#allocation3 + $0x838] sm:$0xff]   ;;  %v5732_v41 = vcombine.low %v63_v39, %v63_v39  ;;  %v7309_v44 = vld [vmem:[#allocation3 + $0x940] sm:$0xff]  }
 0x121   :  { %6598 = vmatpush3.bf16.msra.mxu0 %v7263_v47  ;;  %v7310_v46 = vld [vmem:[#allocation3 + $0x9c0] sm:$0xff]  }
 0x122   :  { %6620 = vmatpush3.bf16.msra.mxu1 %v7264_v48  ;;  %6599 = vmatprep.subr.bf16.mxu0 %v7265_v49  ;;  %v7311_v47 = vld [vmem:[#allocation3 + $0x900] sm:$0xff]   ;;  %v7313_v49 = vld [vmem:[#allocation3 + $0x948] sm:$0xff]  }
 0x123   :  { %6621 = vmatprep.subr.bf16.mxu1 %v7266_v50  ;;  %v7312_v48 = vld [vmem:[#allocation3 + $0x980] sm:$0xff]   ;;  %v7314_v50 = vld [vmem:[#allocation3 + $0x9c8] sm:$0xff]  }
 0x125   :  { %6600 = vmatpush3.bf16.msra.mxu0 %v7267_v51  ;;  %v7315_v51 = vld [vmem:[#allocation3 + $0x908] sm:$0xff]  }
 0x126   :  { %6622 = vmatpush3.bf16.msra.mxu1 %v7268_v52  ;;  %6629 = vmatprep.subr.bf16.mxu0 %v7273_v58  ;;  %v7316_v52 = vld [vmem:[#allocation3 + $0x988] sm:$0xff]   ;;  %v7322_v58 = vld [vmem:[#allocation3 + $0x9d8] sm:$0xff]  }
 0x127   :  { %6651 = vmatprep.subr.bf16.mxu1 %v7274_v60  ;;  %v7324_v60 = vld [vmem:[#allocation3 + $0x998] sm:$0xff]  }
 0x128   :  { %4992 = vmatmul.mubr.bf16.vlgmr.msra.gmra.mrb[28].mxu0 %v5728_v55  ;;  %v7319_v55 = vld [vmem:[#allocation3 + $0x910] sm:$0xff]  }
 0x129   :  { %5032 = vmatmul.mubr.bf16.vlgmr.msra.gmra.mrb[28].mxu1 %v5730_v57  ;;  %6630 = vmatpush3.bf16.msra.mxu0 %v7275_v61  ;;  %v7321_v57 = vld [vmem:[#allocation3 + $0x958] sm:$0xff]   ;;  %v7325_v61 = vld [vmem:[#allocation3 + $0x960] sm:$0xff]  }
 0x12a   :  { %6652 = vmatpush3.bf16.msra.mxu1 %v7276_v62  ;;  %6631 = vmatprep.subr.bf16.mxu0 %v7277_v63  ;;  %v7326_v62 = vld [vmem:[#allocation3 + $0x9e0] sm:$0xff]  }
 0x12b   :  { %6653 = vmatprep.subr.bf16.mxu1 %v7278_v0  ;;  %5111 = vmatprep.mubr.bf16.mxu1 %v5735_v45  ;;  %v7327_v0 = vld [vmem:[#allocation3 + $0x920] sm:$0xff]   ;;  %v7359_v45 = vld [vmem:[#allocation3 + $0xa18] sm:$0xff]  }
 0x12d   :  { %6632 = vmatpush3.bf16.msra.mxu0 %v7279_v1 }
 0x12e   :  { %6654 = vmatpush3.bf16.msra.mxu1 %v7280_v2  ;;  %6633 = vmatprep.subr.bf16.mxu0 %v7281_v3  ;;  %v7328_v2 = vld [vmem:[#allocation3 + $0x9a0] sm:$0xff]  }
 0x12f   :  { %6655 = vmatprep.subr.bf16.mxu1 %v7282_v4 }
 0x131   :  { %6634 = vmatpush3.bf16.msra.mxu0 %v7283_v5  ;;  %v7329_v5 = vld [vmem:[#allocation3 + $0x968] sm:$0xff]  }
 0x132   :  { %6656 = vmatpush3.bf16.msra.mxu1 %v7284_v6  ;;  %6635 = vmatprep.subr.bf16.mxu0 %v7285_v7 }
 0x133   :  { %6657 = vmatprep.subr.bf16.mxu1 %v7286_v8  ;;  %v7330_v8 = vld [vmem:[#allocation3 + $0x9e8] sm:$0xff]  }
 0x135   :  { %6636 = vmatpush3.bf16.msra.mxu0 %v7287_v9 }
 0x136   :  { %6658 = vmatpush3.bf16.msra.mxu1 %v7288_v10  ;;  %6637 = vmatprep.subr.bf16.mxu0 %v7289_v11  ;;  %v7331_v11 = vld [vmem:[#allocation3 + $0x928] sm:$0xff]  }
 0x137   :  { %6659 = vmatprep.subr.bf16.mxu1 %v7290_v12 }
 0x139   :  { %6638 = vmatpush3.bf16.msra.mxu0 %v7291_v13  ;;  %v7332_v13 = vld [vmem:[#allocation3 + $0x9a8] sm:$0xff]  }
 0x13a   :  { %6660 = vmatpush3.bf16.msra.mxu1 %v7292_v15  ;;  %6639 = vmatprep.subr.bf16.mxu0 %v7293_v18  ;;  %v7334_v18 = vld [vmem:[#allocation3 + $0x9f0] sm:$0xff]  }
 0x13b   :  { %v6337_v14 = vpop.f32.mrb[4].mxu0  ;;  %6661 = vmatprep.subr.bf16.mxu1 %v7294_v21  ;;  %v7337_v21 = vld [vmem:[#allocation3 + $0x978] sm:$0xff]  }
 0x13c   :  { %v6359_v16 = vpop.f32.mrb[4].mxu1  ;;  %v6338_v17 = vpop.f32.mrb[5].mxu0 }
 0x13d   :  { %v6339_v19 = vadd.f32 %v6338_v17, %v6337_v14  ;;  %v6360_v20 = vpop.f32.mrb[5].mxu1  ;;  %v6340_v23 = vpop.f32.mrb[6].mxu0  ;;  %6640 = vmatpush3.bf16.msra.mxu0 %v7295_v26 }
 0x13e   :  { %v6361_v22 = vadd.f32 %v6360_v20, %v6359_v16  ;;  %v6362_v24 = vpop.f32.mrb[6].mxu1  ;;  %v6341_v27 = vpop.f32.mrb[7].mxu0  ;;  %6662 = vmatpush3.bf16.msra.mxu1 %v7296_v28  ;;  %6641 = vmatprep.subr.bf16.mxu0 %v7297_v31  ;;  %v7333_v16 = vld [vmem:[#allocation3 + $0x970] sm:$0xff]   ;;  %v7339_v23 = vld [vmem:[#allocation3 + $0x938] sm:$0xff]   ;;  %v7345_v31 = vld [vmem:[#allocation3 + $0xa40] sm:$0xff]  }
 0x13f   :  { %v4514_v25 = vadd.f32 %v6339_v19, %v7699_v42  ;;  %v6363_v29 = vpop.f32.mrb[7].mxu1  ;;  %6663 = vmatprep.subr.bf16.mxu1 %v7298_v32  ;;  %v5733_v42 = vcombine.high %v63_v39, %v63_v39  ;;  %v7335_v19 = vld [vmem:[#allocation3 + $0x930] sm:$0xff]   ;;  %v7340_v24 = vld [vmem:[#allocation3 + $0x9b8] sm:$0xff]   ;;  %v7346_v32 = vld [vmem:[#allocation3 + $0xac0] sm:$0xff]  }
 0x140   :  { %v7336_v20 = vld [vmem:[#allocation3 + $0x9b0] sm:$0xff]   ;;  %v66_v28 = vld [vmem:[%s7780_s0 + $0x98] sm:$0xff] }
 0x141   :  { %v7708_v30 = vadd.f32 %v6361_v22, %v4514_v25  ;;  %6642 = vmatpush3.bf16.msra.mxu0 %v7299_v33  ;;  %5071 = vmatprep.mubr.bf16.mxu0 %v5733_v42  ;;  %v7338_v22 = vld [vmem:[#allocation3 + $0x9f8] sm:$0xff]   ;;  %v65_v25 = vld [vmem:[%s7780_s0 + $0x90] sm:$0xff]  ;;  %v5738_v29 = vcombine.low %v66_v28, %v66_v28  ;;  %v7347_v33 = vld [vmem:[#allocation3 + $0xa00] sm:$0xff]  }
 0x142   :  { %6664 = vmatpush3.bf16.msra.mxu1 %v7300_v34  ;;  %6643 = vmatprep.subr.bf16.mxu0 %v7301_v35  ;;  %v5736_v26 = vcombine.low %v65_v25, %v65_v25  ;;  %v5737_v27 = vcombine.high %v65_v25, %v65_v25  ;;  %v7348_v34 = vld [vmem:[#allocation3 + $0xa80] sm:$0xff]   ;;  %v7349_v35 = vld [vmem:[#allocation3 + $0xa48] sm:$0xff]   ;;  %v7353_v39 = vld [vmem:[#allocation3 + $0xa50] sm:$0xff]  }
 0x143   :  { %6665 = vmatprep.subr.bf16.mxu1 %v7302_v36  ;;  %v7350_v36 = vld [vmem:[#allocation3 + $0xac8] sm:$0xff]   ;;  %v7356_v42 = vld [vmem:[#allocation3 + $0xa90] sm:$0xff]  }
 0x144   :  { %v7389_v25 = vld [vmem:[#allocation3 + $0xb50] sm:$0xff]  }
 0x145   :  { %6644 = vmatpush3.bf16.msra.mxu0 %v7303_v37  ;;  %v7351_v37 = vld [vmem:[#allocation3 + $0xa08] sm:$0xff]  }
 0x146   :  { %6666 = vmatpush3.bf16.msra.mxu1 %v7304_v38  ;;  %6673 = vmatprep.subr.bf16.mxu0 %v7309_v44  ;;  %v7352_v38 = vld [vmem:[#allocation3 + $0xa88] sm:$0xff]   ;;  %v7358_v44 = vld [vmem:[#allocation3 + $0xad8] sm:$0xff]  }
 0x147   :  { %6695 = vmatprep.subr.bf16.mxu1 %v7310_v46  ;;  %v7360_v46 = vld [vmem:[#allocation3 + $0xa98] sm:$0xff]  }
 0x148   :  { %5072 = vmatmul.mubr.bf16.vlgmr.msra.gmra.mrb[32].mxu0 %v5732_v41  ;;  %v7355_v41 = vld [vmem:[#allocation3 + $0xa10] sm:$0xff]  }
 0x149   :  { %5112 = vmatmul.mubr.bf16.vlgmr.msra.gmra.mrb[32].mxu1 %v5734_v43  ;;  %6674 = vmatpush3.bf16.msra.mxu0 %v7311_v47  ;;  %v7357_v43 = vld [vmem:[#allocation3 + $0xa58] sm:$0xff]   ;;  %v7361_v47 = vld [vmem:[#allocation3 + $0xa60] sm:$0xff]  }
 0x14a   :  { %6696 = vmatpush3.bf16.msra.mxu1 %v7312_v48  ;;  %6675 = vmatprep.subr.bf16.mxu0 %v7313_v49  ;;  %v7362_v48 = vld [vmem:[#allocation3 + $0xae0] sm:$0xff]  }
 0x14b   :  { %6697 = vmatprep.subr.bf16.mxu1 %v7314_v50  ;;  %5151 = vmatprep.mubr.bf16.mxu0 %v5737_v27  ;;  %v7363_v50 = vld [vmem:[#allocation3 + $0xa20] sm:$0xff]   ;;  %v7391_v27 = vld [vmem:[#allocation3 + $0xb10] sm:$0xff]  }
 0x14d   :  { %6676 = vmatpush3.bf16.msra.mxu0 %v7315_v51 }
 0x14e   :  { %6698 = vmatpush3.bf16.msra.mxu1 %v7316_v52  ;;  %6677 = vmatprep.subr.bf16.mxu0 %v7317_v53  ;;  %v7364_v52 = vld [vmem:[#allocation3 + $0xaa0] sm:$0xff]  }
 0x14f   :  { %6699 = vmatprep.subr.bf16.mxu1 %v7318_v54 }
 0x151   :  { %6678 = vmatpush3.bf16.msra.mxu0 %v7319_v55  ;;  %v7365_v55 = vld [vmem:[#allocation3 + $0xa68] sm:$0xff]  }
 0x152   :  { %6700 = vmatpush3.bf16.msra.mxu1 %v7320_v56  ;;  %6679 = vmatprep.subr.bf16.mxu0 %v7321_v57 }
 0x153   :  { %6701 = vmatprep.subr.bf16.mxu1 %v7322_v58  ;;  %v7366_v58 = vld [vmem:[#allocation3 + $0xae8] sm:$0xff]  }
 0x155   :  { %6680 = vmatpush3.bf16.msra.mxu0 %v7323_v59 }
 0x156   :  { %6702 = vmatpush3.bf16.msra.mxu1 %v7324_v60  ;;  %6681 = vmatprep.subr.bf16.mxu0 %v7325_v61  ;;  %v7367_v61 = vld [vmem:[#allocation3 + $0xa28] sm:$0xff]  }
 0x157   :  { %6703 = vmatprep.subr.bf16.mxu1 %v7326_v62 }
 0x159   :  { %6682 = vmatpush3.bf16.msra.mxu0 %v7327_v0 }
 0x15a   :  { %6704 = vmatpush3.bf16.msra.mxu1 %v7328_v2  ;;  %6683 = vmatprep.subr.bf16.mxu0 %v7329_v5  ;;  %v7369_v2 = vld [vmem:[#allocation3 + $0xa70] sm:$0xff]  }
 0x15b   :  { %v6381_v63 = vpop.f32.mrb[8].mxu0  ;;  %6705 = vmatprep.subr.bf16.mxu1 %v7330_v8  ;;  %v7371_v5 = vld [vmem:[#allocation3 + $0xa30] sm:$0xff]   ;;  %v7374_v8 = vld [vmem:[#allocation3 + $0xaf8] sm:$0xff]  }
 0x15c   :  { %v6403_v1 = vpop.f32.mrb[8].mxu1  ;;  %v6382_v3 = vpop.f32.mrb[9].mxu0 }
 0x15d   :  { %v6404_v4 = vpop.f32.mrb[9].mxu1  ;;  %v6383_v6 = vadd.f32 %v6382_v3, %v6381_v63  ;;  %v6384_v9 = vpop.f32.mrb[10].mxu0  ;;  %6684 = vmatpush3.bf16.msra.mxu0 %v7331_v11  ;;  %v7368_v63 = vld [vmem:[#allocation3 + $0xaa8] sm:$0xff]   ;;  %v67_v11 = vld [vmem:[%s7780_s0 + $0xa0] sm:$0xff] }
 0x15e   :  { %v6405_v7 = vadd.f32 %v6404_v4, %v6403_v1  ;;  %v6406_v10 = vpop.f32.mrb[10].mxu1  ;;  %v6385_v14 = vpop.f32.mrb[11].mxu0  ;;  %6706 = vmatpush3.bf16.msra.mxu1 %v7332_v13  ;;  %6685 = vmatprep.subr.bf16.mxu0 %v7333_v16  ;;  %v7370_v4 = vld [vmem:[#allocation3 + $0xaf0] sm:$0xff]   ;;  %v7375_v9 = vld [vmem:[#allocation3 + $0xa38] sm:$0xff]   ;;  %v5740_v13 = vcombine.low %v67_v11, %v67_v11 }
 0x15f   :  { %v4594_v12 = vadd.f32 %v6383_v6, %v7708_v30  ;;  %v6407_v15 = vpop.f32.mrb[11].mxu1  ;;  %6707 = vmatprep.subr.bf16.mxu1 %v7334_v18  ;;  %v5739_v30 = vcombine.high %v66_v28, %v66_v28  ;;  %v7372_v6 = vld [vmem:[#allocation3 + $0xab0] sm:$0xff]   ;;  %v7376_v10 = vld [vmem:[#allocation3 + $0xab8] sm:$0xff]   ;;  %v5741_v14 = vcombine.high %v67_v11, %v67_v11  ;;  %v7382_v18 = vld [vmem:[#allocation3 + $0xbc0] sm:$0xff]  }
 0x160   :  { %v7392_v28 = vld [vmem:[#allocation3 + $0xb90] sm:$0xff]  }
 0x161   :  { %v7717_v17 = vadd.f32 %v6405_v7, %v4594_v12  ;;  %6686 = vmatpush3.bf16.msra.mxu0 %v7335_v19  ;;  %5191 = vmatprep.mubr.bf16.mxu1 %v5739_v30  ;;  %v7373_v7 = vld [vmem:[#allocation3 + $0xa78] sm:$0xff]   ;;  %v68_v12 = vld [vmem:[%s7780_s0 + $0xa8] sm:$0xff]  ;;  %v7383_v19 = vld [vmem:[#allocation3 + $0xb00] sm:$0xff]  }
 0x162   :  { %6708 = vmatpush3.bf16.msra.mxu1 %v7336_v20  ;;  %6687 = vmatprep.subr.bf16.mxu0 %v7337_v21  ;;  %v5742_v15 = vcombine.low %v68_v12, %v68_v12  ;;  %v5743_v16 = vcombine.high %v68_v12, %v68_v12  ;;  %v7384_v20 = vld [vmem:[#allocation3 + $0xb80] sm:$0xff]   ;;  %v7385_v21 = vld [vmem:[#allocation3 + $0xb48] sm:$0xff]   ;;  %v7394_v30 = vld [vmem:[#allocation3 + $0xbd8] sm:$0xff]  }
 0x163   :  { %6709 = vmatprep.subr.bf16.mxu1 %v7338_v22  ;;  %v7386_v22 = vld [vmem:[#allocation3 + $0xbc8] sm:$0xff]   ;;  %v7425_v11 = vld [vmem:[#allocation3 + $0xc50] sm:$0xff]  }
 0x164   :  { %v7426_v12 = vld [vmem:[#allocation3 + $0xcd0] sm:$0xff]  }
 0x165   :  { %6688 = vmatpush3.bf16.msra.mxu0 %v7339_v23  ;;  %v7387_v23 = vld [vmem:[#allocation3 + $0xb08] sm:$0xff]  }
 0x166   :  { %6710 = vmatpush3.bf16.msra.mxu1 %v7340_v24  ;;  %6717 = vmatprep.subr.bf16.mxu0 %v7345_v31  ;;  %v7388_v24 = vld [vmem:[#allocation3 + $0xb88] sm:$0xff]   ;;  %v7395_v31 = vld [vmem:[#allocation3 + $0xb18] sm:$0xff]  }
 0x167   :  { %6739 = vmatprep.subr.bf16.mxu1 %v7346_v32  ;;  %v7396_v32 = vld [vmem:[#allocation3 + $0xb98] sm:$0xff]  }
 0x168   :  { %5152 = vmatmul.mubr.bf16.vlgmr.msra.gmra.mrb[36].mxu0 %v5736_v26  ;;  %v7390_v26 = vld [vmem:[#allocation3 + $0xbd0] sm:$0xff]  }
 0x169   :  { %5192 = vmatmul.mubr.bf16.vlgmr.msra.gmra.mrb[36].mxu1 %v5738_v29  ;;  %6718 = vmatpush3.bf16.msra.mxu0 %v7347_v33  ;;  %v7393_v29 = vld [vmem:[#allocation3 + $0xb58] sm:$0xff]   ;;  %v7397_v33 = vld [vmem:[#allocation3 + $0xb60] sm:$0xff]  }
 0x16a   :  { %6740 = vmatpush3.bf16.msra.mxu1 %v7348_v34  ;;  %6719 = vmatprep.subr.bf16.mxu0 %v7349_v35  ;;  %v7398_v34 = vld [vmem:[#allocation3 + $0xbe0] sm:$0xff]  }
 0x16b   :  { %6741 = vmatprep.subr.bf16.mxu1 %v7350_v36  ;;  %5231 = vmatprep.mubr.bf16.mxu0 %v5741_v14  ;;  %v7399_v35 = vld [vmem:[#allocation3 + $0xb20] sm:$0xff]   ;;  %v7428_v14 = vld [vmem:[#allocation3 + $0xc90] sm:$0xff]  }
 0x16c   :  { %5271 = vmatprep.mubr.bf16.mxu1 %v5743_v16  ;;  %v7430_v16 = vld [vmem:[#allocation3 + $0xcd8] sm:$0xff]  }
 0x16d   :  { %6720 = vmatpush3.bf16.msra.mxu0 %v7351_v37  ;;  %v7400_v37 = vld [vmem:[#allocation3 + $0xba0] sm:$0xff]  }
 0x16e   :  { %6742 = vmatpush3.bf16.msra.mxu1 %v7352_v38  ;;  %6721 = vmatprep.subr.bf16.mxu0 %v7353_v39 }
 0x16f   :  { %6743 = vmatprep.subr.bf16.mxu1 %v7354_v40 }
 0x171   :  { %6722 = vmatpush3.bf16.msra.mxu0 %v7355_v41 }
 0x172   :  { %6744 = vmatpush3.bf16.msra.mxu1 %v7356_v42  ;;  %6723 = vmatprep.subr.bf16.mxu0 %v7357_v43  ;;  %v7401_v43 = vld [vmem:[#allocation3 + $0xb68] sm:$0xff]  }
 0x173   :  { %6745 = vmatprep.subr.bf16.mxu1 %v7358_v44 }
 0x175   :  { %6724 = vmatpush3.bf16.msra.mxu0 %v7359_v45  ;;  %v7402_v45 = vld [vmem:[#allocation3 + $0xbe8] sm:$0xff]  }
 0x176   :  { %6746 = vmatpush3.bf16.msra.mxu1 %v7360_v46  ;;  %6725 = vmatprep.subr.bf16.mxu0 %v7361_v47 }
 0x177   :  { %6747 = vmatprep.subr.bf16.mxu1 %v7362_v48  ;;  %v7403_v48 = vld [vmem:[#allocation3 + $0xb28] sm:$0xff]  }
 0x179   :  { %6726 = vmatpush3.bf16.msra.mxu0 %v7363_v50  ;;  %v7404_v50 = vld [vmem:[#allocation3 + $0xba8] sm:$0xff]  }
 0x17a   :  { %6748 = vmatpush3.bf16.msra.mxu1 %v7364_v52  ;;  %6727 = vmatprep.subr.bf16.mxu0 %v7365_v55  ;;  %v7407_v55 = vld [vmem:[#allocation3 + $0xb30] sm:$0xff]  }
 0x17b   :  { %v6425_v49 = vpop.f32.mrb[12].mxu0  ;;  %6749 = vmatprep.subr.bf16.mxu1 %v7366_v58  ;;  %v7410_v58 = vld [vmem:[#allocation3 + $0xbf8] sm:$0xff]  }
 0x17c   :  { %v6447_v51 = vpop.f32.mrb[12].mxu1  ;;  %v6426_v53 = vpop.f32.mrb[13].mxu0 }
 0x17d   :  { %v6448_v54 = vpop.f32.mrb[13].mxu1  ;;  %v6427_v56 = vadd.f32 %v6426_v53, %v6425_v49  ;;  %v6428_v59 = vpop.f32.mrb[14].mxu0  ;;  %6728 = vmatpush3.bf16.msra.mxu0 %v7367_v61  ;;  %v7405_v53 = vld [vmem:[#allocation3 + $0xb70] sm:$0xff]  }
 0x17e   :  { %v6449_v57 = vadd.f32 %v6448_v54, %v6447_v51  ;;  %v6450_v60 = vpop.f32.mrb[14].mxu1  ;;  %v6429_v0 = vpop.f32.mrb[15].mxu0  ;;  %6750 = vmatpush3.bf16.msra.mxu1 %v7368_v63  ;;  %6729 = vmatprep.subr.bf16.mxu0 %v7369_v2  ;;  %v7406_v54 = vld [vmem:[#allocation3 + $0xbf0] sm:$0xff]   ;;  %v7411_v59 = vld [vmem:[#allocation3 + $0xb38] sm:$0xff]  }
 0x17f   :  { %v4674_v62 = vadd.f32 %v6427_v56, %v7717_v17  ;;  %v6451_v1 = vpop.f32.mrb[15].mxu1  ;;  %6751 = vmatprep.subr.bf16.mxu1 %v7370_v4  ;;  %v7381_v17 = vld [vmem:[#allocation3 + $0xb40] sm:$0xff]   ;;  %v7408_v56 = vld [vmem:[#allocation3 + $0xbb0] sm:$0xff]   ;;  %v7412_v60 = vld [vmem:[#allocation3 + $0xbb8] sm:$0xff]  }
 0x180   :  { %v69_v61 = vld [vmem:[%s7780_s0 + $0xb0] sm:$0xff]  ;;  %v7418_v4 = vld [vmem:[#allocation3 + $0xcc0] sm:$0xff]  }
 0x181   :  { %v7726_v3 = vadd.f32 %v6449_v57, %v4674_v62  ;;  %6730 = vmatpush3.bf16.msra.mxu0 %v7371_v5  ;;  %v7409_v57 = vld [vmem:[#allocation3 + $0xb78] sm:$0xff]   ;;  %v5744_v63 = vcombine.low %v69_v61, %v69_v61  ;;  %v5745_v0 = vcombine.high %v69_v61, %v69_v61  ;;  %v7419_v5 = vld [vmem:[#allocation3 + $0xc00] sm:$0xff]   ;;  %v7461_v61 = vld [vmem:[#allocation3 + $0xd50] sm:$0xff]  }
 0x182   :  { %6752 = vmatpush3.bf16.msra.mxu1 %v7372_v6  ;;  %6731 = vmatprep.subr.bf16.mxu0 %v7373_v7  ;;  %v70_v62 = vld [vmem:[%s7780_s0 + $0xb8] sm:$0xff]  ;;  %v7420_v6 = vld [vmem:[#allocation3 + $0xc80] sm:$0xff]   ;;  %v7421_v7 = vld [vmem:[#allocation3 + $0xc48] sm:$0xff]  }
 0x183   :  { %6753 = vmatprep.subr.bf16.mxu1 %v7374_v8  ;;  %v5746_v1 = vcombine.low %v70_v62, %v70_v62  ;;  %v5747_v2 = vcombine.high %v70_v62, %v70_v62  ;;  %v7422_v8 = vld [vmem:[#allocation3 + $0xcc8] sm:$0xff]   ;;  %v7462_v62 = vld [vmem:[#allocation3 + $0xdd0] sm:$0xff]  }
 0x185   :  { %6732 = vmatpush3.bf16.msra.mxu0 %v7375_v9  ;;  %v7423_v9 = vld [vmem:[#allocation3 + $0xc08] sm:$0xff]  }
 0x186   :  { %6754 = vmatpush3.bf16.msra.mxu1 %v7376_v10  ;;  %6761 = vmatprep.subr.bf16.mxu0 %v7381_v17  ;;  %v7424_v10 = vld [vmem:[#allocation3 + $0xc88] sm:$0xff]   ;;  %v7431_v17 = vld [vmem:[#allocation3 + $0xc18] sm:$0xff]  }
 0x187   :  { %6783 = vmatprep.subr.bf16.mxu1 %v7382_v18  ;;  %v7432_v18 = vld [vmem:[#allocation3 + $0xc98] sm:$0xff]  }
 0x188   :  { %5232 = vmatmul.mubr.bf16.vlgmr.msra.gmra.mrb[40].mxu0 %v5740_v13  ;;  %v7427_v13 = vld [vmem:[#allocation3 + $0xc10] sm:$0xff]  }
 0x189   :  { %5272 = vmatmul.mubr.bf16.vlgmr.msra.gmra.mrb[40].mxu1 %v5742_v15  ;;  %6762 = vmatpush3.bf16.msra.mxu0 %v7383_v19  ;;  %v7429_v15 = vld [vmem:[#allocation3 + $0xc58] sm:$0xff]   ;;  %v7433_v19 = vld [vmem:[#allocation3 + $0xc60] sm:$0xff]  }
 0x18a   :  { %6784 = vmatpush3.bf16.msra.mxu1 %v7384_v20  ;;  %6763 = vmatprep.subr.bf16.mxu0 %v7385_v21  ;;  %v7434_v20 = vld [vmem:[#allocation3 + $0xce0] sm:$0xff]  }
 0x18b   :  { %6785 = vmatprep.subr.bf16.mxu1 %v7386_v22  ;;  %5311 = vmatprep.mubr.bf16.mxu0 %v5745_v0  ;;  %v7435_v22 = vld [vmem:[#allocation3 + $0xc20] sm:$0xff]   ;;  %v7464_v0 = vld [vmem:[#allocation3 + $0xd90] sm:$0xff]  }
 0x18c   :  { %5351 = vmatprep.mubr.bf16.mxu1 %v5747_v2  ;;  %v7466_v2 = vld [vmem:[#allocation3 + $0xdd8] sm:$0xff]  }
 0x18d   :  { %6764 = vmatpush3.bf16.msra.mxu0 %v7387_v23 }
 0x18e   :  { %6786 = vmatpush3.bf16.msra.mxu1 %v7388_v24  ;;  %6765 = vmatprep.subr.bf16.mxu0 %v7389_v25  ;;  %v7436_v24 = vld [vmem:[#allocation3 + $0xca0] sm:$0xff]  }
 0x18f   :  { %6787 = vmatprep.subr.bf16.mxu1 %v7390_v26 }
 0x191   :  { %6766 = vmatpush3.bf16.msra.mxu0 %v7391_v27 }
 0x192   :  { %6788 = vmatpush3.bf16.msra.mxu1 %v7392_v28  ;;  %6767 = vmatprep.subr.bf16.mxu0 %v7393_v29  ;;  %v7437_v28 = vld [vmem:[#allocation3 + $0xc68] sm:$0xff]  }
 0x193   :  { %6789 = vmatprep.subr.bf16.mxu1 %v7394_v30  ;;  %v7438_v30 = vld [vmem:[#allocation3 + $0xce8] sm:$0xff]  }
 0x195   :  { %6768 = vmatpush3.bf16.msra.mxu0 %v7395_v31 }
 0x196   :  { %6790 = vmatpush3.bf16.msra.mxu1 %v7396_v32  ;;  %6769 = vmatprep.subr.bf16.mxu0 %v7397_v33 }
 0x197   :  { %6791 = vmatprep.subr.bf16.mxu1 %v7398_v34  ;;  %v7439_v34 = vld [vmem:[#allocation3 + $0xc28] sm:$0xff]  }
 0x199   :  { %6770 = vmatpush3.bf16.msra.mxu0 %v7399_v35  ;;  %v7440_v35 = vld [vmem:[#allocation3 + $0xca8] sm:$0xff]  }
 0x19a   :  { %6792 = vmatpush3.bf16.msra.mxu1 %v7400_v37  ;;  %6771 = vmatprep.subr.bf16.mxu0 %v7401_v43  ;;  %v7445_v43 = vld [vmem:[#allocation3 + $0xc78] sm:$0xff]  }
 0x19b   :  { %v6469_v36 = vpop.f32.mrb[16].mxu0  ;;  %6793 = vmatprep.subr.bf16.mxu1 %v7402_v45  ;;  %v7447_v45 = vld [vmem:[#allocation3 + $0xc38] sm:$0xff]  }
 0x19c   :  { %v6491_v38 = vpop.f32.mrb[16].mxu1  ;;  %v6470_v39 = vpop.f32.mrb[17].mxu0 }
 0x19d   :  { %v6492_v40 = vpop.f32.mrb[17].mxu1  ;;  %v6471_v41 = vadd.f32 %v6470_v39, %v6469_v36  ;;  %v6472_v44 = vpop.f32.mrb[18].mxu0  ;;  %6772 = vmatpush3.bf16.msra.mxu0 %v7403_v48  ;;  %v7441_v39 = vld [vmem:[#allocation3 + $0xc70] sm:$0xff]   ;;  %v72_v48 = vld [vmem:[%s7780_s0 + $0xc8] sm:$0xff] }
 0x19e   :  { %v6493_v42 = vadd.f32 %v6492_v40, %v6491_v38  ;;  %v6494_v46 = vpop.f32.mrb[18].mxu1  ;;  %v6473_v49 = vpop.f32.mrb[19].mxu0  ;;  %6794 = vmatpush3.bf16.msra.mxu1 %v7404_v50  ;;  %6773 = vmatprep.subr.bf16.mxu0 %v7405_v53  ;;  %v7442_v40 = vld [vmem:[#allocation3 + $0xcf0] sm:$0xff]   ;;  %v7446_v44 = vld [vmem:[#allocation3 + $0xcf8] sm:$0xff]   ;;  %v5751_v53 = vcombine.high %v72_v48, %v72_v48 }
 0x19f   :  { %v4754_v47 = vadd.f32 %v6471_v41, %v7726_v3  ;;  %v6495_v51 = vpop.f32.mrb[19].mxu1  ;;  %6795 = vmatprep.subr.bf16.mxu1 %v7406_v54  ;;  %v7417_v3 = vld [vmem:[#allocation3 + $0xc40] sm:$0xff]   ;;  %v7443_v41 = vld [vmem:[#allocation3 + $0xc30] sm:$0xff]   ;;  %v7448_v46 = vld [vmem:[#allocation3 + $0xcb8] sm:$0xff]  }
 0x1a0   :  { %v5750_v51 = vcombine.low %v72_v48, %v72_v48  ;;  %v7454_v54 = vld [vmem:[#allocation3 + $0xdc0] sm:$0xff]   ;;  %v7498_v48 = vld [vmem:[#allocation3 + $0xed0] sm:$0xff]  }
 0x1a1   :  { %v7735_v52 = vadd.f32 %v6493_v42, %v4754_v47  ;;  %6774 = vmatpush3.bf16.msra.mxu0 %v7407_v55  ;;  %v7444_v42 = vld [vmem:[#allocation3 + $0xcb0] sm:$0xff]   ;;  %v71_v47 = vld [vmem:[%s7780_s0 + $0xc0] sm:$0xff] }
 0x1a2   :  { %6796 = vmatpush3.bf16.msra.mxu1 %v7408_v56  ;;  %6775 = vmatprep.subr.bf16.mxu0 %v7409_v57  ;;  %v5748_v49 = vcombine.low %v71_v47, %v71_v47  ;;  %v5749_v50 = vcombine.high %v71_v47, %v71_v47  ;;  %v7455_v55 = vld [vmem:[#allocation3 + $0xd00] sm:$0xff]   ;;  %v7457_v57 = vld [vmem:[#allocation3 + $0xd48] sm:$0xff]   ;;  %v7497_v47 = vld [vmem:[#allocation3 + $0xe50] sm:$0xff]  }
 0x1a3   :  { %6797 = vmatprep.subr.bf16.mxu1 %v7410_v58  ;;  %v7456_v56 = vld [vmem:[#allocation3 + $0xd80] sm:$0xff]   ;;  %v7458_v58 = vld [vmem:[#allocation3 + $0xdc8] sm:$0xff]  }
 0x1a5   :  { %6776 = vmatpush3.bf16.msra.mxu0 %v7411_v59  ;;  %v7459_v59 = vld [vmem:[#allocation3 + $0xd08] sm:$0xff]  }
 0x1a6   :  { %6798 = vmatpush3.bf16.msra.mxu1 %v7412_v60  ;;  %6805 = vmatprep.subr.bf16.mxu0 %v7417_v3  ;;  %v7460_v60 = vld [vmem:[#allocation3 + $0xd88] sm:$0xff]   ;;  %v7467_v3 = vld [vmem:[#allocation3 + $0xd18] sm:$0xff]  }
 0x1a7   :  { %6827 = vmatprep.subr.bf16.mxu1 %v7418_v4  ;;  %v7468_v4 = vld [vmem:[#allocation3 + $0xd98] sm:$0xff]  }
 0x1a8   :  { %5312 = vmatmul.mubr.bf16.vlgmr.msra.gmra.mrb[44].mxu0 %v5744_v63  ;;  %v7463_v63 = vld [vmem:[#allocation3 + $0xd10] sm:$0xff]  }
 0x1a9   :  { %5352 = vmatmul.mubr.bf16.vlgmr.msra.gmra.mrb[44].mxu1 %v5746_v1  ;;  %6806 = vmatpush3.bf16.msra.mxu0 %v7419_v5  ;;  %v7465_v1 = vld [vmem:[#allocation3 + $0xd58] sm:$0xff]   ;;  %v7469_v5 = vld [vmem:[#allocation3 + $0xd60] sm:$0xff]  }
 0x1aa   :  { %6828 = vmatpush3.bf16.msra.mxu1 %v7420_v6  ;;  %6807 = vmatprep.subr.bf16.mxu0 %v7421_v7  ;;  %v7470_v6 = vld [vmem:[#allocation3 + $0xde0] sm:$0xff]  }
 0x1ab   :  { %6829 = vmatprep.subr.bf16.mxu1 %v7422_v8  ;;  %5391 = vmatprep.mubr.bf16.mxu0 %v5749_v50  ;;  %v7471_v8 = vld [vmem:[#allocation3 + $0xd20] sm:$0xff]   ;;  %v7500_v50 = vld [vmem:[#allocation3 + $0xe90] sm:$0xff]  }
 0x1ac   :  { %5431 = vmatprep.mubr.bf16.mxu1 %v5751_v53  ;;  %v7503_v53 = vld [vmem:[#allocation3 + $0xe18] sm:$0xff]  }
 0x1ad   :  { %6808 = vmatpush3.bf16.msra.mxu0 %v7423_v9 }
 0x1ae   :  { %6830 = vmatpush3.bf16.msra.mxu1 %v7424_v10  ;;  %6809 = vmatprep.subr.bf16.mxu0 %v7425_v11  ;;  %v7472_v10 = vld [vmem:[#allocation3 + $0xda0] sm:$0xff]  }
 0x1af   :  { %6831 = vmatprep.subr.bf16.mxu1 %v7426_v12 }
 0x1b1   :  { %6810 = vmatpush3.bf16.msra.mxu0 %v7427_v13  ;;  %v7473_v13 = vld [vmem:[#allocation3 + $0xd68] sm:$0xff]  }
 0x1b2   :  { %6832 = vmatpush3.bf16.msra.mxu1 %v7428_v14  ;;  %6811 = vmatprep.subr.bf16.mxu0 %v7429_v15 }
 0x1b3   :  { %6833 = vmatprep.subr.bf16.mxu1 %v7430_v16  ;;  %v7474_v16 = vld [vmem:[#allocation3 + $0xde8] sm:$0xff]  }
 0x1b5   :  { %6812 = vmatpush3.bf16.msra.mxu0 %v7431_v17 }
 0x1b6   :  { %6834 = vmatpush3.bf16.msra.mxu1 %v7432_v18  ;;  %6813 = vmatprep.subr.bf16.mxu0 %v7433_v19  ;;  %v7475_v19 = vld [vmem:[#allocation3 + $0xd28] sm:$0xff]  }
 0x1b7   :  { %6835 = vmatprep.subr.bf16.mxu1 %v7434_v20 }
 0x1b9   :  { %6814 = vmatpush3.bf16.msra.mxu0 %v7435_v22 }
 0x1ba   :  { %6836 = vmatpush3.bf16.msra.mxu1 %v7436_v24  ;;  %6815 = vmatprep.subr.bf16.mxu0 %v7437_v28  ;;  %v7477_v24 = vld [vmem:[#allocation3 + $0xd70] sm:$0xff]  }
 0x1bb   :  { %v6513_v21 = vpop.f32.mrb[20].mxu0  ;;  %6837 = vmatprep.subr.bf16.mxu1 %v7438_v30  ;;  %v7480_v28 = vld [vmem:[#allocation3 + $0xdb0] sm:$0xff]   ;;  %v7482_v30 = vld [vmem:[#allocation3 + $0xdf8] sm:$0xff]  }
 0x1bc   :  { %v6535_v23 = vpop.f32.mrb[20].mxu1  ;;  %v6514_v25 = vpop.f32.mrb[21].mxu0 }
 0x1bd   :  { %v6515_v26 = vadd.f32 %v6514_v25, %v6513_v21  ;;  %v6536_v27 = vpop.f32.mrb[21].mxu1  ;;  %v6516_v31 = vpop.f32.mrb[22].mxu0  ;;  %6816 = vmatpush3.bf16.msra.mxu0 %v7439_v34  ;;  %v7476_v21 = vld [vmem:[#allocation3 + $0xda8] sm:$0xff]  }
 0x1be   :  { %v6537_v29 = vadd.f32 %v6536_v27, %v6535_v23  ;;  %v6538_v33 = vpop.f32.mrb[22].mxu1  ;;  %v6517_v36 = vpop.f32.mrb[23].mxu0  ;;  %6838 = vmatpush3.bf16.msra.mxu1 %v7440_v35  ;;  %6817 = vmatprep.subr.bf16.mxu0 %v7441_v39  ;;  %v7479_v27 = vld [vmem:[#allocation3 + $0xd30] sm:$0xff]   ;;  %v7483_v31 = vld [vmem:[#allocation3 + $0xd38] sm:$0xff]   ;;  %v7489_v39 = vld [vmem:[#allocation3 + $0xe40] sm:$0xff]  }
 0x1bf   :  { %v4834_v32 = vadd.f32 %v6515_v26, %v7735_v52  ;;  %v6539_v38 = vpop.f32.mrb[23].mxu1  ;;  %6839 = vmatprep.subr.bf16.mxu1 %v7442_v40  ;;  %v7453_v52 = vld [vmem:[#allocation3 + $0xd40] sm:$0xff]   ;;  %v7478_v26 = vld [vmem:[#allocation3 + $0xdf0] sm:$0xff]   ;;  %v74_v36 = vld [vmem:[%s7780_s0 + $0xd8] sm:$0xff] }
 0x1c0   :  { %v73_v33 = vld [vmem:[%s7780_s0 + $0xd0] sm:$0xff]  ;;  %v5755_v38 = vcombine.high %v74_v36, %v74_v36  ;;  %v7490_v40 = vld [vmem:[#allocation3 + $0xec0] sm:$0xff]  }
 0x1c1   :  { %v7744_v37 = vadd.f32 %v6537_v29, %v4834_v32  ;;  %6818 = vmatpush3.bf16.msra.mxu0 %v7443_v41  ;;  %v7481_v29 = vld [vmem:[#allocation3 + $0xd78] sm:$0xff]   ;;  %v5752_v34 = vcombine.low %v73_v33, %v73_v33  ;;  %v5753_v35 = vcombine.high %v73_v33, %v73_v33  ;;  %v7491_v41 = vld [vmem:[#allocation3 + $0xe00] sm:$0xff]   ;;  %v7533_v33 = vld [vmem:[#allocation3 + $0xf50] sm:$0xff]  }
 0x1c2   :  { %6840 = vmatpush3.bf16.msra.mxu1 %v7444_v42  ;;  %6819 = vmatprep.subr.bf16.mxu0 %v7445_v43  ;;  %v7484_v32 = vld [vmem:[#allocation3 + $0xdb8] sm:$0xff]   ;;  %v7492_v42 = vld [vmem:[#allocation3 + $0xe80] sm:$0xff]   ;;  %v7493_v43 = vld [vmem:[#allocation3 + $0xe48] sm:$0xff]  }
 0x1c3   :  { %6841 = vmatprep.subr.bf16.mxu1 %v7446_v44  ;;  %v7494_v44 = vld [vmem:[#allocation3 + $0xec8] sm:$0xff]  }
 0x1c5   :  { %6820 = vmatpush3.bf16.msra.mxu0 %v7447_v45  ;;  %v7495_v45 = vld [vmem:[#allocation3 + $0xe08] sm:$0xff]  }
 0x1c6   :  { %6842 = vmatpush3.bf16.msra.mxu1 %v7448_v46  ;;  %6849 = vmatprep.subr.bf16.mxu0 %v7453_v52  ;;  %v7496_v46 = vld [vmem:[#allocation3 + $0xe88] sm:$0xff]   ;;  %v7502_v52 = vld [vmem:[#allocation3 + $0xed8] sm:$0xff]  }
 0x1c7   :  { %6871 = vmatprep.subr.bf16.mxu1 %v7454_v54  ;;  %v7504_v54 = vld [vmem:[#allocation3 + $0xe98] sm:$0xff]  }
 0x1c8   :  { %5392 = vmatmul.mubr.bf16.vlgmr.msra.gmra.mrb[48].mxu0 %v5748_v49  ;;  %v7499_v49 = vld [vmem:[#allocation3 + $0xe10] sm:$0xff]  }
 0x1c9   :  { %5432 = vmatmul.mubr.bf16.vlgmr.msra.gmra.mrb[48].mxu1 %v5750_v51  ;;  %6850 = vmatpush3.bf16.msra.mxu0 %v7455_v55  ;;  %v7501_v51 = vld [vmem:[#allocation3 + $0xe58] sm:$0xff]   ;;  %v7505_v55 = vld [vmem:[#allocation3 + $0xe60] sm:$0xff]  }
 0x1ca   :  { %6872 = vmatpush3.bf16.msra.mxu1 %v7456_v56  ;;  %6851 = vmatprep.subr.bf16.mxu0 %v7457_v57  ;;  %v7506_v56 = vld [vmem:[#allocation3 + $0xee0] sm:$0xff]  }
 0x1cb   :  { %6873 = vmatprep.subr.bf16.mxu1 %v7458_v58  ;;  %5471 = vmatprep.mubr.bf16.mxu0 %v5753_v35  ;;  %v7507_v58 = vld [vmem:[#allocation3 + $0xe20] sm:$0xff]   ;;  %v7535_v35 = vld [vmem:[#allocation3 + $0xf10] sm:$0xff]  }
 0x1cc   :  { %5511 = vmatprep.mubr.bf16.mxu1 %v5755_v38  ;;  %v7538_v38 = vld [vmem:[#allocation3 + $0xfd8] sm:$0xff]  }
 0x1cd   :  { %6852 = vmatpush3.bf16.msra.mxu0 %v7459_v59 }
 0x1ce   :  { %6874 = vmatpush3.bf16.msra.mxu1 %v7460_v60  ;;  %6853 = vmatprep.subr.bf16.mxu0 %v7461_v61  ;;  %v7508_v60 = vld [vmem:[#allocation3 + $0xea0] sm:$0xff]  }
 0x1cf   :  { %6875 = vmatprep.subr.bf16.mxu1 %v7462_v62 }
 0x1d1   :  { %6854 = vmatpush3.bf16.msra.mxu0 %v7463_v63  ;;  %v7509_v63 = vld [vmem:[#allocation3 + $0xe68] sm:$0xff]  }
 0x1d2   :  { %6876 = vmatpush3.bf16.msra.mxu1 %v7464_v0  ;;  %6855 = vmatprep.subr.bf16.mxu0 %v7465_v1 }
 0x1d3   :  { %6877 = vmatprep.subr.bf16.mxu1 %v7466_v2  ;;  %v7510_v2 = vld [vmem:[#allocation3 + $0xee8] sm:$0xff]  }
 0x1d5   :  { %6856 = vmatpush3.bf16.msra.mxu0 %v7467_v3 }
 0x1d6   :  { %6878 = vmatpush3.bf16.msra.mxu1 %v7468_v4  ;;  %6857 = vmatprep.subr.bf16.mxu0 %v7469_v5  ;;  %v7511_v5 = vld [vmem:[#allocation3 + $0xe28] sm:$0xff]  }
 0x1d7   :  { %6879 = vmatprep.subr.bf16.mxu1 %v7470_v6 }
 0x1d9   :  { %6858 = vmatpush3.bf16.msra.mxu0 %v7471_v8 }
 0x1da   :  { %6880 = vmatpush3.bf16.msra.mxu1 %v7472_v10  ;;  %6859 = vmatprep.subr.bf16.mxu0 %v7473_v13  ;;  %v7513_v10 = vld [vmem:[#allocation3 + $0xe70] sm:$0xff]  }
 0x1db   :  { %v6557_v7 = vpop.f32.mrb[24].mxu0  ;;  %6881 = vmatprep.subr.bf16.mxu1 %v7474_v16  ;;  %v7515_v13 = vld [vmem:[#allocation3 + $0xe30] sm:$0xff]   ;;  %v7518_v16 = vld [vmem:[#allocation3 + $0xef8] sm:$0xff]  }
 0x1dc   :  { %v6579_v9 = vpop.f32.mrb[24].mxu1  ;;  %v6558_v11 = vpop.f32.mrb[25].mxu0 }
 0x1dd   :  { %v6580_v12 = vpop.f32.mrb[25].mxu1  ;;  %v6559_v14 = vadd.f32 %v6558_v11, %v6557_v7  ;;  %v6560_v17 = vpop.f32.mrb[26].mxu0  ;;  %6860 = vmatpush3.bf16.msra.mxu0 %v7475_v19  ;;  %v7512_v7 = vld [vmem:[#allocation3 + $0xea8] sm:$0xff]   ;;  %v75_v19 = vld [vmem:[%s7780_s0 + $0xe0] sm:$0xff] }
 0x1de   :  { %v6581_v15 = vadd.f32 %v6580_v12, %v6579_v9  ;;  %v6582_v18 = vpop.f32.mrb[26].mxu1  ;;  %v6561_v22 = vpop.f32.mrb[27].mxu0  ;;  %6882 = vmatpush3.bf16.msra.mxu1 %v7476_v21  ;;  %6861 = vmatprep.subr.bf16.mxu0 %v7477_v24  ;;  %v7514_v12 = vld [vmem:[#allocation3 + $0xef0] sm:$0xff]   ;;  %v7519_v17 = vld [vmem:[#allocation3 + $0xe38] sm:$0xff]   ;;  %v5756_v21 = vcombine.low %v75_v19, %v75_v19 }
 0x1df   :  { %v4914_v20 = vadd.f32 %v6559_v14, %v7744_v37  ;;  %v6583_v23 = vpop.f32.mrb[27].mxu1  ;;  %6883 = vmatprep.subr.bf16.mxu1 %v7478_v26  ;;  %v5754_v37 = vcombine.low %v74_v36, %v74_v36  ;;  %v7516_v14 = vld [vmem:[#allocation3 + $0xeb0] sm:$0xff]   ;;  %v7520_v18 = vld [vmem:[#allocation3 + $0xeb8] sm:$0xff]   ;;  %v5757_v22 = vcombine.high %v75_v19, %v75_v19  ;;  %v7526_v26 = vld [vmem:[#allocation3 + $0xfc0] sm:$0xff]  }
 0x1e0   :  { %v7536_v36 = vld [vmem:[#allocation3 + $0xf90] sm:$0xff]  }
 0x1e1   :  { %v7753_v25 = vadd.f32 %v6581_v15, %v4914_v20  ;;  %6862 = vmatpush3.bf16.msra.mxu0 %v7479_v27  ;;  %v7517_v15 = vld [vmem:[#allocation3 + $0xe78] sm:$0xff]   ;;  %v76_v20 = vld [vmem:[%s7780_s0 + $0xe8] sm:$0xff]  ;;  %v7527_v27 = vld [vmem:[#allocation3 + $0xf00] sm:$0xff]  }
 0x1e2   :  { %6884 = vmatpush3.bf16.msra.mxu1 %v7480_v28  ;;  %6863 = vmatprep.subr.bf16.mxu0 %v7481_v29  ;;  %v5758_v23 = vcombine.low %v76_v20, %v76_v20  ;;  %v5759_v24 = vcombine.high %v76_v20, %v76_v20  ;;  %v7528_v28 = vld [vmem:[#allocation3 + $0xf80] sm:$0xff]   ;;  %v7529_v29 = vld [vmem:[#allocation3 + $0xf48] sm:$0xff]  }
 0x1e3   :  { %6885 = vmatprep.subr.bf16.mxu1 %v7482_v30  ;;  %v7530_v30 = vld [vmem:[#allocation3 + $0xfc8] sm:$0xff]  }
 0x1e5   :  { %6864 = vmatpush3.bf16.msra.mxu0 %v7483_v31  ;;  %v7531_v31 = vld [vmem:[#allocation3 + $0xf08] sm:$0xff]  }
 0x1e6   :  { %6886 = vmatpush3.bf16.msra.mxu1 %v7484_v32  ;;  %6893 = vmatprep.subr.bf16.mxu0 %v7489_v39  ;;  %v7532_v32 = vld [vmem:[#allocation3 + $0xf88] sm:$0xff]   ;;  %v7539_v39 = vld [vmem:[#allocation3 + $0xf18] sm:$0xff]  }
 0x1e7   :  { %6915 = vmatprep.subr.bf16.mxu1 %v7490_v40  ;;  %v7540_v40 = vld [vmem:[#allocation3 + $0xf98] sm:$0xff]  }
 0x1e8   :  { %5472 = vmatmul.mubr.bf16.vlgmr.msra.gmra.mrb[52].mxu0 %v5752_v34  ;;  %v7534_v34 = vld [vmem:[#allocation3 + $0xfd0] sm:$0xff]  }
 0x1e9   :  { %5512 = vmatmul.mubr.bf16.vlgmr.msra.gmra.mrb[52].mxu1 %v5754_v37  ;;  %6894 = vmatpush3.bf16.msra.mxu0 %v7491_v41  ;;  %v7537_v37 = vld [vmem:[#allocation3 + $0xf58] sm:$0xff]   ;;  %v7541_v41 = vld [vmem:[#allocation3 + $0xf60] sm:$0xff]  }
 0x1ea   :  { %6916 = vmatpush3.bf16.msra.mxu1 %v7492_v42  ;;  %6895 = vmatprep.subr.bf16.mxu0 %v7493_v43  ;;  %v7542_v42 = vld [vmem:[#allocation3 + $0xfe0] sm:$0xff]  }
 0x1eb   :  { %6917 = vmatprep.subr.bf16.mxu1 %v7494_v44  ;;  %5551 = vmatprep.mubr.bf16.mxu0 %v5757_v22  ;;  %v7543_v43 = vld [vmem:[#allocation3 + $0xf20] sm:$0xff]  }
 0x1ec   :  { %5591 = vmatprep.mubr.bf16.mxu1 %v5759_v24 }
 0x1ed   :  { %6896 = vmatpush3.bf16.msra.mxu0 %v7495_v45  ;;  %v7544_v45 = vld [vmem:[#allocation3 + $0xfa0] sm:$0xff]  }
 0x1ee   :  { %6918 = vmatpush3.bf16.msra.mxu1 %v7496_v46  ;;  %6897 = vmatprep.subr.bf16.mxu0 %v7497_v47 }
 0x1ef   :  { %6919 = vmatprep.subr.bf16.mxu1 %v7498_v48 }
 0x1f1   :  { %6898 = vmatpush3.bf16.msra.mxu0 %v7499_v49 }
 0x1f2   :  { %6920 = vmatpush3.bf16.msra.mxu1 %v7500_v50  ;;  %6899 = vmatprep.subr.bf16.mxu0 %v7501_v51  ;;  %v7545_v51 = vld [vmem:[#allocation3 + $0xf68] sm:$0xff]  }
 0x1f3   :  { %6921 = vmatprep.subr.bf16.mxu1 %v7502_v52 }
 0x1f5   :  { %6900 = vmatpush3.bf16.msra.mxu0 %v7503_v53  ;;  %v7546_v53 = vld [vmem:[#allocation3 + $0xfe8] sm:$0xff]  }
 0x1f6   :  { %6922 = vmatpush3.bf16.msra.mxu1 %v7504_v54  ;;  %6901 = vmatprep.subr.bf16.mxu0 %v7505_v55 }
 0x1f7   :  { %6923 = vmatprep.subr.bf16.mxu1 %v7506_v56  ;;  %v7547_v56 = vld [vmem:[#allocation3 + $0xf28] sm:$0xff]  }
 0x1f9   :  { %6902 = vmatpush3.bf16.msra.mxu0 %v7507_v58  ;;  %v7548_v58 = vld [vmem:[#allocation3 + $0xfa8] sm:$0xff]  }
 0x1fa   :  { %6924 = vmatpush3.bf16.msra.mxu1 %v7508_v60  ;;  %6903 = vmatprep.subr.bf16.mxu0 %v7509_v63  ;;  %v7551_v63 = vld [vmem:[#allocation3 + $0xf30] sm:$0xff]  }
 0x1fb   :  { %v6601_v57 = vpop.f32.mrb[28].mxu0  ;;  %6925 = vmatprep.subr.bf16.mxu1 %v7510_v2  ;;  %v7554_v2 = vld [vmem:[#allocation3 + $0xff8] sm:$0xff]  }
 0x1fc   :  { %v6623_v59 = vpop.f32.mrb[28].mxu1  ;;  %v6602_v61 = vpop.f32.mrb[29].mxu0 }
 0x1fd   :  { %v6624_v62 = vpop.f32.mrb[29].mxu1  ;;  %v6603_v0 = vadd.f32 %v6602_v61, %v6601_v57  ;;  %v6604_v3 = vpop.f32.mrb[30].mxu0  ;;  %6904 = vmatpush3.bf16.msra.mxu0 %v7511_v5  ;;  %v7549_v61 = vld [vmem:[#allocation3 + $0xf70] sm:$0xff]  }
 0x1fe   :  { %v6625_v1 = vadd.f32 %v6624_v62, %v6623_v59  ;;  %v6626_v4 = vpop.f32.mrb[30].mxu1  ;;  %v6605_v8 = vpop.f32.mrb[31].mxu0  ;;  %6926 = vmatpush3.bf16.msra.mxu1 %v7512_v7  ;;  %6905 = vmatprep.subr.bf16.mxu0 %v7513_v10  ;;  %v7550_v62 = vld [vmem:[#allocation3 + $0xff0] sm:$0xff]   ;;  %v7555_v3 = vld [vmem:[#allocation3 + $0xf38] sm:$0xff]  }
 0x1ff   :  { %v4994_v6 = vadd.f32 %v6603_v0, %v7753_v25  ;;  %v6627_v9 = vpop.f32.mrb[31].mxu1  ;;  %6927 = vmatprep.subr.bf16.mxu1 %v7514_v12  ;;  %v7525_v25 = vld [vmem:[#allocation3 + $0xf40] sm:$0xff]   ;;  %v7552_v0 = vld [vmem:[#allocation3 + $0xfb0] sm:$0xff]   ;;  %v7556_v4 = vld [vmem:[#allocation3 + $0xfb8] sm:$0xff]  }
 0x200   :  { %v77_v5 = vld [vmem:[%s7780_s0 + $0xf0] sm:$0xff] }
 0x201   :  { %v7762_v11 = vadd.f32 %v6625_v1, %v4994_v6  ;;  %6906 = vmatpush3.bf16.msra.mxu0 %v7515_v13  ;;  %v7553_v1 = vld [vmem:[#allocation3 + $0xf78] sm:$0xff]   ;;  %v5760_v7 = vcombine.low %v77_v5, %v77_v5  ;;  %v5761_v8 = vcombine.high %v77_v5, %v77_v5 }
 0x202   :  { %6928 = vmatpush3.bf16.msra.mxu1 %v7516_v14  ;;  %6907 = vmatprep.subr.bf16.mxu0 %v7517_v15  ;;  %v78_v6 = vld [vmem:[%s7780_s0 + $0xf8] sm:$0xff] }
 0x203   :  { %6929 = vmatprep.subr.bf16.mxu1 %v7518_v16  ;;  %v5762_v9 = vcombine.low %v78_v6, %v78_v6  ;;  %v5763_v10 = vcombine.high %v78_v6, %v78_v6 }
 0x205   :  { %6908 = vmatpush3.bf16.msra.mxu0 %v7519_v17 }
 0x206   :  { %6930 = vmatpush3.bf16.msra.mxu1 %v7520_v18  ;;  %6937 = vmatprep.subr.bf16.mxu0 %v7525_v25 }
 0x207   :  { %6959 = vmatprep.subr.bf16.mxu1 %v7526_v26 }
 0x208   :  { %5552 = vmatmul.mubr.bf16.vlgmr.msra.gmra.mrb[56].mxu0 %v5756_v21 }
 0x209   :  { %5592 = vmatmul.mubr.bf16.vlgmr.msra.gmra.mrb[56].mxu1 %v5758_v23  ;;  %6938 = vmatpush3.bf16.msra.mxu0 %v7527_v27 }
 0x20a   :  { %6960 = vmatpush3.bf16.msra.mxu1 %v7528_v28  ;;  %6939 = vmatprep.subr.bf16.mxu0 %v7529_v29 }
 0x20b   :  { %6961 = vmatprep.subr.bf16.mxu1 %v7530_v30  ;;  %5631 = vmatprep.mubr.bf16.mxu0 %v5761_v8 }
 0x20c   :  { %5671 = vmatprep.mubr.bf16.mxu1 %v5763_v10 }
 0x20d   :  { %6940 = vmatpush3.bf16.msra.mxu0 %v7531_v31 }
 0x20e   :  { %6962 = vmatpush3.bf16.msra.mxu1 %v7532_v32  ;;  %6941 = vmatprep.subr.bf16.mxu0 %v7533_v33 }
 0x20f   :  { %6963 = vmatprep.subr.bf16.mxu1 %v7534_v34 }
 0x211   :  { %6942 = vmatpush3.bf16.msra.mxu0 %v7535_v35 }
 0x212   :  { %6964 = vmatpush3.bf16.msra.mxu1 %v7536_v36  ;;  %6943 = vmatprep.subr.bf16.mxu0 %v7537_v37 }
 0x213   :  { %6965 = vmatprep.subr.bf16.mxu1 %v7538_v38 }
 0x215   :  { %6944 = vmatpush3.bf16.msra.mxu0 %v7539_v39 }
 0x216   :  { %6966 = vmatpush3.bf16.msra.mxu1 %v7540_v40  ;;  %6945 = vmatprep.subr.bf16.mxu0 %v7541_v41 }
 0x217   :  { %6967 = vmatprep.subr.bf16.mxu1 %v7542_v42 }
 0x219   :  { %6946 = vmatpush3.bf16.msra.mxu0 %v7543_v43 }
 0x21a   :  { %6968 = vmatpush3.bf16.msra.mxu1 %v7544_v45  ;;  %6947 = vmatprep.subr.bf16.mxu0 %v7545_v51 }
 0x21b   :  { %v6645_v44 = vpop.f32.mrb[32].mxu0  ;;  %6969 = vmatprep.subr.bf16.mxu1 %v7546_v53 }
 0x21c   :  { %v6667_v46 = vpop.f32.mrb[32].mxu1  ;;  %v6646_v47 = vpop.f32.mrb[33].mxu0 }
 0x21d   :  { %v6668_v48 = vpop.f32.mrb[33].mxu1  ;;  %v6647_v49 = vadd.f32 %v6646_v47, %v6645_v44  ;;  %v6648_v52 = vpop.f32.mrb[34].mxu0  ;;  %6948 = vmatpush3.bf16.msra.mxu0 %v7547_v56 }
 0x21e   :  { %v6669_v50 = vadd.f32 %v6668_v48, %v6667_v46  ;;  %v6670_v54 = vpop.f32.mrb[34].mxu1  ;;  %v6649_v57 = vpop.f32.mrb[35].mxu0  ;;  %6970 = vmatpush3.bf16.msra.mxu1 %v7548_v58  ;;  %6949 = vmatprep.subr.bf16.mxu0 %v7549_v61 }
 0x21f   :  { %v5074_v55 = vadd.f32 %v6647_v49, %v7762_v11  ;;  %v6671_v59 = vpop.f32.mrb[35].mxu1  ;;  %6971 = vmatprep.subr.bf16.mxu1 %v7550_v62 }
 0x221   :  { %v5114_v60 = vadd.f32 %v6669_v50, %v5074_v55  ;;  %6950 = vmatpush3.bf16.msra.mxu0 %v7551_v63 }
 0x222   :  { %6972 = vmatpush3.bf16.msra.mxu1 %v7552_v0  ;;  %6951 = vmatprep.subr.bf16.mxu0 %v7553_v1 }
 0x223   :  { %6973 = vmatprep.subr.bf16.mxu1 %v7554_v2 }
 0x225   :  { %6952 = vmatpush3.bf16.msra.mxu0 %v7555_v3 }
 0x226   :  { %6974 = vmatpush3.bf16.msra.mxu1 %v7556_v4 }
 0x228   :  { %5632 = vmatmul.mubr.bf16.vlgmr.msra.gmra.mrb[60].mxu0 %v5760_v7 }
 0x229   :  { %5672 = vmatmul.mubr.bf16.vlgmr.msra.gmra.mrb[60].mxu1 %v5762_v9 }
 0x23b   :  { %v6689_v11 = vpop.f32.mrb[36].mxu0 }
 0x23c   :  { %v6711_v12 = vpop.f32.mrb[36].mxu1  ;;  %v6690_v13 = vpop.f32.mrb[37].mxu0 }
 0x23d   :  { %v6712_v14 = vpop.f32.mrb[37].mxu1  ;;  %v6691_v15 = vadd.f32 %v6690_v13, %v6689_v11  ;;  %v6692_v17 = vpop.f32.mrb[38].mxu0 }
 0x23e   :  { %v6713_v16 = vadd.f32 %v6712_v14, %v6711_v12  ;;  %v6714_v18 = vpop.f32.mrb[38].mxu1  ;;  %v6693_v19 = vpop.f32.mrb[39].mxu0 }
 0x23f   :  { %v6715_v20 = vpop.f32.mrb[39].mxu1  ;;  %v5154_v21 = vadd.f32 %v6691_v15, %v5114_v60 }
 0x241   :  { %v5194_v22 = vadd.f32 %v6713_v16, %v5154_v21 }
 0x25b   :  { %v6733_v23 = vpop.f32.mrb[40].mxu0 }
 0x25c   :  { %v6755_v24 = vpop.f32.mrb[40].mxu1  ;;  %v6734_v25 = vpop.f32.mrb[41].mxu0 }
 0x25d   :  { %v6735_v26 = vadd.f32 %v6734_v25, %v6733_v23  ;;  %v6756_v27 = vpop.f32.mrb[41].mxu1  ;;  %v6736_v28 = vpop.f32.mrb[42].mxu0 }
 0x25e   :  { %v6757_v29 = vadd.f32 %v6756_v27, %v6755_v24  ;;  %v6758_v30 = vpop.f32.mrb[42].mxu1  ;;  %v6737_v31 = vpop.f32.mrb[43].mxu0 }
 0x25f   :  { %v5234_v32 = vadd.f32 %v6735_v26, %v5194_v22  ;;  %v6759_v33 = vpop.f32.mrb[43].mxu1  ;;  %v6276_v30 = vld [vmem:[#allocation5] ss:$0 sm:$0xff] }
 0x261   :  { %v5274_v34 = vadd.f32 %v6757_v29, %v5234_v32 }
 0x27b   :  { %v6777_v35 = vpop.f32.mrb[44].mxu0 }
 0x27c   :  { %v6799_v36 = vpop.f32.mrb[44].mxu1  ;;  %v6778_v37 = vpop.f32.mrb[45].mxu0 }
 0x27d   :  { %v6779_v38 = vadd.f32 %v6778_v37, %v6777_v35  ;;  %v6800_v39 = vpop.f32.mrb[45].mxu1  ;;  %v6780_v40 = vpop.f32.mrb[46].mxu0 }
 0x27e   :  { %v6801_v41 = vadd.f32 %v6800_v39, %v6799_v36  ;;  %v6802_v42 = vpop.f32.mrb[46].mxu1  ;;  %v6781_v43 = vpop.f32.mrb[47].mxu0 }
 0x27f   :  { %v5314_v44 = vadd.f32 %v6779_v38, %v5274_v34  ;;  %v6803_v45 = vpop.f32.mrb[47].mxu1 }
 0x281   :  { %v5354_v46 = vadd.f32 %v6801_v41, %v5314_v44 }
 0x29b   :  { %v6821_v47 = vpop.f32.mrb[48].mxu0 }
 0x29c   :  { %v6843_v48 = vpop.f32.mrb[48].mxu1  ;;  %v6822_v49 = vpop.f32.mrb[49].mxu0 }
 0x29d   :  { %v6823_v50 = vadd.f32 %v6822_v49, %v6821_v47  ;;  %v6844_v51 = vpop.f32.mrb[49].mxu1  ;;  %v6824_v52 = vpop.f32.mrb[50].mxu0 }
 0x29e   :  { %v6845_v53 = vadd.f32 %v6844_v51, %v6843_v48  ;;  %v6846_v54 = vpop.f32.mrb[50].mxu1  ;;  %v6825_v55 = vpop.f32.mrb[51].mxu0 }
 0x29f   :  { %v5394_v56 = vadd.f32 %v6823_v50, %v5354_v46  ;;  %v6847_v57 = vpop.f32.mrb[51].mxu1 }
 0x2a1   :  { %v5434_v58 = vadd.f32 %v6845_v53, %v5394_v56 }
 0x2bb   :  { %v6865_v59 = vpop.f32.mrb[52].mxu0 }
 0x2bc   :  { %v6887_v60 = vpop.f32.mrb[52].mxu1  ;;  %v6866_v61 = vpop.f32.mrb[53].mxu0 }
 0x2bd   :  { %v6888_v62 = vpop.f32.mrb[53].mxu1  ;;  %v6867_v63 = vadd.f32 %v6866_v61, %v6865_v59  ;;  %v6868_v1 = vpop.f32.mrb[54].mxu0 }
 0x2be   :  { %v6889_v0 = vadd.f32 %v6888_v62, %v6887_v60  ;;  %v6890_v2 = vpop.f32.mrb[54].mxu1  ;;  %v6869_v3 = vpop.f32.mrb[55].mxu0 }
 0x2bf   :  { %v6891_v4 = vpop.f32.mrb[55].mxu1  ;;  %v5474_v5 = vadd.f32 %v6867_v63, %v5434_v58 }
 0x2c1   :  { %v5514_v6 = vadd.f32 %v6889_v0, %v5474_v5 }
 0x2db   :  { %v6909_v7 = vpop.f32.mrb[56].mxu0 }
 0x2dc   :  { %v6931_v8 = vpop.f32.mrb[56].mxu1  ;;  %v6910_v9 = vpop.f32.mrb[57].mxu0 }
 0x2dd   :  { %v6911_v10 = vadd.f32 %v6910_v9, %v6909_v7  ;;  %v6932_v11 = vpop.f32.mrb[57].mxu1  ;;  %v6912_v12 = vpop.f32.mrb[58].mxu0 }
 0x2de   :  { %v6933_v13 = vadd.f32 %v6932_v11, %v6931_v8  ;;  %v6934_v14 = vpop.f32.mrb[58].mxu1  ;;  %v6913_v15 = vpop.f32.mrb[59].mxu0 }
 0x2df   :  { %v5554_v16 = vadd.f32 %v6911_v10, %v5514_v6  ;;  %v6935_v17 = vpop.f32.mrb[59].mxu1 }
 0x2e1   :  { %v5594_v18 = vadd.f32 %v6933_v13, %v5554_v16 }
 0x2fb   :  { %v6953_v19 = vpop.f32.mrb[60].mxu0 }
 0x2fc   :  { %v6975_v20 = vpop.f32.mrb[60].mxu1  ;;  %v6954_v21 = vpop.f32.mrb[61].mxu0 }
 0x2fd   :  { %v6955_v22 = vadd.f32 %v6954_v21, %v6953_v19  ;;  %v6976_v23 = vpop.f32.mrb[61].mxu1  ;;  %v6956_v24 = vpop.f32.mrb[62].mxu0 }
 0x2fe   :  { %v6977_v25 = vadd.f32 %v6976_v23, %v6975_v20  ;;  %v6978_v26 = vpop.f32.mrb[62].mxu1  ;;  %v6957_v27 = vpop.f32.mrb[63].mxu0 }
 0x2ff   :  { %v5634_v28 = vadd.f32 %v6955_v22, %v5594_v18  ;;  %v6979_v29 = vpop.f32.mrb[63].mxu1 }
 0x301   :  { %v5674_v31 = vadd.f32 %v6977_v25, %v5634_v28 }
 0x303   :  { %v5692_v32 = vadd.f32 %v6276_v30, %v5674_v31 }
 0x305   :  { %5693 = vst [vmem:[%s7783_s3] sm:$0xff] %v5692_v32 }
 0x306   :  { %5698 = vsyncpa [#allocation4], 1 }
 0x307   :  { %5699 = vsyncpa [#allocation6], 1 }

</bundles_post_ra>
